<compile_context>
chip_gen: v6e
topology: v6e:2x2x1
jax: 0.10.0
libtpu: 0.0.40
codegen_flags: <defaults>
</compile_context>

<pallas_src>
import functools

import jax
import jax.numpy as jnp
from jax import lax
from jax.experimental import pallas as pl
from jax.experimental.pallas import tpu as pltpu


def _round_up(x, m):
    return -(-x // m) * m


# ---------------------------------------------------------------------------
# Fused multi-layer LSTM kernel (grid over batch blocks)
# ---------------------------------------------------------------------------
def encoder_lstm_kernel(x_ref, wih0_ref, b0_ref, whh_ref, *rest,
                        num_layers, seq_len, batch, hidden, embed_dim,
                        time_chunk, unroll):
    """Fused multi-layer LSTM recurrence for one batch block.

      x_ref     : (T, Bb, E_pad)  matmul dtype   embedded input block
      wih0_ref  : (E_pad, 4H)     matmul dtype   layer-0 input weights (transposed)
      b0_ref    : (1, 4H) f32                    layer-0 bias (b_ih + b_hh)
      whh_ref   : (L, H, 4H)      matmul dtype   recurrent weights (transposed)
      [L > 1 only]
      wih_ref   : (L-1, H, 4H)    matmul dtype   layer>=1 input weights (transposed)
      brest_ref : (L-1, 1, 4H) f32               layer>=1 biases
      hid_ref   : (L, Bb, H) f32                 final hidden state per layer
      cell_ref  : (L, Bb, H) f32                 final cell state per layer
      [L > 1 only] seq_ref : (T, Bb, H) matmul dtype   layer output sequence (VMEM)
      gates_ref : (Tc, Bb, 4H) f32               per-chunk gate pre-activations
    """
    H = hidden
    Bb = batch
    Tc = time_chunk

    if num_layers > 1:
        wih_ref, brest_ref, hid_ref, cell_ref, seq_ref, gates_ref = rest
    else:
        hid_ref, cell_ref, gates_ref = rest
        wih_ref = brest_ref = seq_ref = None

    def run_layer(layer_idx, in_ref, in_dim, wih, bias, store_seq):
        whh = whh_ref[layer_idx]                                   # (H, 4H)

        def chunk(t0, nsteps, carry):
            # (a) hoisted input projection for this time-chunk: one big matmul.
            xin = in_ref[pl.ds(t0, nsteps)]                        # (n, Bb, in_dim)
            xin2 = xin.reshape(nsteps * Bb, in_dim).astype(wih.dtype)
            g = jnp.dot(xin2, wih, preferred_element_type=jnp.float32) + bias
            gates_ref[pl.ds(0, nsteps)] = g.reshape(nsteps, Bb, 4 * H)

            # (b) serial recurrence over the chunk (only h @ W_hh^T per step).
            def step(tloc, hc):
                h, c = hc
                gt = gates_ref[tloc] + jnp.dot(
                    h.astype(whh.dtype), whh, preferred_element_type=jnp.float32)
                # PyTorch gate order i, f, g, o — 128-lane aligned slices.
                i_g = jax.nn.sigmoid(gt[:, 0 * H:1 * H])
                f_g = jax.nn.sigmoid(gt[:, 1 * H:2 * H])
                g_g = jnp.tanh(gt[:, 2 * H:3 * H])
                o_g = jax.nn.sigmoid(gt[:, 3 * H:4 * H])
                c_new = f_g * c + i_g * g_g
                h_new = o_g * jnp.tanh(c_new)
                if store_seq:
                    # Safe in-place reuse: rows [t0, t0+n) of seq_ref were
                    # already consumed by this chunk's projection above.
                    seq_ref[t0 + tloc] = h_new.astype(seq_ref.dtype)
                return (h_new, c_new)

            return lax.fori_loop(0, nsteps, step, carry,
                                 unroll=min(nsteps, unroll))

        carry = (jnp.zeros((Bb, H), jnp.float32),
                 jnp.zeros((Bb, H), jnp.float32))
        n_full = seq_len // Tc
        rem = seq_len - n_full * Tc
        if n_full > 0:
            carry = lax.fori_loop(0, n_full,
                                  lambda ci, c: chunk(ci * Tc, Tc, c), carry)
        if rem > 0:
            carry = chunk(n_full * Tc, rem, carry)
        h_fin, c_fin = carry
        hid_ref[layer_idx] = h_fin
        cell_ref[layer_idx] = c_fin

    # Layer 0 reads the embedded input block; layers >= 1 read (and overwrite,
    # chunk by chunk) the previous layer's VMEM-resident output sequence.
    run_layer(0, x_ref, embed_dim, wih0_ref[...], b0_ref[...],
              store_seq=(num_layers > 1))
    for l in range(1, num_layers):
        run_layer(l, seq_ref, H, wih_ref[l - 1], brest_ref[l - 1],
                  store_seq=(l < num_layers - 1))


# ---------------------------------------------------------------------------
# Parameter padding helpers (gate-blocked padding keeps real outputs exact)
# ---------------------------------------------------------------------------
def _pad_gate_mat_t(w, H, H_pad, in_pad, dtype):
    """w: (4H, in_dim) PyTorch layout -> (in_pad, 4*H_pad) transposed, with each
    of the 4 gate blocks zero-padded H -> H_pad and the input dim -> in_pad."""
    four_h, in_dim = w.shape
    w4 = w.reshape(4, H, in_dim).astype(jnp.float32)
    w4p = jnp.zeros((4, H_pad, in_pad), jnp.float32).at[:, :H, :in_dim].set(w4)
    return w4p.reshape(4 * H_pad, in_pad).T.astype(dtype)


def _pad_gate_bias(b_ih, b_hh, H, H_pad):
    b = (b_ih + b_hh).reshape(4, H).astype(jnp.float32)
    bp = jnp.zeros((4, H_pad), jnp.float32).at[:, :H].set(b)
    return bp.reshape(1, 4 * H_pad)


# ---------------------------------------------------------------------------
# Encoder forward
# ---------------------------------------------------------------------------
def encoder_forward(params, x_ids, matmul_dtype=jnp.bfloat16,
                    batch_blocks=1, time_chunk=64):
    """x_ids: (B, T) int32 -> (hidden, cell), each (num_layers, B, H).

    matmul_dtype : operand dtype for all MXU matmuls (bf16 default; gate math,
                   state and accumulation stay f32).
    batch_blocks : number of grid points over the batch ("parallel" axis;
                   set to 2 on a 2-TensorCore chip when B_pad >= 16).
    time_chunk   : timesteps per hoisted input-projection matmul / gate buffer.
    """
    B, T = x_ids.shape
    E = params["embedding"].shape[1]
    H = params["lstm"][0]["w_hh"].shape[1]
    L = len(params["lstm"])

    B_pad = _round_up(B, 8 * batch_blocks)     # each block a sublane multiple
    Bblk = B_pad // batch_blocks
    H_pad = _round_up(H, 128)                  # lane-aligned gate slices
    # TODO(synk): at H << 128 this pad dominates cost; pack lanes if it matters.
    E_pad = _round_up(E, 128)
    Tc = max(1, min(time_chunk, T))
    four_h = 4 * H_pad

    # Embedding lookup (plain-JAX gather) + dropout (identity, eval mode).
    emb = jnp.take(params["embedding"], x_ids, axis=0)             # (B, T, E)
    x_tbe = jnp.transpose(emb, (1, 0, 2)).astype(matmul_dtype)     # (T, B, E)
    x_pad = jnp.zeros((T, B_pad, E_pad), matmul_dtype).at[:, :B, :E].set(x_tbe)

    lp0 = params["lstm"][0]
    wih0_t = _pad_gate_mat_t(lp0["w_ih"], H, H_pad, E_pad, matmul_dtype)
    b0 = _pad_gate_bias(lp0["b_ih"], lp0["b_hh"], H, H_pad)
    whh_all = jnp.stack(
        [_pad_gate_mat_t(lp["w_hh"], H, H_pad, H_pad, matmul_dtype)
         for lp in params["lstm"]])                                # (L, H_pad, 4H)

    operands = [x_pad, wih0_t, b0, whh_all]
    in_specs = [
        pl.BlockSpec((T, Bblk, E_pad), lambda j: (0, j, 0)),
        pl.BlockSpec((E_pad, four_h), lambda j: (0, 0)),
        pl.BlockSpec((1, four_h), lambda j: (0, 0)),
        pl.BlockSpec((L, H_pad, four_h), lambda j: (0, 0, 0)),
    ]
    if L > 1:   # no dummy weight stacks are shipped for single-layer encoders
        wih_rest = jnp.stack(
            [_pad_gate_mat_t(lp["w_ih"], H, H_pad, H_pad, matmul_dtype)
             for lp in params["lstm"][1:]])                        # (L-1, H_pad, 4H)
        b_rest = jnp.stack(
            [_pad_gate_bias(lp["b_ih"], lp["b_hh"], H, H_pad)
             for lp in params["lstm"][1:]])                        # (L-1, 1, 4H)
        operands += [wih_rest, b_rest]
        in_specs += [
            pl.BlockSpec((L - 1, H_pad, four_h), lambda j: (0, 0, 0)),
            pl.BlockSpec((L - 1, 1, four_h), lambda j: (0, 0, 0)),
        ]

    scratch_shapes = []
    if L > 1:
        scratch_shapes.append(pltpu.VMEM((T, Bblk, H_pad), matmul_dtype))  # seq
    scratch_shapes.append(pltpu.VMEM((Tc, Bblk, four_h), jnp.float32))     # gates

    # Scoped-VMEM limit from the actual resident footprint (+ headroom).
    msize = jnp.dtype(matmul_dtype).itemsize
    resident = (
        2 * T * Bblk * E_pad * msize                                   # x block
        + 2 * (E_pad * four_h * msize + four_h * 4)                    # wih0 + b0
        + 2 * L * H_pad * four_h * msize                               # whh
        + 2 * max(L - 1, 0) * (H_pad * four_h * msize + four_h * 4)    # wih_rest
        + 2 * 2 * L * Bblk * H_pad * 4                                 # hid + cell
        + (T * Bblk * H_pad * msize if L > 1 else 0)                   # seq scratch
        + Tc * Bblk * four_h * 4)                                      # gate scratch
    vmem_limit = min(max(int(resident) + (8 << 20), 32 << 20), 100 << 20)

    kernel = functools.partial(
        encoder_lstm_kernel, num_layers=L, seq_len=T, batch=Bblk,
        hidden=H_pad, embed_dim=E_pad, time_chunk=Tc, unroll=8)

    hidden_p, cell_p = pl.pallas_call(
        kernel,
        grid=(batch_blocks,),
        in_specs=in_specs,
        out_specs=(pl.BlockSpec((L, Bblk, H_pad), lambda j: (0, j, 0)),
                   pl.BlockSpec((L, Bblk, H_pad), lambda j: (0, j, 0))),
        out_shape=(jax.ShapeDtypeStruct((L, B_pad, H_pad), jnp.float32),
                   jax.ShapeDtypeStruct((L, B_pad, H_pad), jnp.float32)),
        scratch_shapes=scratch_shapes,
        compiler_params=pltpu.CompilerParams(
            dimension_semantics=("parallel",),
            vmem_limit_bytes=vmem_limit),
    )(*operands)

    # Strip batch / hidden padding (recurrence is row-independent; padded
    # hidden columns are exact zeros).
    return hidden_p[:, :B, :H], cell_p[:, :B, :H]


# ---------------------------------------------------------------------------
# Params + pure-JAX reference
# ---------------------------------------------------------------------------
def init_encoder_params(key, input_size, embedding_size, hidden_size, num_layers):
    keys = jax.random.split(key, 1 + 4 * num_layers)
    params = {
        "embedding": jax.random.normal(keys[0], (input_size, embedding_size),
                                       jnp.float32) * 0.1,
        "lstm": [],
    }
    scale = 1.0 / jnp.sqrt(hidden_size)
    for l in range(num_layers):
        in_dim = embedding_size if l == 0 else hidden_size
        k = keys[1 + 4 * l:1 + 4 * (l + 1)]
        params["lstm"].append({
            "w_ih": jax.random.uniform(k[0], (4 * hidden_size, in_dim),
                                       jnp.float32, -scale, scale),
            "w_hh": jax.random.uniform(k[1], (4 * hidden_size, hidden_size),
                                       jnp.float32, -scale, scale),
            "b_ih": jax.random.uniform(k[2], (4 * hidden_size,),
                                       jnp.float32, -scale, scale),
            "b_hh": jax.random.uniform(k[3], (4 * hidden_size,),
                                       jnp.float32, -scale, scale),
        })
    return params


def _lstm_reference(params, x_ids):
    embedded = jnp.take(params["embedding"], x_ids, axis=0)
    layer_in = jnp.transpose(embedded, (1, 0, 2))                  # (T, B, E)
    hiddens, cells = [], []
    for lp in params["lstm"]:
        Bv = layer_in.shape[1]
        H = lp["w_hh"].shape[1]
        h0 = jnp.zeros((Bv, H), jnp.float32)
        c0 = jnp.zeros((Bv, H), jnp.float32)

        def step(carry, x_t, lp=lp, H=H):
            h, c = carry
            gates = x_t @ lp["w_ih"].T + h @ lp["w_hh"].T + lp["b_ih"] + lp["b_hh"]
            i = jax.nn.sigmoid(gates[:, 0 * H:1 * H])
            f = jax.nn.sigmoid(gates[:, 1 * H:2 * H])
            g = jnp.tanh(gates[:, 2 * H:3 * H])
            o = jax.nn.sigmoid(gates[:, 3 * H:4 * H])
            c_new = f * c + i * g
            h_new = o * jnp.tanh(c_new)
            return (h_new, c_new), h_new

        (h_fin, c_fin), outs = jax.lax.scan(step, (h0, c0), layer_in)
        hiddens.append(h_fin)
        cells.append(c_fin)
        layer_in = outs
    return jnp.stack(hiddens, 0), jnp.stack(cells, 0)


if __name__ == "__main__":
    input_size = 50
    embedding_size = 32
    hidden_size = 32
    num_layers = 2
    batch = 2
    seq = 8

    key = jax.random.PRNGKey(0)
    pkey, xkey = jax.random.split(key)
    params = init_encoder_params(pkey, input_size, embedding_size,
                                 hidden_size, num_layers)
    x_ids = jax.random.randint(xkey, (batch, seq), 0, input_size, jnp.int32)

    fwd = jax.jit(encoder_forward,
                  static_argnames=("matmul_dtype", "batch_blocks", "time_chunk"))

    h_ref, c_ref = _lstm_reference(params, x_ids)

    # Default path: bf16 matmul operands (MXU-native on all chips), f32 gate math.
    hidden_bf, cell_bf = jax.block_until_ready(fwd(params, x_ids))
    assert hidden_bf.shape == (num_layers, batch, hidden_size)
    assert cell_bf.shape == (num_layers, batch, hidden_size)
    assert jnp.allclose(hidden_bf, h_ref, atol=5e-2, rtol=5e-2)
    assert jnp.allclose(cell_bf, c_ref, atol=5e-2, rtol=5e-2)

    # f32 matmul-operand path: near-exact vs reference.
    hidden_f32, cell_f32 = jax.block_until_ready(
        fwd(params, x_ids, matmul_dtype=jnp.float32))
    assert jnp.allclose(hidden_f32, h_ref, atol=1e-5, rtol=1e-5)
    assert jnp.allclose(cell_f32, c_ref, atol=1e-5, rtol=1e-5)

    # Exercise the single-layer path, the multi-block ("parallel") grid and the
    # time-chunk remainder path.
    params1 = init_encoder_params(jax.random.PRNGKey(1), input_size,
                                  embedding_size, hidden_size, 1)
    x_ids2 = jax.random.randint(jax.random.PRNGKey(2), (16, seq), 0,
                                input_size, jnp.int32)
    h1, c1 = jax.block_until_ready(
        fwd(params1, x_ids2, matmul_dtype=jnp.float32,
            batch_blocks=2, time_chunk=3))
    h1_ref, c1_ref = _lstm_reference(params1, x_ids2)
    assert jnp.allclose(h1, h1_ref, atol=1e-5, rtol=1e-5)
    assert jnp.allclose(c1, c1_ref, atol=1e-5, rtol=1e-5)

    print("KERNEL_OK")
</pallas_src>

<mosaic_0001>
module attributes {stable_mosaic.version = 11 : i64} {
  func.func @encoder_lstm_kernel(%arg0: i32, %arg1: memref<8x8x128xbf16, #tpu.memory_space<vmem>>, %arg2: memref<128x512xbf16, #tpu.memory_space<vmem>>, %arg3: memref<1x512xf32, #tpu.memory_space<vmem>>, %arg4: memref<2x128x512xbf16, #tpu.memory_space<vmem>>, %arg5: memref<1x128x512xbf16, #tpu.memory_space<vmem>>, %arg6: memref<1x1x512xf32, #tpu.memory_space<vmem>>, %arg7: memref<2x8x128xf32, #tpu.memory_space<vmem>>, %arg8: memref<2x8x128xf32, #tpu.memory_space<vmem>>, %arg9: memref<8x8x128xbf16, #tpu.memory_space<vmem>>, %arg10: memref<8x8x512xf32, #tpu.memory_space<vmem>>) attributes {dimension_semantics = [#tpu.dimension_semantics<parallel>], iteration_bounds = array<i64: 1>, scalar_prefetch = 0 : i64, scratch_operands = 2 : i64, tpu.core_type = #tpu.core_type<tc>, window_params = [{transform_indices = @transform_0, window_bounds = array<i64: 8, 8, 128>}, {pipeline_mode = #tpu.pipeline_mode<synchronous>, transform_indices = @transform_1, window_bounds = array<i64: 128, 512>}, {pipeline_mode = #tpu.pipeline_mode<synchronous>, transform_indices = @transform_2, window_bounds = array<i64: 1, 512>}, {pipeline_mode = #tpu.pipeline_mode<synchronous>, transform_indices = @transform_3, window_bounds = array<i64: 2, 128, 512>}, {pipeline_mode = #tpu.pipeline_mode<synchronous>, transform_indices = @transform_4, window_bounds = array<i64: 1, 128, 512>}, {pipeline_mode = #tpu.pipeline_mode<synchronous>, transform_indices = @transform_5, window_bounds = array<i64: 1, 1, 512>}, {transform_indices = @transform_6, window_bounds = array<i64: 2, 8, 128>}, {transform_indices = @transform_7, window_bounds = array<i64: 2, 8, 128>}]} {
    %c0 = arith.constant 0 : index
    %c0_0 = arith.constant 0 : index
    %0 = vector.load %arg2[%c0, %c0_0] : memref<128x512xbf16, #tpu.memory_space<vmem>>, vector<128x512xbf16>
    %c0_1 = arith.constant 0 : index
    %c0_2 = arith.constant 0 : index
    %1 = vector.load %arg3[%c0_1, %c0_2] : memref<1x512xf32, #tpu.memory_space<vmem>>, vector<1x512xf32>
    %c0_3 = arith.constant 0 : index
    %c0_4 = arith.constant 0 : index
    %c0_5 = arith.constant 0 : index
    %2 = vector.load %arg4[%c0_3, %c0_4, %c0_5] : memref<2x128x512xbf16, #tpu.memory_space<vmem>>, vector<1x128x512xbf16>
    %3 = vector.shape_cast %2 : vector<1x128x512xbf16> to vector<128x512xbf16>
    %cst = arith.constant 0.000000e+00 : f32
    %4 = vector.broadcast %cst : f32 to vector<8x128xf32>
    %cst_6 = arith.constant 0.000000e+00 : f32
    %5 = vector.broadcast %cst_6 : f32 to vector<8x128xf32>
    %c0_i32 = arith.constant 0 : i32
    %c8_i32 = arith.constant 8 : i32
    %6 = arith.muli %c0_i32, %c8_i32 : i32
    %7 = arith.index_cast %6 : i32 to index
    %c0_7 = arith.constant 0 : index
    %c0_8 = arith.constant 0 : index
    %8 = vector.load %arg1[%7, %c0_7, %c0_8] : memref<8x8x128xbf16, #tpu.memory_space<vmem>>, vector<8x8x128xbf16>
    %9 = vector.shape_cast %8 : vector<8x8x128xbf16> to vector<64x128xbf16>
    %cst_9 = arith.constant dense<0.000000e+00> : vector<64x512xf32>
    %10 = tpu.matmul %9, %0, %cst_9 {dimension_numbers = #tpu.dot_dimension_numbers<[1], [0], [0], [1], [0, 0, 1, 1], [], []>} : vector<64x128xbf16>, vector<128x512xbf16>, vector<64x512xf32> -> vector<64x512xf32>
    %11 = vector.broadcast %1 : vector<1x512xf32> to vector<64x512xf32>
    %12 = arith.addf %10, %11 : vector<64x512xf32>
    %13 = vector.shape_cast %12 : vector<64x512xf32> to vector<8x8x512xf32>
    %c0_10 = arith.constant 0 : index
    %c0_11 = arith.constant 0 : index
    %c0_12 = arith.constant 0 : index
    %14 = vector.load %arg10[%c0_10, %c0_11, %c0_12] : memref<8x8x512xf32, #tpu.memory_space<vmem>>, vector<8x8x512xf32>
    tpu.vector_store %arg10[%c0_10, %c0_11, %c0_12], %13 {strides = array<i32>} : memref<8x8x512xf32, #tpu.memory_space<vmem>>, vector<8x8x512xf32>,
    %c0_i32_13 = arith.constant 0 : i32
    %15 = arith.index_cast %c0_i32_13 : i32 to index
    %c0_14 = arith.constant 0 : index
    %c0_15 = arith.constant 0 : index
    %16 = vector.load %arg10[%15, %c0_14, %c0_15] : memref<8x8x512xf32, #tpu.memory_space<vmem>>, vector<1x8x512xf32>
    %17 = vector.shape_cast %16 : vector<1x8x512xf32> to vector<8x512xf32>
    %18 = arith.truncf %4 : vector<8x128xf32> to vector<8x128xbf16>
    %cst_16 = arith.constant dense<0.000000e+00> : vector<8x512xf32>
    %19 = tpu.matmul %18, %3, %cst_16 {dimension_numbers = #tpu.dot_dimension_numbers<[1], [0], [0], [1], [0, 0, 1, 1], [], []>} : vector<8x128xbf16>, vector<128x512xbf16>, vector<8x512xf32> -> vector<8x512xf32>
    %20 = arith.addf %17, %19 : vector<8x512xf32>
    %21 = vector.extract_strided_slice %20 {offsets = [0, 0], sizes = [8, 128], strides = [1, 1]} : vector<8x512xf32> to vector<8x128xf32>
    %22 = arith.negf %21 : vector<8x128xf32>
    %23 = math.exp %22 : vector<8x128xf32>
    %cst_17 = arith.constant 1.000000e+00 : f32
    %24 = vector.broadcast %cst_17 : f32 to vector<8x128xf32>
    %25 = arith.addf %24, %23 : vector<8x128xf32>
    %26 = arith.divf %24, %25 : vector<8x128xf32>
    %27 = vector.extract_strided_slice %20 {offsets = [0, 128], sizes = [8, 128], strides = [1, 1]} : vector<8x512xf32> to vector<8x128xf32>
    %28 = arith.negf %27 : vector<8x128xf32>
    %29 = math.exp %28 : vector<8x128xf32>
    %cst_18 = arith.constant 1.000000e+00 : f32
    %30 = vector.broadcast %cst_18 : f32 to vector<8x128xf32>
    %31 = arith.addf %30, %29 : vector<8x128xf32>
    %32 = arith.divf %30, %31 : vector<8x128xf32>
    %33 = vector.extract_strided_slice %20 {offsets = [0, 256], sizes = [8, 128], strides = [1, 1]} : vector<8x512xf32> to vector<8x128xf32>
    %34 = math.tanh %33 : vector<8x128xf32>
    %35 = vector.extract_strided_slice %20 {offsets = [0, 384], sizes = [8, 128], strides = [1, 1]} : vector<8x512xf32> to vector<8x128xf32>
    %36 = arith.negf %35 : vector<8x128xf32>
    %37 = math.exp %36 : vector<8x128xf32>
    %cst_19 = arith.constant 1.000000e+00 : f32
    %38 = vector.broadcast %cst_19 : f32 to vector<8x128xf32>
    %39 = arith.addf %38, %37 : vector<8x128xf32>
    %40 = arith.divf %38, %39 : vector<8x128xf32>
    %41 = arith.mulf %32, %5 : vector<8x128xf32>
    %42 = arith.mulf %26, %34 : vector<8x128xf32>
    %43 = arith.addf %41, %42 : vector<8x128xf32>
    %44 = math.tanh %43 : vector<8x128xf32>
    %45 = arith.mulf %40, %44 : vector<8x128xf32>
    %46 = arith.truncf %45 : vector<8x128xf32> to vector<8x128xbf16>
    %47 = arith.addi %6, %c0_i32_13 : i32
    %48 = arith.index_cast %47 : i32 to index
    %c0_20 = arith.constant 0 : index
    %c0_21 = arith.constant 0 : index
    %49 = vector.load %arg9[%48, %c0_20, %c0_21] : memref<8x8x128xbf16, #tpu.memory_space<vmem>>, vector<1x8x128xbf16>
    %50 = vector.shape_cast %49 : vector<1x8x128xbf16> to vector<8x128xbf16>
    %51 = vector.shape_cast %46 : vector<8x128xbf16> to vector<1x8x128xbf16>
    tpu.vector_store %arg9[%48, %c0_20, %c0_21], %51 {strides = array<i32>} : memref<8x8x128xbf16, #tpu.memory_space<vmem>>, vector<1x8x128xbf16>,
    %c1_i32 = arith.constant 1 : i32
    %52 = arith.index_cast %c1_i32 : i32 to index
    %c0_22 = arith.constant 0 : index
    %c0_23 = arith.constant 0 : index
    %53 = vector.load %arg10[%52, %c0_22, %c0_23] : memref<8x8x512xf32, #tpu.memory_space<vmem>>, vector<1x8x512xf32>
    %54 = vector.shape_cast %53 : vector<1x8x512xf32> to vector<8x512xf32>
    %55 = arith.truncf %45 : vector<8x128xf32> to vector<8x128xbf16>
    %cst_24 = arith.constant dense<0.000000e+00> : vector<8x512xf32>
    %56 = tpu.matmul %55, %3, %cst_24 {dimension_numbers = #tpu.dot_dimension_numbers<[1], [0], [0], [1], [0, 0, 1, 1], [], []>} : vector<8x128xbf16>, vector<128x512xbf16>, vector<8x512xf32> -> vector<8x512xf32>
    %57 = arith.addf %54, %56 : vector<8x512xf32>
    %58 = vector.extract_strided_slice %57 {offsets = [0, 0], sizes = [8, 128], strides = [1, 1]} : vector<8x512xf32> to vector<8x128xf32>
    %59 = arith.negf %58 : vector<8x128xf32>
    %60 = math.exp %59 : vector<8x128xf32>
    %cst_25 = arith.constant 1.000000e+00 : f32
    %61 = vector.broadcast %cst_25 : f32 to vector<8x128xf32>
    %62 = arith.addf %61, %60 : vector<8x128xf32>
    %63 = arith.divf %61, %62 : vector<8x128xf32>
    %64 = vector.extract_strided_slice %57 {offsets = [0, 128], sizes = [8, 128], strides = [1, 1]} : vector<8x512xf32> to vector<8x128xf32>
    %65 = arith.negf %64 : vector<8x128xf32>
    %66 = math.exp %65 : vector<8x128xf32>
    %cst_26 = arith.constant 1.000000e+00 : f32
    %67 = vector.broadcast %cst_26 : f32 to vector<8x128xf32>
    %68 = arith.addf %67, %66 : vector<8x128xf32>
    %69 = arith.divf %67, %68 : vector<8x128xf32>
    %70 = vector.extract_strided_slice %57 {offsets = [0, 256], sizes = [8, 128], strides = [1, 1]} : vector<8x512xf32> to vector<8x128xf32>
    %71 = math.tanh %70 : vector<8x128xf32>
    %72 = vector.extract_strided_slice %57 {offsets = [0, 384], sizes = [8, 128], strides = [1, 1]} : vector<8x512xf32> to vector<8x128xf32>
    %73 = arith.negf %72 : vector<8x128xf32>
    %74 = math.exp %73 : vector<8x128xf32>
    %cst_27 = arith.constant 1.000000e+00 : f32
    %75 = vector.broadcast %cst_27 : f32 to vector<8x128xf32>
    %76 = arith.addf %75, %74 : vector<8x128xf32>
    %77 = arith.divf %75, %76 : vector<8x128xf32>
    %78 = arith.mulf %69, %43 : vector<8x128xf32>
    %79 = arith.mulf %63, %71 : vector<8x128xf32>
    %80 = arith.addf %78, %79 : vector<8x128xf32>
    %81 = math.tanh %80 : vector<8x128xf32>
    %82 = arith.mulf %77, %81 : vector<8x128xf32>
    %83 = arith.truncf %82 : vector<8x128xf32> to vector<8x128xbf16>
    %84 = arith.addi %6, %c1_i32 : i32
    %85 = arith.index_cast %84 : i32 to index
    %c0_28 = arith.constant 0 : index
    %c0_29 = arith.constant 0 : index
    %86 = vector.load %arg9[%85, %c0_28, %c0_29] : memref<8x8x128xbf16, #tpu.memory_space<vmem>>, vector<1x8x128xbf16>
    %87 = vector.shape_cast %86 : vector<1x8x128xbf16> to vector<8x128xbf16>
    %88 = vector.shape_cast %83 : vector<8x128xbf16> to vector<1x8x128xbf16>
    tpu.vector_store %arg9[%85, %c0_28, %c0_29], %88 {strides = array<i32>} : memref<8x8x128xbf16, #tpu.memory_space<vmem>>, vector<1x8x128xbf16>,
    %c2_i32 = arith.constant 2 : i32
    %89 = arith.index_cast %c2_i32 : i32 to index
    %c0_30 = arith.constant 0 : index
    %c0_31 = arith.constant 0 : index
    %90 = vector.load %arg10[%89, %c0_30, %c0_31] : memref<8x8x512xf32, #tpu.memory_space<vmem>>, vector<1x8x512xf32>
    %91 = vector.shape_cast %90 : vector<1x8x512xf32> to vector<8x512xf32>
    %92 = arith.truncf %82 : vector<8x128xf32> to vector<8x128xbf16>
    %cst_32 = arith.constant dense<0.000000e+00> : vector<8x512xf32>
    %93 = tpu.matmul %92, %3, %cst_32 {dimension_numbers = #tpu.dot_dimension_numbers<[1], [0], [0], [1], [0, 0, 1, 1], [], []>} : vector<8x128xbf16>, vector<128x512xbf16>, vector<8x512xf32> -> vector<8x512xf32>
    %94 = arith.addf %91, %93 : vector<8x512xf32>
    %95 = vector.extract_strided_slice %94 {offsets = [0, 0], sizes = [8, 128], strides = [1, 1]} : vector<8x512xf32> to vector<8x128xf32>
    %96 = arith.negf %95 : vector<8x128xf32>
    %97 = math.exp %96 : vector<8x128xf32>
    %cst_33 = arith.constant 1.000000e+00 : f32
    %98 = vector.broadcast %cst_33 : f32 to vector<8x128xf32>
    %99 = arith.addf %98, %97 : vector<8x128xf32>
    %100 = arith.divf %98, %99 : vector<8x128xf32>
    %101 = vector.extract_strided_slice %94 {offsets = [0, 128], sizes = [8, 128], strides = [1, 1]} : vector<8x512xf32> to vector<8x128xf32>
    %102 = arith.negf %101 : vector<8x128xf32>
    %103 = math.exp %102 : vector<8x128xf32>
    %cst_34 = arith.constant 1.000000e+00 : f32
    %104 = vector.broadcast %cst_34 : f32 to vector<8x128xf32>
    %105 = arith.addf %104, %103 : vector<8x128xf32>
    %106 = arith.divf %104, %105 : vector<8x128xf32>
    %107 = vector.extract_strided_slice %94 {offsets = [0, 256], sizes = [8, 128], strides = [1, 1]} : vector<8x512xf32> to vector<8x128xf32>
    %108 = math.tanh %107 : vector<8x128xf32>
    %109 = vector.extract_strided_slice %94 {offsets = [0, 384], sizes = [8, 128], strides = [1, 1]} : vector<8x512xf32> to vector<8x128xf32>
    %110 = arith.negf %109 : vector<8x128xf32>
    %111 = math.exp %110 : vector<8x128xf32>
    %cst_35 = arith.constant 1.000000e+00 : f32
    %112 = vector.broadcast %cst_35 : f32 to vector<8x128xf32>
    %113 = arith.addf %112, %111 : vector<8x128xf32>
    %114 = arith.divf %112, %113 : vector<8x128xf32>
    %115 = arith.mulf %106, %80 : vector<8x128xf32>
    %116 = arith.mulf %100, %108 : vector<8x128xf32>
    %117 = arith.addf %115, %116 : vector<8x128xf32>
    %118 = math.tanh %117 : vector<8x128xf32>
    %119 = arith.mulf %114, %118 : vector<8x128xf32>
    %120 = arith.truncf %119 : vector<8x128xf32> to vector<8x128xbf16>
    %121 = arith.addi %6, %c2_i32 : i32
    %122 = arith.index_cast %121 : i32 to index
    %c0_36 = arith.constant 0 : index
    %c0_37 = arith.constant 0 : index
    %123 = vector.load %arg9[%122, %c0_36, %c0_37] : memref<8x8x128xbf16, #tpu.memory_space<vmem>>, vector<1x8x128xbf16>
    %124 = vector.shape_cast %123 : vector<1x8x128xbf16> to vector<8x128xbf16>
    %125 = vector.shape_cast %120 : vector<8x128xbf16> to vector<1x8x128xbf16>
    tpu.vector_store %arg9[%122, %c0_36, %c0_37], %125 {strides = array<i32>} : memref<8x8x128xbf16, #tpu.memory_space<vmem>>, vector<1x8x128xbf16>,
    %c3_i32 = arith.constant 3 : i32
    %126 = arith.index_cast %c3_i32 : i32 to index
    %c0_38 = arith.constant 0 : index
    %c0_39 = arith.constant 0 : index
    %127 = vector.load %arg10[%126, %c0_38, %c0_39] : memref<8x8x512xf32, #tpu.memory_space<vmem>>, vector<1x8x512xf32>
    %128 = vector.shape_cast %127 : vector<1x8x512xf32> to vector<8x512xf32>
    %129 = arith.truncf %119 : vector<8x128xf32> to vector<8x128xbf16>
    %cst_40 = arith.constant dense<0.000000e+00> : vector<8x512xf32>
    %130 = tpu.matmul %129, %3, %cst_40 {dimension_numbers = #tpu.dot_dimension_numbers<[1], [0], [0], [1], [0, 0, 1, 1], [], []>} : vector<8x128xbf16>, vector<128x512xbf16>, vector<8x512xf32> -> vector<8x512xf32>
    %131 = arith.addf %128, %130 : vector<8x512xf32>
    %132 = vector.extract_strided_slice %131 {offsets = [0, 0], sizes = [8, 128], strides = [1, 1]} : vector<8x512xf32> to vector<8x128xf32>
    %133 = arith.negf %132 : vector<8x128xf32>
    %134 = math.exp %133 : vector<8x128xf32>
    %cst_41 = arith.constant 1.000000e+00 : f32
    %135 = vector.broadcast %cst_41 : f32 to vector<8x128xf32>
    %136 = arith.addf %135, %134 : vector<8x128xf32>
    %137 = arith.divf %135, %136 : vector<8x128xf32>
    %138 = vector.extract_strided_slice %131 {offsets = [0, 128], sizes = [8, 128], strides = [1, 1]} : vector<8x512xf32> to vector<8x128xf32>
    %139 = arith.negf %138 : vector<8x128xf32>
    %140 = math.exp %139 : vector<8x128xf32>
    %cst_42 = arith.constant 1.000000e+00 : f32
    %141 = vector.broadcast %cst_42 : f32 to vector<8x128xf32>
    %142 = arith.addf %141, %140 : vector<8x128xf32>
    %143 = arith.divf %141, %142 : vector<8x128xf32>
    %144 = vector.extract_strided_slice %131 {offsets = [0, 256], sizes = [8, 128], strides = [1, 1]} : vector<8x512xf32> to vector<8x128xf32>
    %145 = math.tanh %144 : vector<8x128xf32>
    %146 = vector.extract_strided_slice %131 {offsets = [0, 384], sizes = [8, 128], strides = [1, 1]} : vector<8x512xf32> to vector<8x128xf32>
    %147 = arith.negf %146 : vector<8x128xf32>
    %148 = math.exp %147 : vector<8x128xf32>
    %cst_43 = arith.constant 1.000000e+00 : f32
    %149 = vector.broadcast %cst_43 : f32 to vector<8x128xf32>
    %150 = arith.addf %149, %148 : vector<8x128xf32>
    %151 = arith.divf %149, %150 : vector<8x128xf32>
    %152 = arith.mulf %143, %117 : vector<8x128xf32>
    %153 = arith.mulf %137, %145 : vector<8x128xf32>
    %154 = arith.addf %152, %153 : vector<8x128xf32>
    %155 = math.tanh %154 : vector<8x128xf32>
    %156 = arith.mulf %151, %155 : vector<8x128xf32>
    %157 = arith.truncf %156 : vector<8x128xf32> to vector<8x128xbf16>
    %158 = arith.addi %6, %c3_i32 : i32
    %159 = arith.index_cast %158 : i32 to index
    %c0_44 = arith.constant 0 : index
    %c0_45 = arith.constant 0 : index
    %160 = vector.load %arg9[%159, %c0_44, %c0_45] : memref<8x8x128xbf16, #tpu.memory_space<vmem>>, vector<1x8x128xbf16>
    %161 = vector.shape_cast %160 : vector<1x8x128xbf16> to vector<8x128xbf16>
    %162 = vector.shape_cast %157 : vector<8x128xbf16> to vector<1x8x128xbf16>
    tpu.vector_store %arg9[%159, %c0_44, %c0_45], %162 {strides = array<i32>} : memref<8x8x128xbf16, #tpu.memory_space<vmem>>, vector<1x8x128xbf16>,
    %c4_i32 = arith.constant 4 : i32
    %163 = arith.index_cast %c4_i32 : i32 to index
    %c0_46 = arith.constant 0 : index
    %c0_47 = arith.constant 0 : index
    %164 = vector.load %arg10[%163, %c0_46, %c0_47] : memref<8x8x512xf32, #tpu.memory_space<vmem>>, vector<1x8x512xf32>
    %165 = vector.shape_cast %164 : vector<1x8x512xf32> to vector<8x512xf32>
    %166 = arith.truncf %156 : vector<8x128xf32> to vector<8x128xbf16>
    %cst_48 = arith.constant dense<0.000000e+00> : vector<8x512xf32>
    %167 = tpu.matmul %166, %3, %cst_48 {dimension_numbers = #tpu.dot_dimension_numbers<[1], [0], [0], [1], [0, 0, 1, 1], [], []>} : vector<8x128xbf16>, vector<128x512xbf16>, vector<8x512xf32> -> vector<8x512xf32>
    %168 = arith.addf %165, %167 : vector<8x512xf32>
    %169 = vector.extract_strided_slice %168 {offsets = [0, 0], sizes = [8, 128], strides = [1, 1]} : vector<8x512xf32> to vector<8x128xf32>
    %170 = arith.negf %169 : vector<8x128xf32>
    %171 = math.exp %170 : vector<8x128xf32>
    %cst_49 = arith.constant 1.000000e+00 : f32
    %172 = vector.broadcast %cst_49 : f32 to vector<8x128xf32>
    %173 = arith.addf %172, %171 : vector<8x128xf32>
    %174 = arith.divf %172, %173 : vector<8x128xf32>
    %175 = vector.extract_strided_slice %168 {offsets = [0, 128], sizes = [8, 128], strides = [1, 1]} : vector<8x512xf32> to vector<8x128xf32>
    %176 = arith.negf %175 : vector<8x128xf32>
    %177 = math.exp %176 : vector<8x128xf32>
    %cst_50 = arith.constant 1.000000e+00 : f32
    %178 = vector.broadcast %cst_50 : f32 to vector<8x128xf32>
    %179 = arith.addf %178, %177 : vector<8x128xf32>
    %180 = arith.divf %178, %179 : vector<8x128xf32>
    %181 = vector.extract_strided_slice %168 {offsets = [0, 256], sizes = [8, 128], strides = [1, 1]} : vector<8x512xf32> to vector<8x128xf32>
    %182 = math.tanh %181 : vector<8x128xf32>
    %183 = vector.extract_strided_slice %168 {offsets = [0, 384], sizes = [8, 128], strides = [1, 1]} : vector<8x512xf32> to vector<8x128xf32>
    %184 = arith.negf %183 : vector<8x128xf32>
    %185 = math.exp %184 : vector<8x128xf32>
    %cst_51 = arith.constant 1.000000e+00 : f32
    %186 = vector.broadcast %cst_51 : f32 to vector<8x128xf32>
    %187 = arith.addf %186, %185 : vector<8x128xf32>
    %188 = arith.divf %186, %187 : vector<8x128xf32>
    %189 = arith.mulf %180, %154 : vector<8x128xf32>
    %190 = arith.mulf %174, %182 : vector<8x128xf32>
    %191 = arith.addf %189, %190 : vector<8x128xf32>
    %192 = math.tanh %191 : vector<8x128xf32>
    %193 = arith.mulf %188, %192 : vector<8x128xf32>
    %194 = arith.truncf %193 : vector<8x128xf32> to vector<8x128xbf16>
    %195 = arith.addi %6, %c4_i32 : i32
    %196 = arith.index_cast %195 : i32 to index
    %c0_52 = arith.constant 0 : index
    %c0_53 = arith.constant 0 : index
    %197 = vector.load %arg9[%196, %c0_52, %c0_53] : memref<8x8x128xbf16, #tpu.memory_space<vmem>>, vector<1x8x128xbf16>
    %198 = vector.shape_cast %197 : vector<1x8x128xbf16> to vector<8x128xbf16>
    %199 = vector.shape_cast %194 : vector<8x128xbf16> to vector<1x8x128xbf16>
    tpu.vector_store %arg9[%196, %c0_52, %c0_53], %199 {strides = array<i32>} : memref<8x8x128xbf16, #tpu.memory_space<vmem>>, vector<1x8x128xbf16>,
    %c5_i32 = arith.constant 5 : i32
    %200 = arith.index_cast %c5_i32 : i32 to index
    %c0_54 = arith.constant 0 : index
    %c0_55 = arith.constant 0 : index
    %201 = vector.load %arg10[%200, %c0_54, %c0_55] : memref<8x8x512xf32, #tpu.memory_space<vmem>>, vector<1x8x512xf32>
    %202 = vector.shape_cast %201 : vector<1x8x512xf32> to vector<8x512xf32>
    %203 = arith.truncf %193 : vector<8x128xf32> to vector<8x128xbf16>
    %cst_56 = arith.constant dense<0.000000e+00> : vector<8x512xf32>
    %204 = tpu.matmul %203, %3, %cst_56 {dimension_numbers = #tpu.dot_dimension_numbers<[1], [0], [0], [1], [0, 0, 1, 1], [], []>} : vector<8x128xbf16>, vector<128x512xbf16>, vector<8x512xf32> -> vector<8x512xf32>
    %205 = arith.addf %202, %204 : vector<8x512xf32>
    %206 = vector.extract_strided_slice %205 {offsets = [0, 0], sizes = [8, 128], strides = [1, 1]} : vector<8x512xf32> to vector<8x128xf32>
    %207 = arith.negf %206 : vector<8x128xf32>
    %208 = math.exp %207 : vector<8x128xf32>
    %cst_57 = arith.constant 1.000000e+00 : f32
    %209 = vector.broadcast %cst_57 : f32 to vector<8x128xf32>
    %210 = arith.addf %209, %208 : vector<8x128xf32>
    %211 = arith.divf %209, %210 : vector<8x128xf32>
    %212 = vector.extract_strided_slice %205 {offsets = [0, 128], sizes = [8, 128], strides = [1, 1]} : vector<8x512xf32> to vector<8x128xf32>
    %213 = arith.negf %212 : vector<8x128xf32>
    %214 = math.exp %213 : vector<8x128xf32>
    %cst_58 = arith.constant 1.000000e+00 : f32
    %215 = vector.broadcast %cst_58 : f32 to vector<8x128xf32>
    %216 = arith.addf %215, %214 : vector<8x128xf32>
    %217 = arith.divf %215, %216 : vector<8x128xf32>
    %218 = vector.extract_strided_slice %205 {offsets = [0, 256], sizes = [8, 128], strides = [1, 1]} : vector<8x512xf32> to vector<8x128xf32>
    %219 = math.tanh %218 : vector<8x128xf32>
    %220 = vector.extract_strided_slice %205 {offsets = [0, 384], sizes = [8, 128], strides = [1, 1]} : vector<8x512xf32> to vector<8x128xf32>
    %221 = arith.negf %220 : vector<8x128xf32>
    %222 = math.exp %221 : vector<8x128xf32>
    %cst_59 = arith.constant 1.000000e+00 : f32
    %223 = vector.broadcast %cst_59 : f32 to vector<8x128xf32>
    %224 = arith.addf %223, %222 : vector<8x128xf32>
    %225 = arith.divf %223, %224 : vector<8x128xf32>
    %226 = arith.mulf %217, %191 : vector<8x128xf32>
    %227 = arith.mulf %211, %219 : vector<8x128xf32>
    %228 = arith.addf %226, %227 : vector<8x128xf32>
    %229 = math.tanh %228 : vector<8x128xf32>
    %230 = arith.mulf %225, %229 : vector<8x128xf32>
    %231 = arith.truncf %230 : vector<8x128xf32> to vector<8x128xbf16>
    %232 = arith.addi %6, %c5_i32 : i32
    %233 = arith.index_cast %232 : i32 to index
    %c0_60 = arith.constant 0 : index
    %c0_61 = arith.constant 0 : index
    %234 = vector.load %arg9[%233, %c0_60, %c0_61] : memref<8x8x128xbf16, #tpu.memory_space<vmem>>, vector<1x8x128xbf16>
    %235 = vector.shape_cast %234 : vector<1x8x128xbf16> to vector<8x128xbf16>
    %236 = vector.shape_cast %231 : vector<8x128xbf16> to vector<1x8x128xbf16>
    tpu.vector_store %arg9[%233, %c0_60, %c0_61], %236 {strides = array<i32>} : memref<8x8x128xbf16, #tpu.memory_space<vmem>>, vector<1x8x128xbf16>,
    %c6_i32 = arith.constant 6 : i32
    %237 = arith.index_cast %c6_i32 : i32 to index
    %c0_62 = arith.constant 0 : index
    %c0_63 = arith.constant 0 : index
    %238 = vector.load %arg10[%237, %c0_62, %c0_63] : memref<8x8x512xf32, #tpu.memory_space<vmem>>, vector<1x8x512xf32>
    %239 = vector.shape_cast %238 : vector<1x8x512xf32> to vector<8x512xf32>
    %240 = arith.truncf %230 : vector<8x128xf32> to vector<8x128xbf16>
    %cst_64 = arith.constant dense<0.000000e+00> : vector<8x512xf32>
    %241 = tpu.matmul %240, %3, %cst_64 {dimension_numbers = #tpu.dot_dimension_numbers<[1], [0], [0], [1], [0, 0, 1, 1], [], []>} : vector<8x128xbf16>, vector<128x512xbf16>, vector<8x512xf32> -> vector<8x512xf32>
    %242 = arith.addf %239, %241 : vector<8x512xf32>
    %243 = vector.extract_strided_slice %242 {offsets = [0, 0], sizes = [8, 128], strides = [1, 1]} : vector<8x512xf32> to vector<8x128xf32>
    %244 = arith.negf %243 : vector<8x128xf32>
    %245 = math.exp %244 : vector<8x128xf32>
    %cst_65 = arith.constant 1.000000e+00 : f32
    %246 = vector.broadcast %cst_65 : f32 to vector<8x128xf32>
    %247 = arith.addf %246, %245 : vector<8x128xf32>
    %248 = arith.divf %246, %247 : vector<8x128xf32>
    %249 = vector.extract_strided_slice %242 {offsets = [0, 128], sizes = [8, 128], strides = [1, 1]} : vector<8x512xf32> to vector<8x128xf32>
    %250 = arith.negf %249 : vector<8x128xf32>
    %251 = math.exp %250 : vector<8x128xf32>
    %cst_66 = arith.constant 1.000000e+00 : f32
    %252 = vector.broadcast %cst_66 : f32 to vector<8x128xf32>
    %253 = arith.addf %252, %251 : vector<8x128xf32>
    %254 = arith.divf %252, %253 : vector<8x128xf32>
    %255 = vector.extract_strided_slice %242 {offsets = [0, 256], sizes = [8, 128], strides = [1, 1]} : vector<8x512xf32> to vector<8x128xf32>
    %256 = math.tanh %255 : vector<8x128xf32>
    %257 = vector.extract_strided_slice %242 {offsets = [0, 384], sizes = [8, 128], strides = [1, 1]} : vector<8x512xf32> to vector<8x128xf32>
    %258 = arith.negf %257 : vector<8x128xf32>
    %259 = math.exp %258 : vector<8x128xf32>
    %cst_67 = arith.constant 1.000000e+00 : f32
    %260 = vector.broadcast %cst_67 : f32 to vector<8x128xf32>
    %261 = arith.addf %260, %259 : vector<8x128xf32>
    %262 = arith.divf %260, %261 : vector<8x128xf32>
    %263 = arith.mulf %254, %228 : vector<8x128xf32>
    %264 = arith.mulf %248, %256 : vector<8x128xf32>
    %265 = arith.addf %263, %264 : vector<8x128xf32>
    %266 = math.tanh %265 : vector<8x128xf32>
    %267 = arith.mulf %262, %266 : vector<8x128xf32>
    %268 = arith.truncf %267 : vector<8x128xf32> to vector<8x128xbf16>
    %269 = arith.addi %6, %c6_i32 : i32
    %270 = arith.index_cast %269 : i32 to index
    %c0_68 = arith.constant 0 : index
    %c0_69 = arith.constant 0 : index
    %271 = vector.load %arg9[%270, %c0_68, %c0_69] : memref<8x8x128xbf16, #tpu.memory_space<vmem>>, vector<1x8x128xbf16>
    %272 = vector.shape_cast %271 : vector<1x8x128xbf16> to vector<8x128xbf16>
    %273 = vector.shape_cast %268 : vector<8x128xbf16> to vector<1x8x128xbf16>
    tpu.vector_store %arg9[%270, %c0_68, %c0_69], %273 {strides = array<i32>} : memref<8x8x128xbf16, #tpu.memory_space<vmem>>, vector<1x8x128xbf16>,
    %c7_i32 = arith.constant 7 : i32
    %274 = arith.index_cast %c7_i32 : i32 to index
    %c0_70 = arith.constant 0 : index
    %c0_71 = arith.constant 0 : index
    %275 = vector.load %arg10[%274, %c0_70, %c0_71] : memref<8x8x512xf32, #tpu.memory_space<vmem>>, vector<1x8x512xf32>
    %276 = vector.shape_cast %275 : vector<1x8x512xf32> to vector<8x512xf32>
    %277 = arith.truncf %267 : vector<8x128xf32> to vector<8x128xbf16>
    %cst_72 = arith.constant dense<0.000000e+00> : vector<8x512xf32>
    %278 = tpu.matmul %277, %3, %cst_72 {dimension_numbers = #tpu.dot_dimension_numbers<[1], [0], [0], [1], [0, 0, 1, 1], [], []>} : vector<8x128xbf16>, vector<128x512xbf16>, vector<8x512xf32> -> vector<8x512xf32>
    %279 = arith.addf %276, %278 : vector<8x512xf32>
    %280 = vector.extract_strided_slice %279 {offsets = [0, 0], sizes = [8, 128], strides = [1, 1]} : vector<8x512xf32> to vector<8x128xf32>
    %281 = arith.negf %280 : vector<8x128xf32>
    %282 = math.exp %281 : vector<8x128xf32>
    %cst_73 = arith.constant 1.000000e+00 : f32
    %283 = vector.broadcast %cst_73 : f32 to vector<8x128xf32>
    %284 = arith.addf %283, %282 : vector<8x128xf32>
    %285 = arith.divf %283, %284 : vector<8x128xf32>
    %286 = vector.extract_strided_slice %279 {offsets = [0, 128], sizes = [8, 128], strides = [1, 1]} : vector<8x512xf32> to vector<8x128xf32>
    %287 = arith.negf %286 : vector<8x128xf32>
    %288 = math.exp %287 : vector<8x128xf32>
    %cst_74 = arith.constant 1.000000e+00 : f32
    %289 = vector.broadcast %cst_74 : f32 to vector<8x128xf32>
    %290 = arith.addf %289, %288 : vector<8x128xf32>
    %291 = arith.divf %289, %290 : vector<8x128xf32>
    %292 = vector.extract_strided_slice %279 {offsets = [0, 256], sizes = [8, 128], strides = [1, 1]} : vector<8x512xf32> to vector<8x128xf32>
    %293 = math.tanh %292 : vector<8x128xf32>
    %294 = vector.extract_strided_slice %279 {offsets = [0, 384], sizes = [8, 128], strides = [1, 1]} : vector<8x512xf32> to vector<8x128xf32>
    %295 = arith.negf %294 : vector<8x128xf32>
    %296 = math.exp %295 : vector<8x128xf32>
    %cst_75 = arith.constant 1.000000e+00 : f32
    %297 = vector.broadcast %cst_75 : f32 to vector<8x128xf32>
    %298 = arith.addf %297, %296 : vector<8x128xf32>
    %299 = arith.divf %297, %298 : vector<8x128xf32>
    %300 = arith.mulf %291, %265 : vector<8x128xf32>
    %301 = arith.mulf %285, %293 : vector<8x128xf32>
    %302 = arith.addf %300, %301 : vector<8x128xf32>
    %303 = math.tanh %302 : vector<8x128xf32>
    %304 = arith.mulf %299, %303 : vector<8x128xf32>
    %305 = arith.truncf %304 : vector<8x128xf32> to vector<8x128xbf16>
    %306 = arith.addi %6, %c7_i32 : i32
    %307 = arith.index_cast %306 : i32 to index
    %c0_76 = arith.constant 0 : index
    %c0_77 = arith.constant 0 : index
    %308 = vector.load %arg9[%307, %c0_76, %c0_77] : memref<8x8x128xbf16, #tpu.memory_space<vmem>>, vector<1x8x128xbf16>
    %309 = vector.shape_cast %308 : vector<1x8x128xbf16> to vector<8x128xbf16>
    %310 = vector.shape_cast %305 : vector<8x128xbf16> to vector<1x8x128xbf16>
    tpu.vector_store %arg9[%307, %c0_76, %c0_77], %310 {strides = array<i32>} : memref<8x8x128xbf16, #tpu.memory_space<vmem>>, vector<1x8x128xbf16>,
    %c8_i32_78 = arith.constant 8 : i32
    %c1_i32_79 = arith.constant 1 : i32
    %c0_80 = arith.constant 0 : index
    %c0_81 = arith.constant 0 : index
    %c0_82 = arith.constant 0 : index
    %311 = vector.load %arg7[%c0_80, %c0_81, %c0_82] : memref<2x8x128xf32, #tpu.memory_space<vmem>>, vector<1x8x128xf32>
    %312 = vector.shape_cast %311 : vector<1x8x128xf32> to vector<8x128xf32>
    %313 = vector.shape_cast %304 : vector<8x128xf32> to vector<1x8x128xf32>
    tpu.vector_store %arg7[%c0_80, %c0_81, %c0_82], %313 {strides = array<i32>} : memref<2x8x128xf32, #tpu.memory_space<vmem>>, vector<1x8x128xf32>,
    %c0_83 = arith.constant 0 : index
    %c0_84 = arith.constant 0 : index
    %c0_85 = arith.constant 0 : index
    %314 = vector.load %arg8[%c0_83, %c0_84, %c0_85] : memref<2x8x128xf32, #tpu.memory_space<vmem>>, vector<1x8x128xf32>
    %315 = vector.shape_cast %314 : vector<1x8x128xf32> to vector<8x128xf32>
    %316 = vector.shape_cast %302 : vector<8x128xf32> to vector<1x8x128xf32>
    tpu.vector_store %arg8[%c0_83, %c0_84, %c0_85], %316 {strides = array<i32>} : memref<2x8x128xf32, #tpu.memory_space<vmem>>, vector<1x8x128xf32>,
    %c0_86 = arith.constant 0 : index
    %c0_87 = arith.constant 0 : index
    %c0_88 = arith.constant 0 : index
    %317 = vector.load %arg5[%c0_86, %c0_87, %c0_88] : memref<1x128x512xbf16, #tpu.memory_space<vmem>>, vector<1x128x512xbf16>
    %318 = vector.shape_cast %317 : vector<1x128x512xbf16> to vector<128x512xbf16>
    %c0_89 = arith.constant 0 : index
    %c0_90 = arith.constant 0 : index
    %c0_91 = arith.constant 0 : index
    %319 = vector.load %arg6[%c0_89, %c0_90, %c0_91] : memref<1x1x512xf32, #tpu.memory_space<vmem>>, vector<1x1x512xf32>
    %320 = vector.shape_cast %319 : vector<1x1x512xf32> to vector<1x512xf32>
    %c1 = arith.constant 1 : index
    %c0_92 = arith.constant 0 : index
    %c0_93 = arith.constant 0 : index
    %321 = vector.load %arg4[%c1, %c0_92, %c0_93] : memref<2x128x512xbf16, #tpu.memory_space<vmem>>, vector<1x128x512xbf16>
    %322 = vector.shape_cast %321 : vector<1x128x512xbf16> to vector<128x512xbf16>
    %cst_94 = arith.constant 0.000000e+00 : f32
    %323 = vector.broadcast %cst_94 : f32 to vector<8x128xf32>
    %cst_95 = arith.constant 0.000000e+00 : f32
    %324 = vector.broadcast %cst_95 : f32 to vector<8x128xf32>
    %c0_i32_96 = arith.constant 0 : i32
    %c8_i32_97 = arith.constant 8 : i32
    %325 = arith.muli %c0_i32_96, %c8_i32_97 : i32
    %326 = arith.index_cast %325 : i32 to index
    %c0_98 = arith.constant 0 : index
    %c0_99 = arith.constant 0 : index
    %327 = vector.load %arg9[%326, %c0_98, %c0_99] : memref<8x8x128xbf16, #tpu.memory_space<vmem>>, vector<8x8x128xbf16>
    %328 = vector.shape_cast %327 : vector<8x8x128xbf16> to vector<64x128xbf16>
    %cst_100 = arith.constant dense<0.000000e+00> : vector<64x512xf32>
    %329 = tpu.matmul %328, %318, %cst_100 {dimension_numbers = #tpu.dot_dimension_numbers<[1], [0], [0], [1], [0, 0, 1, 1], [], []>} : vector<64x128xbf16>, vector<128x512xbf16>, vector<64x512xf32> -> vector<64x512xf32>
    %330 = vector.broadcast %320 : vector<1x512xf32> to vector<64x512xf32>
    %331 = arith.addf %329, %330 : vector<64x512xf32>
    %332 = vector.shape_cast %331 : vector<64x512xf32> to vector<8x8x512xf32>
    %c0_101 = arith.constant 0 : index
    %c0_102 = arith.constant 0 : index
    %c0_103 = arith.constant 0 : index
    %333 = vector.load %arg10[%c0_101, %c0_102, %c0_103] : memref<8x8x512xf32, #tpu.memory_space<vmem>>, vector<8x8x512xf32>
    tpu.vector_store %arg10[%c0_101, %c0_102, %c0_103], %332 {strides = array<i32>} : memref<8x8x512xf32, #tpu.memory_space<vmem>>, vector<8x8x512xf32>,
    %c0_i32_104 = arith.constant 0 : i32
    %334 = arith.index_cast %c0_i32_104 : i32 to index
    %c0_105 = arith.constant 0 : index
    %c0_106 = arith.constant 0 : index
    %335 = vector.load %arg10[%334, %c0_105, %c0_106] : memref<8x8x512xf32, #tpu.memory_space<vmem>>, vector<1x8x512xf32>
    %336 = vector.shape_cast %335 : vector<1x8x512xf32> to vector<8x512xf32>
    %337 = arith.truncf %323 : vector<8x128xf32> to vector<8x128xbf16>
    %cst_107 = arith.constant dense<0.000000e+00> : vector<8x512xf32>
    %338 = tpu.matmul %337, %322, %cst_107 {dimension_numbers = #tpu.dot_dimension_numbers<[1], [0], [0], [1], [0, 0, 1, 1], [], []>} : vector<8x128xbf16>, vector<128x512xbf16>, vector<8x512xf32> -> vector<8x512xf32>
    %339 = arith.addf %336, %338 : vector<8x512xf32>
    %340 = vector.extract_strided_slice %339 {offsets = [0, 0], sizes = [8, 128], strides = [1, 1]} : vector<8x512xf32> to vector<8x128xf32>
    %341 = arith.negf %340 : vector<8x128xf32>
    %342 = math.exp %341 : vector<8x128xf32>
    %cst_108 = arith.constant 1.000000e+00 : f32
    %343 = vector.broadcast %cst_108 : f32 to vector<8x128xf32>
    %344 = arith.addf %343, %342 : vector<8x128xf32>
    %345 = arith.divf %343, %344 : vector<8x128xf32>
    %346 = vector.extract_strided_slice %339 {offsets = [0, 128], sizes = [8, 128], strides = [1, 1]} : vector<8x512xf32> to vector<8x128xf32>
    %347 = arith.negf %346 : vector<8x128xf32>
    %348 = math.exp %347 : vector<8x128xf32>
    %cst_109 = arith.constant 1.000000e+00 : f32
    %349 = vector.broadcast %cst_109 : f32 to vector<8x128xf32>
    %350 = arith.addf %349, %348 : vector<8x128xf32>
    %351 = arith.divf %349, %350 : vector<8x128xf32>
    %352 = vector.extract_strided_slice %339 {offsets = [0, 256], sizes = [8, 128], strides = [1, 1]} : vector<8x512xf32> to vector<8x128xf32>
    %353 = math.tanh %352 : vector<8x128xf32>
    %354 = vector.extract_strided_slice %339 {offsets = [0, 384], sizes = [8, 128], strides = [1, 1]} : vector<8x512xf32> to vector<8x128xf32>
    %355 = arith.negf %354 : vector<8x128xf32>
    %356 = math.exp %355 : vector<8x128xf32>
    %cst_110 = arith.constant 1.000000e+00 : f32
    %357 = vector.broadcast %cst_110 : f32 to vector<8x128xf32>
    %358 = arith.addf %357, %356 : vector<8x128xf32>
    %359 = arith.divf %357, %358 : vector<8x128xf32>
    %360 = arith.mulf %351, %324 : vector<8x128xf32>
    %361 = arith.mulf %345, %353 : vector<8x128xf32>
    %362 = arith.addf %360, %361 : vector<8x128xf32>
    %363 = math.tanh %362 : vector<8x128xf32>
    %364 = arith.mulf %359, %363 : vector<8x128xf32>
    %c1_i32_111 = arith.constant 1 : i32
    %365 = arith.index_cast %c1_i32_111 : i32 to index
    %c0_112 = arith.constant 0 : index
    %c0_113 = arith.constant 0 : index
    %366 = vector.load %arg10[%365, %c0_112, %c0_113] : memref<8x8x512xf32, #tpu.memory_space<vmem>>, vector<1x8x512xf32>
    %367 = vector.shape_cast %366 : vector<1x8x512xf32> to vector<8x512xf32>
    %368 = arith.truncf %364 : vector<8x128xf32> to vector<8x128xbf16>
    %cst_114 = arith.constant dense<0.000000e+00> : vector<8x512xf32>
    %369 = tpu.matmul %368, %322, %cst_114 {dimension_numbers = #tpu.dot_dimension_numbers<[1], [0], [0], [1], [0, 0, 1, 1], [], []>} : vector<8x128xbf16>, vector<128x512xbf16>, vector<8x512xf32> -> vector<8x512xf32>
    %370 = arith.addf %367, %369 : vector<8x512xf32>
    %371 = vector.extract_strided_slice %370 {offsets = [0, 0], sizes = [8, 128], strides = [1, 1]} : vector<8x512xf32> to vector<8x128xf32>
    %372 = arith.negf %371 : vector<8x128xf32>
    %373 = math.exp %372 : vector<8x128xf32>
    %cst_115 = arith.constant 1.000000e+00 : f32
    %374 = vector.broadcast %cst_115 : f32 to vector<8x128xf32>
    %375 = arith.addf %374, %373 : vector<8x128xf32>
    %376 = arith.divf %374, %375 : vector<8x128xf32>
    %377 = vector.extract_strided_slice %370 {offsets = [0, 128], sizes = [8, 128], strides = [1, 1]} : vector<8x512xf32> to vector<8x128xf32>
    %378 = arith.negf %377 : vector<8x128xf32>
    %379 = math.exp %378 : vector<8x128xf32>
    %cst_116 = arith.constant 1.000000e+00 : f32
    %380 = vector.broadcast %cst_116 : f32 to vector<8x128xf32>
    %381 = arith.addf %380, %379 : vector<8x128xf32>
    %382 = arith.divf %380, %381 : vector<8x128xf32>
    %383 = vector.extract_strided_slice %370 {offsets = [0, 256], sizes = [8, 128], strides = [1, 1]} : vector<8x512xf32> to vector<8x128xf32>
    %384 = math.tanh %383 : vector<8x128xf32>
    %385 = vector.extract_strided_slice %370 {offsets = [0, 384], sizes = [8, 128], strides = [1, 1]} : vector<8x512xf32> to vector<8x128xf32>
    %386 = arith.negf %385 : vector<8x128xf32>
    %387 = math.exp %386 : vector<8x128xf32>
    %cst_117 = arith.constant 1.000000e+00 : f32
    %388 = vector.broadcast %cst_117 : f32 to vector<8x128xf32>
    %389 = arith.addf %388, %387 : vector<8x128xf32>
    %390 = arith.divf %388, %389 : vector<8x128xf32>
    %391 = arith.mulf %382, %362 : vector<8x128xf32>
    %392 = arith.mulf %376, %384 : vector<8x128xf32>
    %393 = arith.addf %391, %392 : vector<8x128xf32>
    %394 = math.tanh %393 : vector<8x128xf32>
    %395 = arith.mulf %390, %394 : vector<8x128xf32>
    %c2_i32_118 = arith.constant 2 : i32
    %396 = arith.index_cast %c2_i32_118 : i32 to index
    %c0_119 = arith.constant 0 : index
    %c0_120 = arith.constant 0 : index
    %397 = vector.load %arg10[%396, %c0_119, %c0_120] : memref<8x8x512xf32, #tpu.memory_space<vmem>>, vector<1x8x512xf32>
    %398 = vector.shape_cast %397 : vector<1x8x512xf32> to vector<8x512xf32>
    %399 = arith.truncf %395 : vector<8x128xf32> to vector<8x128xbf16>
    %cst_121 = arith.constant dense<0.000000e+00> : vector<8x512xf32>
    %400 = tpu.matmul %399, %322, %cst_121 {dimension_numbers = #tpu.dot_dimension_numbers<[1], [0], [0], [1], [0, 0, 1, 1], [], []>} : vector<8x128xbf16>, vector<128x512xbf16>, vector<8x512xf32> -> vector<8x512xf32>
    %401 = arith.addf %398, %400 : vector<8x512xf32>
    %402 = vector.extract_strided_slice %401 {offsets = [0, 0], sizes = [8, 128], strides = [1, 1]} : vector<8x512xf32> to vector<8x128xf32>
    %403 = arith.negf %402 : vector<8x128xf32>
    %404 = math.exp %403 : vector<8x128xf32>
    %cst_122 = arith.constant 1.000000e+00 : f32
    %405 = vector.broadcast %cst_122 : f32 to vector<8x128xf32>
    %406 = arith.addf %405, %404 : vector<8x128xf32>
    %407 = arith.divf %405, %406 : vector<8x128xf32>
    %408 = vector.extract_strided_slice %401 {offsets = [0, 128], sizes = [8, 128], strides = [1, 1]} : vector<8x512xf32> to vector<8x128xf32>
    %409 = arith.negf %408 : vector<8x128xf32>
    %410 = math.exp %409 : vector<8x128xf32>
    %cst_123 = arith.constant 1.000000e+00 : f32
    %411 = vector.broadcast %cst_123 : f32 to vector<8x128xf32>
    %412 = arith.addf %411, %410 : vector<8x128xf32>
    %413 = arith.divf %411, %412 : vector<8x128xf32>
    %414 = vector.extract_strided_slice %401 {offsets = [0, 256], sizes = [8, 128], strides = [1, 1]} : vector<8x512xf32> to vector<8x128xf32>
    %415 = math.tanh %414 : vector<8x128xf32>
    %416 = vector.extract_strided_slice %401 {offsets = [0, 384], sizes = [8, 128], strides = [1, 1]} : vector<8x512xf32> to vector<8x128xf32>
    %417 = arith.negf %416 : vector<8x128xf32>
    %418 = math.exp %417 : vector<8x128xf32>
    %cst_124 = arith.constant 1.000000e+00 : f32
    %419 = vector.broadcast %cst_124 : f32 to vector<8x128xf32>
    %420 = arith.addf %419, %418 : vector<8x128xf32>
    %421 = arith.divf %419, %420 : vector<8x128xf32>
    %422 = arith.mulf %413, %393 : vector<8x128xf32>
    %423 = arith.mulf %407, %415 : vector<8x128xf32>
    %424 = arith.addf %422, %423 : vector<8x128xf32>
    %425 = math.tanh %424 : vector<8x128xf32>
    %426 = arith.mulf %421, %425 : vector<8x128xf32>
    %c3_i32_125 = arith.constant 3 : i32
    %427 = arith.index_cast %c3_i32_125 : i32 to index
    %c0_126 = arith.constant 0 : index
    %c0_127 = arith.constant 0 : index
    %428 = vector.load %arg10[%427, %c0_126, %c0_127] : memref<8x8x512xf32, #tpu.memory_space<vmem>>, vector<1x8x512xf32>
    %429 = vector.shape_cast %428 : vector<1x8x512xf32> to vector<8x512xf32>
    %430 = arith.truncf %426 : vector<8x128xf32> to vector<8x128xbf16>
    %cst_128 = arith.constant dense<0.000000e+00> : vector<8x512xf32>
    %431 = tpu.matmul %430, %322, %cst_128 {dimension_numbers = #tpu.dot_dimension_numbers<[1], [0], [0], [1], [0, 0, 1, 1], [], []>} : vector<8x128xbf16>, vector<128x512xbf16>, vector<8x512xf32> -> vector<8x512xf32>
    %432 = arith.addf %429, %431 : vector<8x512xf32>
    %433 = vector.extract_strided_slice %432 {offsets = [0, 0], sizes = [8, 128], strides = [1, 1]} : vector<8x512xf32> to vector<8x128xf32>
    %434 = arith.negf %433 : vector<8x128xf32>
    %435 = math.exp %434 : vector<8x128xf32>
    %cst_129 = arith.constant 1.000000e+00 : f32
    %436 = vector.broadcast %cst_129 : f32 to vector<8x128xf32>
    %437 = arith.addf %436, %435 : vector<8x128xf32>
    %438 = arith.divf %436, %437 : vector<8x128xf32>
    %439 = vector.extract_strided_slice %432 {offsets = [0, 128], sizes = [8, 128], strides = [1, 1]} : vector<8x512xf32> to vector<8x128xf32>
    %440 = arith.negf %439 : vector<8x128xf32>
    %441 = math.exp %440 : vector<8x128xf32>
    %cst_130 = arith.constant 1.000000e+00 : f32
    %442 = vector.broadcast %cst_130 : f32 to vector<8x128xf32>
    %443 = arith.addf %442, %441 : vector<8x128xf32>
    %444 = arith.divf %442, %443 : vector<8x128xf32>
    %445 = vector.extract_strided_slice %432 {offsets = [0, 256], sizes = [8, 128], strides = [1, 1]} : vector<8x512xf32> to vector<8x128xf32>
    %446 = math.tanh %445 : vector<8x128xf32>
    %447 = vector.extract_strided_slice %432 {offsets = [0, 384], sizes = [8, 128], strides = [1, 1]} : vector<8x512xf32> to vector<8x128xf32>
    %448 = arith.negf %447 : vector<8x128xf32>
    %449 = math.exp %448 : vector<8x128xf32>
    %cst_131 = arith.constant 1.000000e+00 : f32
    %450 = vector.broadcast %cst_131 : f32 to vector<8x128xf32>
    %451 = arith.addf %450, %449 : vector<8x128xf32>
    %452 = arith.divf %450, %451 : vector<8x128xf32>
    %453 = arith.mulf %444, %424 : vector<8x128xf32>
    %454 = arith.mulf %438, %446 : vector<8x128xf32>
    %455 = arith.addf %453, %454 : vector<8x128xf32>
    %456 = math.tanh %455 : vector<8x128xf32>
    %457 = arith.mulf %452, %456 : vector<8x128xf32>
    %c4_i32_132 = arith.constant 4 : i32
    %458 = arith.index_cast %c4_i32_132 : i32 to index
    %c0_133 = arith.constant 0 : index
    %c0_134 = arith.constant 0 : index
    %459 = vector.load %arg10[%458, %c0_133, %c0_134] : memref<8x8x512xf32, #tpu.memory_space<vmem>>, vector<1x8x512xf32>
    %460 = vector.shape_cast %459 : vector<1x8x512xf32> to vector<8x512xf32>
    %461 = arith.truncf %457 : vector<8x128xf32> to vector<8x128xbf16>
    %cst_135 = arith.constant dense<0.000000e+00> : vector<8x512xf32>
    %462 = tpu.matmul %461, %322, %cst_135 {dimension_numbers = #tpu.dot_dimension_numbers<[1], [0], [0], [1], [0, 0, 1, 1], [], []>} : vector<8x128xbf16>, vector<128x512xbf16>, vector<8x512xf32> -> vector<8x512xf32>
    %463 = arith.addf %460, %462 : vector<8x512xf32>
    %464 = vector.extract_strided_slice %463 {offsets = [0, 0], sizes = [8, 128], strides = [1, 1]} : vector<8x512xf32> to vector<8x128xf32>
    %465 = arith.negf %464 : vector<8x128xf32>
    %466 = math.exp %465 : vector<8x128xf32>
    %cst_136 = arith.constant 1.000000e+00 : f32
    %467 = vector.broadcast %cst_136 : f32 to vector<8x128xf32>
    %468 = arith.addf %467, %466 : vector<8x128xf32>
    %469 = arith.divf %467, %468 : vector<8x128xf32>
    %470 = vector.extract_strided_slice %463 {offsets = [0, 128], sizes = [8, 128], strides = [1, 1]} : vector<8x512xf32> to vector<8x128xf32>
    %471 = arith.negf %470 : vector<8x128xf32>
    %472 = math.exp %471 : vector<8x128xf32>
    %cst_137 = arith.constant 1.000000e+00 : f32
    %473 = vector.broadcast %cst_137 : f32 to vector<8x128xf32>
    %474 = arith.addf %473, %472 : vector<8x128xf32>
    %475 = arith.divf %473, %474 : vector<8x128xf32>
    %476 = vector.extract_strided_slice %463 {offsets = [0, 256], sizes = [8, 128], strides = [1, 1]} : vector<8x512xf32> to vector<8x128xf32>
    %477 = math.tanh %476 : vector<8x128xf32>
    %478 = vector.extract_strided_slice %463 {offsets = [0, 384], sizes = [8, 128], strides = [1, 1]} : vector<8x512xf32> to vector<8x128xf32>
    %479 = arith.negf %478 : vector<8x128xf32>
    %480 = math.exp %479 : vector<8x128xf32>
    %cst_138 = arith.constant 1.000000e+00 : f32
    %481 = vector.broadcast %cst_138 : f32 to vector<8x128xf32>
    %482 = arith.addf %481, %480 : vector<8x128xf32>
    %483 = arith.divf %481, %482 : vector<8x128xf32>
    %484 = arith.mulf %475, %455 : vector<8x128xf32>
    %485 = arith.mulf %469, %477 : vector<8x128xf32>
    %486 = arith.addf %484, %485 : vector<8x128xf32>
    %487 = math.tanh %486 : vector<8x128xf32>
    %488 = arith.mulf %483, %487 : vector<8x128xf32>
    %c5_i32_139 = arith.constant 5 : i32
    %489 = arith.index_cast %c5_i32_139 : i32 to index
    %c0_140 = arith.constant 0 : index
    %c0_141 = arith.constant 0 : index
    %490 = vector.load %arg10[%489, %c0_140, %c0_141] : memref<8x8x512xf32, #tpu.memory_space<vmem>>, vector<1x8x512xf32>
    %491 = vector.shape_cast %490 : vector<1x8x512xf32> to vector<8x512xf32>
    %492 = arith.truncf %488 : vector<8x128xf32> to vector<8x128xbf16>
    %cst_142 = arith.constant dense<0.000000e+00> : vector<8x512xf32>
    %493 = tpu.matmul %492, %322, %cst_142 {dimension_numbers = #tpu.dot_dimension_numbers<[1], [0], [0], [1], [0, 0, 1, 1], [], []>} : vector<8x128xbf16>, vector<128x512xbf16>, vector<8x512xf32> -> vector<8x512xf32>
    %494 = arith.addf %491, %493 : vector<8x512xf32>
    %495 = vector.extract_strided_slice %494 {offsets = [0, 0], sizes = [8, 128], strides = [1, 1]} : vector<8x512xf32> to vector<8x128xf32>
    %496 = arith.negf %495 : vector<8x128xf32>
    %497 = math.exp %496 : vector<8x128xf32>
    %cst_143 = arith.constant 1.000000e+00 : f32
    %498 = vector.broadcast %cst_143 : f32 to vector<8x128xf32>
    %499 = arith.addf %498, %497 : vector<8x128xf32>
    %500 = arith.divf %498, %499 : vector<8x128xf32>
    %501 = vector.extract_strided_slice %494 {offsets = [0, 128], sizes = [8, 128], strides = [1, 1]} : vector<8x512xf32> to vector<8x128xf32>
    %502 = arith.negf %501 : vector<8x128xf32>
    %503 = math.exp %502 : vector<8x128xf32>
    %cst_144 = arith.constant 1.000000e+00 : f32
    %504 = vector.broadcast %cst_144 : f32 to vector<8x128xf32>
    %505 = arith.addf %504, %503 : vector<8x128xf32>
    %506 = arith.divf %504, %505 : vector<8x128xf32>
    %507 = vector.extract_strided_slice %494 {offsets = [0, 256], sizes = [8, 128], strides = [1, 1]} : vector<8x512xf32> to vector<8x128xf32>
    %508 = math.tanh %507 : vector<8x128xf32>
    %509 = vector.extract_strided_slice %494 {offsets = [0, 384], sizes = [8, 128], strides = [1, 1]} : vector<8x512xf32> to vector<8x128xf32>
    %510 = arith.negf %509 : vector<8x128xf32>
    %511 = math.exp %510 : vector<8x128xf32>
    %cst_145 = arith.constant 1.000000e+00 : f32
    %512 = vector.broadcast %cst_145 : f32 to vector<8x128xf32>
    %513 = arith.addf %512, %511 : vector<8x128xf32>
    %514 = arith.divf %512, %513 : vector<8x128xf32>
    %515 = arith.mulf %506, %486 : vector<8x128xf32>
    %516 = arith.mulf %500, %508 : vector<8x128xf32>
    %517 = arith.addf %515, %516 : vector<8x128xf32>
    %518 = math.tanh %517 : vector<8x128xf32>
    %519 = arith.mulf %514, %518 : vector<8x128xf32>
    %c6_i32_146 = arith.constant 6 : i32
    %520 = arith.index_cast %c6_i32_146 : i32 to index
    %c0_147 = arith.constant 0 : index
    %c0_148 = arith.constant 0 : index
    %521 = vector.load %arg10[%520, %c0_147, %c0_148] : memref<8x8x512xf32, #tpu.memory_space<vmem>>, vector<1x8x512xf32>
    %522 = vector.shape_cast %521 : vector<1x8x512xf32> to vector<8x512xf32>
    %523 = arith.truncf %519 : vector<8x128xf32> to vector<8x128xbf16>
    %cst_149 = arith.constant dense<0.000000e+00> : vector<8x512xf32>
    %524 = tpu.matmul %523, %322, %cst_149 {dimension_numbers = #tpu.dot_dimension_numbers<[1], [0], [0], [1], [0, 0, 1, 1], [], []>} : vector<8x128xbf16>, vector<128x512xbf16>, vector<8x512xf32> -> vector<8x512xf32>
    %525 = arith.addf %522, %524 : vector<8x512xf32>
    %526 = vector.extract_strided_slice %525 {offsets = [0, 0], sizes = [8, 128], strides = [1, 1]} : vector<8x512xf32> to vector<8x128xf32>
    %527 = arith.negf %526 : vector<8x128xf32>
    %528 = math.exp %527 : vector<8x128xf32>
    %cst_150 = arith.constant 1.000000e+00 : f32
    %529 = vector.broadcast %cst_150 : f32 to vector<8x128xf32>
    %530 = arith.addf %529, %528 : vector<8x128xf32>
    %531 = arith.divf %529, %530 : vector<8x128xf32>
    %532 = vector.extract_strided_slice %525 {offsets = [0, 128], sizes = [8, 128], strides = [1, 1]} : vector<8x512xf32> to vector<8x128xf32>
    %533 = arith.negf %532 : vector<8x128xf32>
    %534 = math.exp %533 : vector<8x128xf32>
    %cst_151 = arith.constant 1.000000e+00 : f32
    %535 = vector.broadcast %cst_151 : f32 to vector<8x128xf32>
    %536 = arith.addf %535, %534 : vector<8x128xf32>
    %537 = arith.divf %535, %536 : vector<8x128xf32>
    %538 = vector.extract_strided_slice %525 {offsets = [0, 256], sizes = [8, 128], strides = [1, 1]} : vector<8x512xf32> to vector<8x128xf32>
    %539 = math.tanh %538 : vector<8x128xf32>
    %540 = vector.extract_strided_slice %525 {offsets = [0, 384], sizes = [8, 128], strides = [1, 1]} : vector<8x512xf32> to vector<8x128xf32>
    %541 = arith.negf %540 : vector<8x128xf32>
    %542 = math.exp %541 : vector<8x128xf32>
    %cst_152 = arith.constant 1.000000e+00 : f32
    %543 = vector.broadcast %cst_152 : f32 to vector<8x128xf32>
    %544 = arith.addf %543, %542 : vector<8x128xf32>
    %545 = arith.divf %543, %544 : vector<8x128xf32>
    %546 = arith.mulf %537, %517 : vector<8x128xf32>
    %547 = arith.mulf %531, %539 : vector<8x128xf32>
    %548 = arith.addf %546, %547 : vector<8x128xf32>
    %549 = math.tanh %548 : vector<8x128xf32>
    %550 = arith.mulf %545, %549 : vector<8x128xf32>
    %c7_i32_153 = arith.constant 7 : i32
    %551 = arith.index_cast %c7_i32_153 : i32 to index
    %c0_154 = arith.constant 0 : index
    %c0_155 = arith.constant 0 : index
    %552 = vector.load %arg10[%551, %c0_154, %c0_155] : memref<8x8x512xf32, #tpu.memory_space<vmem>>, vector<1x8x512xf32>
    %553 = vector.shape_cast %552 : vector<1x8x512xf32> to vector<8x512xf32>
    %554 = arith.truncf %550 : vector<8x128xf32> to vector<8x128xbf16>
    %cst_156 = arith.constant dense<0.000000e+00> : vector<8x512xf32>
    %555 = tpu.matmul %554, %322, %cst_156 {dimension_numbers = #tpu.dot_dimension_numbers<[1], [0], [0], [1], [0, 0, 1, 1], [], []>} : vector<8x128xbf16>, vector<128x512xbf16>, vector<8x512xf32> -> vector<8x512xf32>
    %556 = arith.addf %553, %555 : vector<8x512xf32>
    %557 = vector.extract_strided_slice %556 {offsets = [0, 0], sizes = [8, 128], strides = [1, 1]} : vector<8x512xf32> to vector<8x128xf32>
    %558 = arith.negf %557 : vector<8x128xf32>
    %559 = math.exp %558 : vector<8x128xf32>
    %cst_157 = arith.constant 1.000000e+00 : f32
    %560 = vector.broadcast %cst_157 : f32 to vector<8x128xf32>
    %561 = arith.addf %560, %559 : vector<8x128xf32>
    %562 = arith.divf %560, %561 : vector<8x128xf32>
    %563 = vector.extract_strided_slice %556 {offsets = [0, 128], sizes = [8, 128], strides = [1, 1]} : vector<8x512xf32> to vector<8x128xf32>
    %564 = arith.negf %563 : vector<8x128xf32>
    %565 = math.exp %564 : vector<8x128xf32>
    %cst_158 = arith.constant 1.000000e+00 : f32
    %566 = vector.broadcast %cst_158 : f32 to vector<8x128xf32>
    %567 = arith.addf %566, %565 : vector<8x128xf32>
    %568 = arith.divf %566, %567 : vector<8x128xf32>
    %569 = vector.extract_strided_slice %556 {offsets = [0, 256], sizes = [8, 128], strides = [1, 1]} : vector<8x512xf32> to vector<8x128xf32>
    %570 = math.tanh %569 : vector<8x128xf32>
    %571 = vector.extract_strided_slice %556 {offsets = [0, 384], sizes = [8, 128], strides = [1, 1]} : vector<8x512xf32> to vector<8x128xf32>
    %572 = arith.negf %571 : vector<8x128xf32>
    %573 = math.exp %572 : vector<8x128xf32>
    %cst_159 = arith.constant 1.000000e+00 : f32
    %574 = vector.broadcast %cst_159 : f32 to vector<8x128xf32>
    %575 = arith.addf %574, %573 : vector<8x128xf32>
    %576 = arith.divf %574, %575 : vector<8x128xf32>
    %577 = arith.mulf %568, %548 : vector<8x128xf32>
    %578 = arith.mulf %562, %570 : vector<8x128xf32>
    %579 = arith.addf %577, %578 : vector<8x128xf32>
    %580 = math.tanh %579 : vector<8x128xf32>
    %581 = arith.mulf %576, %580 : vector<8x128xf32>
    %c8_i32_160 = arith.constant 8 : i32
    %c1_i32_161 = arith.constant 1 : i32
    %c1_162 = arith.constant 1 : index
    %c0_163 = arith.constant 0 : index
    %c0_164 = arith.constant 0 : index
    %582 = vector.load %arg7[%c1_162, %c0_163, %c0_164] : memref<2x8x128xf32, #tpu.memory_space<vmem>>, vector<1x8x128xf32>
    %583 = vector.shape_cast %582 : vector<1x8x128xf32> to vector<8x128xf32>
    %584 = vector.shape_cast %581 : vector<8x128xf32> to vector<1x8x128xf32>
    tpu.vector_store %arg7[%c1_162, %c0_163, %c0_164], %584 {strides = array<i32>} : memref<2x8x128xf32, #tpu.memory_space<vmem>>, vector<1x8x128xf32>,
    %c1_165 = arith.constant 1 : index
    %c0_166 = arith.constant 0 : index
    %c0_167 = arith.constant 0 : index
    %585 = vector.load %arg8[%c1_165, %c0_166, %c0_167] : memref<2x8x128xf32, #tpu.memory_space<vmem>>, vector<1x8x128xf32>
    %586 = vector.shape_cast %585 : vector<1x8x128xf32> to vector<8x128xf32>
    %587 = vector.shape_cast %579 : vector<8x128xf32> to vector<1x8x128xf32>
    tpu.vector_store %arg8[%c1_165, %c0_166, %c0_167], %587 {strides = array<i32>} : memref<2x8x128xf32, #tpu.memory_space<vmem>>, vector<1x8x128xf32>,
    return
  }
  func.func @transform_0(%arg0: i32) -> (i32, i32, i32) {
    %c0_i32 = arith.constant 0 : i32
    %c0_i32_0 = arith.constant 0 : i32
    %c0_i32_1 = arith.constant 0 : i32
    return %c0_i32, %arg0, %c0_i32_0 : i32, i32, i32
  }
  func.func @transform_1(%arg0: i32) -> (i32, i32) {
    %c0_i32 = arith.constant 0 : i32
    %c0_i32_0 = arith.constant 0 : i32
    %c0_i32_1 = arith.constant 0 : i32
    return %c0_i32, %c0_i32_0 : i32, i32
  }
  func.func @transform_2(%arg0: i32) -> (i32, i32) {
    %c0_i32 = arith.constant 0 : i32
    %c0_i32_0 = arith.constant 0 : i32
    %c0_i32_1 = arith.constant 0 : i32
    return %c0_i32, %c0_i32_0 : i32, i32
  }
  func.func @transform_3(%arg0: i32) -> (i32, i32, i32) {
    %c0_i32 = arith.constant 0 : i32
    %c0_i32_0 = arith.constant 0 : i32
    %c0_i32_1 = arith.constant 0 : i32
    %c0_i32_2 = arith.constant 0 : i32
    return %c0_i32, %c0_i32_0, %c0_i32_1 : i32, i32, i32
  }
  func.func @transform_4(%arg0: i32) -> (i32, i32, i32) {
    %c0_i32 = arith.constant 0 : i32
    %c0_i32_0 = arith.constant 0 : i32
    %c0_i32_1 = arith.constant 0 : i32
    %c0_i32_2 = arith.constant 0 : i32
    return %c0_i32, %c0_i32_0, %c0_i32_1 : i32, i32, i32
  }
  func.func @transform_5(%arg0: i32) -> (i32, i32, i32) {
    %c0_i32 = arith.constant 0 : i32
    %c0_i32_0 = arith.constant 0 : i32
    %c0_i32_1 = arith.constant 0 : i32
    %c0_i32_2 = arith.constant 0 : i32
    return %c0_i32, %c0_i32_0, %c0_i32_1 : i32, i32, i32
  }
  func.func @transform_6(%arg0: i32) -> (i32, i32, i32) {
    %c0_i32 = arith.constant 0 : i32
    %c0_i32_0 = arith.constant 0 : i32
    %c0_i32_1 = arith.constant 0 : i32
    return %c0_i32, %arg0, %c0_i32_0 : i32, i32, i32
  }
  func.func @transform_7(%arg0: i32) -> (i32, i32, i32) {
    %c0_i32 = arith.constant 0 : i32
    %c0_i32_0 = arith.constant 0 : i32
    %c0_i32_1 = arith.constant 0 : i32
    return %c0_i32, %arg0, %c0_i32_0 : i32, i32, i32
  }
}

</mosaic_0001>

<bundles_post_ra>
// kernel: encoder_forward.1
= control target key start
LH: loop header
LB: loop body
LE: loop exit
PB: predicated region body
PF: predicated region fallthrough
CT: control target
= control target key end

     0   :  { %v5651_v1 = vmov 0   ;;  %s5639_s1 = inlined_call_operand.vmem [shape: bf16[128,512], index: 1, kind: input, shape index: {}]   ;;  %s5640_s0 = inlined_call_operand.vmem [shape: bf16[8,8,128], index: 0, kind: input, shape index: {}]   ;;  %s5641_s3 = inlined_call_operand.vmem [shape: bf16[2,128,512], index: 3, kind: input, shape index: {}]   ;;  %s5642_s2 = inlined_call_operand.vmem [shape: f32[1,512], index: 2, kind: input, shape index: {}]   ;;  %s5643_s4 = inlined_call_operand.vmem [shape: bf16[1,128,512], index: 4, kind: input, shape index: {}]   ;;  %s5644_s7 = inlined_call_operand.vmem [shape: f32[2,8,128], index: 7, kind: output, shape index: {1}]   ;;  %s5645_s6 = inlined_call_operand.vmem [shape: f32[2,8,128], index: 6, kind: output, shape index: {0}]   ;;  %s5646_s5 = inlined_call_operand.vmem [shape: f32[1,1,512], index: 5, kind: input, shape index: {}]  }
   0x1   :  { %v3353_v0 = vld [vmem:[%s5639_s1 + $0xe4] ss:$16 sps:$4 sm:$0xff]   ;;  %336 = vmatprep.mubr.bf16.mxu0 %v5651_v1  ;;  %409 = vmatprep.mubr.bf16.mxu1 %v5651_v1  ;;  %v3355_v2 = vld [vmem:[%s5639_s1 + $0xec] ss:$16 sps:$4 sm:$0xff]   ;;  %v3357_v3 = vld [vmem:[%s5639_s1 + $0xe0] ss:$16 sps:$4 sm:$0xff]  }
   0x2   :  { %304 = vmatprep.subr.bf16.mxu0 %v3353_v0  ;;  %v3358_v4 = vld [vmem:[%s5639_s1 + $0xe8] ss:$16 sps:$4 sm:$0xff]   ;;  %377 = vmatprep.subr.bf16.mxu1 %v3355_v2  ;;  %v3359_v5 = vld [vmem:[%s5639_s1 + $0xc4] ss:$16 sps:$4 sm:$0xff]   ;;  %v3361_v6 = vld [vmem:[%s5639_s1 + $0xcc] ss:$16 sps:$4 sm:$0xff]  }
   0x3   :  { %305 = vmatpush1.bf16.msra.mxu0 %v3357_v3  ;;  %378 = vmatpush1.bf16.msra.mxu1 %v3358_v4  ;;  %v3363_v7 = vld [vmem:[%s5639_s1 + $0xc0] ss:$16 sps:$4 sm:$0xff]   ;;  %v3364_v8 = vld [vmem:[%s5639_s1 + $0xc8] ss:$16 sps:$4 sm:$0xff]   ;;  %v3365_v9 = vld [vmem:[%s5639_s1 + $0xa4] ss:$16 sps:$4 sm:$0xff]  }
   0x4   :  { %306 = vmatprep.subr.bf16.mxu0 %v3359_v5  ;;  %379 = vmatprep.subr.bf16.mxu1 %v3361_v6  ;;  %v3367_v10 = vld [vmem:[%s5639_s1 + $0xac] ss:$16 sps:$4 sm:$0xff]   ;;  %v3369_v11 = vld [vmem:[%s5639_s1 + $0xa0] ss:$16 sps:$4 sm:$0xff]   ;;  %v3370_v12 = vld [vmem:[%s5639_s1 + $0xa8] ss:$16 sps:$4 sm:$0xff]   ;;  %v100_v6 = vlaneseq }
   0x5   :  { %v3371_v13 = vld [vmem:[%s5639_s1 + $0x84] ss:$16 sps:$4 sm:$0xff]   ;;  %v3373_v14 = vld [vmem:[%s5639_s1 + $0x8c] ss:$16 sps:$4 sm:$0xff]   ;;  %v3375_v15 = vld [vmem:[%s5639_s1 + $0x80] ss:$16 sps:$4 sm:$0xff]  }
   0x6   :  { %v3376_v16 = vld [vmem:[%s5639_s1 + $0x88] ss:$16 sps:$4 sm:$0xff]   ;;  %v3377_v17 = vld [vmem:[%s5639_s1 + $0x64] ss:$16 sps:$4 sm:$0xff]   ;;  %v3379_v18 = vld [vmem:[%s5639_s1 + $0x6c] ss:$16 sps:$4 sm:$0xff]  }
   0x7   :  { %307 = vmatpush1.bf16.msra.mxu0 %v3363_v7  ;;  %380 = vmatpush1.bf16.msra.mxu1 %v3364_v8  ;;  %v3381_v19 = vld [vmem:[%s5639_s1 + $0x60] ss:$16 sps:$4 sm:$0xff]   ;;  %v3382_v20 = vld [vmem:[%s5639_s1 + $0x68] ss:$16 sps:$4 sm:$0xff]   ;;  %v3383_v21 = vld [vmem:[%s5639_s1 + $0x44] ss:$16 sps:$4 sm:$0xff]  }
   0x8   :  { %308 = vmatprep.subr.bf16.mxu0 %v3365_v9  ;;  %381 = vmatprep.subr.bf16.mxu1 %v3367_v10  ;;  %v3385_v22 = vld [vmem:[%s5639_s1 + $0x4c] ss:$16 sps:$4 sm:$0xff]   ;;  %v3387_v23 = vld [vmem:[%s5639_s1 + $0x40] ss:$16 sps:$4 sm:$0xff]   ;;  %v3388_v24 = vld [vmem:[%s5639_s1 + $0x48] ss:$16 sps:$4 sm:$0xff]  }
   0x9   :  { %v3389_v25 = vld [vmem:[%s5639_s1 + $0x24] ss:$16 sps:$4 sm:$0xff]   ;;  %v3391_v26 = vld [vmem:[%s5639_s1 + $0x2c] ss:$16 sps:$4 sm:$0xff]   ;;  %v3393_v27 = vld [vmem:[%s5639_s1 + $0x20] ss:$16 sps:$4 sm:$0xff]  }
   0xa   :  { %v3394_v28 = vld [vmem:[%s5639_s1 + $0x28] ss:$16 sps:$4 sm:$0xff]   ;;  %v3395_v29 = vld [vmem:[%s5639_s1 + $0x4] ss:$16 sps:$4 sm:$0xff]   ;;  %v3397_v30 = vld [vmem:[%s5639_s1 + $0xc] ss:$16 sps:$4 sm:$0xff]  }
   0xb   :  { %309 = vmatpush1.bf16.msra.mxu0 %v3369_v11  ;;  %382 = vmatpush1.bf16.msra.mxu1 %v3370_v12  ;;  %v3399_v31 = vld [vmem:[%s5639_s1] ss:$16 sps:$4 sm:$0xff]   ;;  %v3400_v32 = vld [vmem:[%s5639_s1 + $0x8] ss:$16 sps:$4 sm:$0xff]   ;;  %v4015_v33 = vld [vmem:[%s5641_s3 + $0xe4] ss:$16 sps:$4 sm:$0xff]  }
   0xc   :  { %310 = vmatprep.subr.bf16.mxu0 %v3371_v13  ;;  %383 = vmatprep.subr.bf16.mxu1 %v3373_v14  ;;  %v4020_v34 = vld [vmem:[%s5641_s3 + $0xec] ss:$16 sps:$4 sm:$0xff]   ;;  %v3401_v35 = vld [vmem:[%s5640_s0] sm:$0xff]   ;;  %v4033_v37 = vld [vmem:[%s5641_s3 + $0xe8] ss:$16 sps:$4 sm:$0xff]   ;;  %v4262_v7 = vshrl.u32 %v100_v6, 7 }
   0xd   :  { %v4028_v36 = vld [vmem:[%s5641_s3 + $0xe0] ss:$16 sps:$4 sm:$0xff]   ;;  %v4040_v38 = vld [vmem:[%s5641_s3 + $0xc4] ss:$16 sps:$4 sm:$0xff]   ;;  %v4045_v39 = vld [vmem:[%s5641_s3 + $0xcc] ss:$16 sps:$4 sm:$0xff]  }
   0xe   :  { %v4050_v40 = vld [vmem:[%s5641_s3 + $0xc0] ss:$16 sps:$4 sm:$0xff]   ;;  %v4057_v41 = vld [vmem:[%s5641_s3 + $0xc8] ss:$16 sps:$4 sm:$0xff]   ;;  %v4064_v42 = vld [vmem:[%s5641_s3 + $0xa4] ss:$16 sps:$4 sm:$0xff]  }
   0xf   :  { %311 = vmatpush1.bf16.msra.mxu0 %v3375_v15  ;;  %384 = vmatpush1.bf16.msra.mxu1 %v3376_v16  ;;  %v4069_v43 = vld [vmem:[%s5641_s3 + $0xac] ss:$16 sps:$4 sm:$0xff]   ;;  %v4079_v45 = vld [vmem:[%s5641_s3 + $0xa0] ss:$16 sps:$4 sm:$0xff]   ;;  %v4084_v46 = vld [vmem:[%s5641_s3 + $0xa8] ss:$16 sps:$4 sm:$0xff]  }
  0x10   :  { %312 = vmatprep.subr.bf16.mxu0 %v3377_v17  ;;  %385 = vmatprep.subr.bf16.mxu1 %v3379_v18  ;;  %v3414_v44 = vld [vmem:[%s5640_s0 + $0x8] sm:$0xff]   ;;  %v4091_v47 = vld [vmem:[%s5641_s3 + $0x84] ss:$16 sps:$4 sm:$0xff]   ;;  %v4103_v49 = vld [vmem:[%s5641_s3 + $0x80] ss:$16 sps:$4 sm:$0xff]   ;;  %5655 = vst [vmem:[#allocation4_spill] sm:$0xff] %v4262_v7 }
  0x11   :  { %v4098_v48 = vld [vmem:[%s5641_s3 + $0x8c] ss:$16 sps:$4 sm:$0xff]   ;;  %v4108_v50 = vld [vmem:[%s5641_s3 + $0x88] ss:$16 sps:$4 sm:$0xff]   ;;  %v4115_v51 = vld [vmem:[%s5641_s3 + $0x64] ss:$16 sps:$4 sm:$0xff]  }
  0x12   :  { %v4122_v52 = vld [vmem:[%s5641_s3 + $0x6c] ss:$16 sps:$4 sm:$0xff]   ;;  %v3427_v53 = vld [vmem:[%s5640_s0 + $0x10] sm:$0xff]   ;;  %v4137_v55 = vld [vmem:[%s5641_s3 + $0x68] ss:$16 sps:$4 sm:$0xff]   ;;  %v5647_v8 = vsub.s32 2, %v4262_v7 }
  0x13   :  { %313 = vmatpush1.bf16.msra.mxu0 %v3381_v19  ;;  %386 = vmatpush1.bf16.msra.mxu1 %v3382_v20  ;;  %v4132_v54 = vld [vmem:[%s5641_s3 + $0x60] ss:$16 sps:$4 sm:$0xff]   ;;  %v4142_v56 = vld [vmem:[%s5641_s3 + $0x44] ss:$16 sps:$4 sm:$0xff]   ;;  %v4147_v57 = vld [vmem:[%s5641_s3 + $0x4c] ss:$16 sps:$4 sm:$0xff]  }
  0x14   :  { %314 = vmatprep.subr.bf16.mxu0 %v3383_v21  ;;  %387 = vmatprep.subr.bf16.mxu1 %v3385_v22  ;;  %v4156_v58 = vld [vmem:[%s5641_s3 + $0x40] ss:$16 sps:$4 sm:$0xff]   ;;  %v4161_v59 = vld [vmem:[%s5641_s3 + $0x48] ss:$16 sps:$4 sm:$0xff]   ;;  %v4166_v60 = vld [vmem:[%s5641_s3 + $0x24] ss:$16 sps:$4 sm:$0xff]  }
  0x15   :  { %v4171_v61 = vld [vmem:[%s5641_s3 + $0x2c] ss:$16 sps:$4 sm:$0xff]   ;;  %v4185_v63 = vld [vmem:[%s5641_s3 + $0x20] ss:$16 sps:$4 sm:$0xff]   ;;  %v4190_v0 = vld [vmem:[%s5641_s3 + $0x28] ss:$16 sps:$4 sm:$0xff]  }
  0x16   :  { %v3440_v62 = vld [vmem:[%s5640_s0 + $0x18] sm:$0xff]   ;;  %v4195_v2 = vld [vmem:[%s5641_s3 + $0x4] ss:$16 sps:$4 sm:$0xff]   ;;  %v4211_v4 = vld [vmem:[%s5641_s3] ss:$16 sps:$4 sm:$0xff]   ;;  %v5650_v9 = vsub.s32 0, %v4262_v7 }
  0x17   :  { %315 = vmatpush1.bf16.msra.mxu0 %v3387_v23  ;;  %388 = vmatpush1.bf16.msra.mxu1 %v3388_v24  ;;  %v4204_v3 = vld [vmem:[%s5641_s3 + $0xc] ss:$16 sps:$4 sm:$0xff]   ;;  %v4216_v5 = vld [vmem:[%s5641_s3 + $0x8] ss:$16 sps:$4 sm:$0xff]   ;;  %v5648_v10 = vsub.s32 3, %v4262_v7  ;;  %v5649_v15 = vsub.s32 1, %v4262_v7 }
  0x18   :  { %316 = vmatprep.subr.bf16.mxu0 %v3389_v25  ;;  %389 = vmatprep.subr.bf16.mxu1 %v3391_v26  ;;  %v58_v11 = vld [vmem:[%s5642_s2] sm:$0xf] }
  0x19   :  { %v4276_v14 = vrot.slane %v58_v11, %v5647_v8  ;;  %v103_v18 = vrot.slane %v58_v11, %v5650_v9  ;;  %v4287_v19 = vrot.slane %v58_v11, %v5648_v10  ;;  %v107_v22 = vrot.slane %v58_v11, %v5649_v15 }
  0x1b   :  { %317 = vmatpush1.bf16.msra.mxu0 %v3393_v27  ;;  %390 = vmatpush1.bf16.msra.mxu1 %v3394_v28 }
  0x1c   :  { %318 = vmatprep.subr.bf16.mxu0 %v3395_v29  ;;  %391 = vmatprep.subr.bf16.mxu1 %v3397_v30 }
  0x1f   :  { %319 = vmatpush1.bf16.msra.mxu0 %v3399_v31  ;;  %392 = vmatpush1.bf16.msra.mxu1 %v3400_v32 }
  0x20   :  { %646 = vmatprep.subr.bf16.mxu0 %v4015_v33  ;;  %687 = vmatprep.subr.bf16.mxu1 %v4020_v34 }
  0x22   :  { %337 = vmatmul.mubr.bf16.vlgmr.msra.gmra.mxu0 %v3401_v35  ;;  %410 = vmatmul.mubr.bf16.vlgmr.msra.gmra.mxu1 %v3401_v35 }
  0x23   :  { %647 = vmatpush1.bf16.msra.mxu0 %v4028_v36  ;;  %688 = vmatpush1.bf16.msra.mxu1 %v4033_v37 }
  0x24   :  { %648 = vmatprep.subr.bf16.mxu0 %v4040_v38  ;;  %689 = vmatprep.subr.bf16.mxu1 %v4045_v39 }
  0x25   :  { %346 = vmatprep.mubr.bf16.mxu0 %v5651_v1  ;;  %419 = vmatprep.mubr.bf16.mxu1 %v5651_v1 }
  0x27   :  { %649 = vmatpush1.bf16.msra.mxu0 %v4050_v40  ;;  %690 = vmatpush1.bf16.msra.mxu1 %v4057_v41 }
  0x28   :  { %650 = vmatprep.subr.bf16.mxu0 %v4064_v42  ;;  %691 = vmatprep.subr.bf16.mxu1 %v4069_v43 }
  0x2a   :  { %347 = vmatmul.mubr.bf16.gmra.mxu0 %v3414_v44  ;;  %420 = vmatmul.mubr.bf16.gmra.mxu1 %v3414_v44 }
  0x2b   :  { %651 = vmatpush1.bf16.msra.mxu0 %v4079_v45  ;;  %692 = vmatpush1.bf16.msra.mxu1 %v4084_v46 }
  0x2c   :  { %652 = vmatprep.subr.bf16.mxu0 %v4091_v47  ;;  %693 = vmatprep.subr.bf16.mxu1 %v4098_v48 }
  0x2d   :  { %356 = vmatprep.mubr.bf16.mxu0 %v5651_v1  ;;  %429 = vmatprep.mubr.bf16.mxu1 %v5651_v1 }
  0x2f   :  { %653 = vmatpush1.bf16.msra.mxu0 %v4103_v49  ;;  %694 = vmatpush1.bf16.msra.mxu1 %v4108_v50 }
  0x30   :  { %654 = vmatprep.subr.bf16.mxu0 %v4115_v51  ;;  %695 = vmatprep.subr.bf16.mxu1 %v4122_v52 }
  0x32   :  { %357 = vmatmul.mubr.bf16.gmra.mxu0 %v3427_v53  ;;  %430 = vmatmul.mubr.bf16.gmra.mxu1 %v3427_v53 }
  0x33   :  { %655 = vmatpush1.bf16.msra.mxu0 %v4132_v54  ;;  %696 = vmatpush1.bf16.msra.mxu1 %v4137_v55 }
  0x34   :  { %656 = vmatprep.subr.bf16.mxu0 %v4142_v56  ;;  %697 = vmatprep.subr.bf16.mxu1 %v4147_v57 }
  0x35   :  { %366 = vmatprep.mubr.bf16.mxu0 %v5651_v1  ;;  %439 = vmatprep.mubr.bf16.mxu1 %v5651_v1 }
  0x37   :  { %657 = vmatpush1.bf16.msra.mxu0 %v4156_v58  ;;  %698 = vmatpush1.bf16.msra.mxu1 %v4161_v59 }
  0x38   :  { %658 = vmatprep.subr.bf16.mxu0 %v4166_v60  ;;  %699 = vmatprep.subr.bf16.mxu1 %v4171_v61 }
  0x3a   :  { %367 = vmatmul.mubr.bf16.gmra.mxu0 %v3440_v62  ;;  %440 = vmatmul.mubr.bf16.gmra.mxu1 %v3440_v62 }
  0x3b   :  { %659 = vmatpush1.bf16.msra.mxu0 %v4185_v63  ;;  %700 = vmatpush1.bf16.msra.mxu1 %v4190_v0 }
  0x3c   :  { %660 = vmatprep.subr.bf16.mxu0 %v4195_v2  ;;  %701 = vmatprep.subr.bf16.mxu1 %v4204_v3 }
  0x3d   :  { %678 = vmatprep.mubr.bf16.mxu0 %v5651_v1  ;;  %719 = vmatprep.mubr.bf16.mxu1 %v5651_v1 }
  0x3f   :  { %661 = vmatpush1.bf16.msra.mxu0 %v4211_v4  ;;  %702 = vmatpush1.bf16.msra.mxu1 %v4216_v5 }
  0x40   :  { %763 = vmatprep.subr.bf16.mxu0 %v4015_v33  ;;  %804 = vmatprep.subr.bf16.mxu1 %v4020_v34 }
  0x42   :  { %679 = vmatmul.mubr.bf16.vlgmr.msra.gmra.mxu0 %v5651_v1  ;;  %720 = vmatmul.mubr.bf16.vlgmr.msra.gmra.mxu1 %v5651_v1 }
  0x43   :  { %764 = vmatpush1.bf16.msra.mxu0 %v4028_v36  ;;  %805 = vmatpush1.bf16.msra.mxu1 %v4033_v37 }
  0x44   :  { %765 = vmatprep.subr.bf16.mxu0 %v4040_v38  ;;  %806 = vmatprep.subr.bf16.mxu1 %v4045_v39 }
  0x45   :  { %795 = vmatprep.mubr.bf16.mxu0 %v5651_v1  ;;  %836 = vmatprep.mubr.bf16.mxu1 %v5651_v1 }
  0x47   :  { %766 = vmatpush1.bf16.msra.mxu0 %v4050_v40  ;;  %807 = vmatpush1.bf16.msra.mxu1 %v4057_v41 }
  0x48   :  { %767 = vmatprep.subr.bf16.mxu0 %v4064_v42  ;;  %808 = vmatprep.subr.bf16.mxu1 %v4069_v43 }
  0x4b   :  { %768 = vmatpush1.bf16.msra.mxu0 %v4079_v45  ;;  %809 = vmatpush1.bf16.msra.mxu1 %v4084_v46 }
  0x4c   :  { %769 = vmatprep.subr.bf16.mxu0 %v4091_v47  ;;  %810 = vmatprep.subr.bf16.mxu1 %v4098_v48 }
  0x4f   :  { %770 = vmatpush1.bf16.msra.mxu0 %v4103_v49  ;;  %811 = vmatpush1.bf16.msra.mxu1 %v4108_v50 }
  0x50   :  { %771 = vmatprep.subr.bf16.mxu0 %v4115_v51  ;;  %812 = vmatprep.subr.bf16.mxu1 %v4122_v52 }
  0x53   :  { %772 = vmatpush1.bf16.msra.mxu0 %v4132_v54  ;;  %813 = vmatpush1.bf16.msra.mxu1 %v4137_v55 }
  0x54   :  { %773 = vmatprep.subr.bf16.mxu0 %v4142_v56  ;;  %814 = vmatprep.subr.bf16.mxu1 %v4147_v57 }
  0x57   :  { %774 = vmatpush1.bf16.msra.mxu0 %v4156_v58  ;;  %815 = vmatpush1.bf16.msra.mxu1 %v4161_v59 }
  0x58   :  { %775 = vmatprep.subr.bf16.mxu0 %v4166_v60  ;;  %816 = vmatprep.subr.bf16.mxu1 %v4171_v61 }
  0x5b   :  { %776 = vmatpush1.bf16.msra.mxu0 %v4185_v63  ;;  %817 = vmatpush1.bf16.msra.mxu1 %v4190_v0 }
  0x5c   :  { %777 = vmatprep.subr.bf16.mxu0 %v4195_v2  ;;  %818 = vmatprep.subr.bf16.mxu1 %v4204_v3 }
  0x5f   :  { %778 = vmatpush1.bf16.msra.mxu0 %v4211_v4  ;;  %819 = vmatpush1.bf16.msra.mxu1 %v4216_v5 }
  0x60   :  { %881 = vmatprep.subr.bf16.mxu0 %v4015_v33  ;;  %922 = vmatprep.subr.bf16.mxu1 %v4020_v34 }
  0xe2   :  { %v4270_v12 = vpop.f32.mrf.mxu0  ;;  %v4272_v13 = vpop.f32.mrf.mxu1 }
  0xe4   :  { %v4279_v16 = vpop.f32.mrf.mxu0  ;;  %v4281_v17 = vpop.f32.mrf.mxu1 }
  0xe6   :  { %v342_v20 = vpop.f32.mrf.mxu0  ;;  %v415_v21 = vpop.f32.mrf.mxu1 }
  0xe7   :  { %v4291_v23 = vadd.f32 %v342_v20, %v103_v18  ;;  %v4294_v24 = vadd.f32 %v415_v21, %v4276_v14 }
  0xe8   :  { %v344_v25 = vpop.f32.mrf.mxu0  ;;  %v417_v26 = vpop.f32.mrf.mxu1 }
  0xe9   :  { %v4296_v27 = vadd.f32 %v344_v25, %v107_v22  ;;  %v4299_v28 = vadd.f32 %v417_v26, %v4287_v19 }
  0xea   :  { %v348_v29 = vpop.f32.mrf.mxu0  ;;  %v421_v30 = vpop.f32.mrf.mxu1 }
  0xeb   :  { %v4301_v31 = vadd.f32 %v348_v29, %v103_v18  ;;  %v4304_v32 = vadd.f32 %v421_v30, %v4276_v14 }
  0xec   :  { %v350_v35 = vpop.f32.mrf.mxu0  ;;  %v423_v44 = vpop.f32.mrf.mxu1 }
  0xed   :  { %5656 = vst [vmem:[#allocation5_spill] sm:$0xff] %v4304_v32  ;;  %v4306_v53 = vadd.f32 %v350_v35, %v107_v22  ;;  %v4309_v62 = vadd.f32 %v423_v44, %v4287_v19 }
  0xee   :  { %v352_v6 = vpop.f32.mrf.mxu0  ;;  %v425_v11 = vpop.f32.mrf.mxu1 }
  0xef   :  { %v4311_v20 = vadd.f32 %v352_v6, %v103_v18  ;;  %v4314_v21 = vadd.f32 %v425_v11, %v4276_v14 }
  0xf0   :  { %v354_v25 = vpop.f32.mrf.mxu0  ;;  %v427_v26 = vpop.f32.mrf.mxu1 }
  0xf1   :  { %5657 = vst [vmem:[#allocation6_spill] sm:$0xff] %v4311_v20  ;;  %5658 = vst [vmem:[#allocation7_spill] sm:$0xff] %v4314_v21  ;;  %v4316_v29 = vadd.f32 %v354_v25, %v107_v22  ;;  %v4319_v30 = vadd.f32 %v427_v26, %v4287_v19 }
  0xf2   :  { %v358_v8 = vpop.f32.mrf.mxu0  ;;  %v431_v35 = vpop.f32.mrf.mxu1 }
  0xf3   :  { %5659 = vst [vmem:[#allocation8_spill] sm:$0xff] %v4316_v29  ;;  %5660 = vst [vmem:[#allocation9_spill] sm:$0xff] %v4319_v30  ;;  %v4321_v10 = vadd.f32 %v358_v8, %v103_v18  ;;  %v4324_v44 = vadd.f32 %v431_v35, %v4276_v14 }
  0xf4   :  { %v360_v15 = vpop.f32.mrf.mxu0  ;;  %v433_v6 = vpop.f32.mrf.mxu1 }
  0xf5   :  { %5661 = vst [vmem:[#allocation10_spill] sm:$0xff] %v4321_v10  ;;  %5662 = vst [vmem:[#allocation11_spill] sm:$0xff] %v4324_v44  ;;  %v4326_v9 = vadd.f32 %v360_v15, %v107_v22  ;;  %v4329_v11 = vadd.f32 %v433_v6, %v4287_v19 }
  0xf6   :  { %v362_v1 = vpop.f32.mrf.mxu0  ;;  %v435_v25 = vpop.f32.mrf.mxu1 }
  0xf7   :  { %5663 = vst [vmem:[#allocation12_spill] sm:$0xff] %v4326_v9  ;;  %5664 = vst [vmem:[#allocation13_spill] sm:$0xff] %v4329_v11  ;;  %v4331_v7 = vadd.f32 %v362_v1, %v103_v18  ;;  %v4334_v26 = vadd.f32 %v435_v25, %v4276_v14 }
  0xf8   :  { %v364_v21 = vpop.f32.mrf.mxu0  ;;  %v437_v8 = vpop.f32.mrf.mxu1 }
  0xf9   :  { %5665 = vst [vmem:[#allocation14_spill] sm:$0xff] %v4331_v7  ;;  %5666 = vst [vmem:[#allocation15_spill] sm:$0xff] %v4334_v26  ;;  %v4336_v10 = vadd.f32 %v364_v21, %v107_v22  ;;  %v4339_v35 = vadd.f32 %v437_v8, %v4287_v19 }
  0xfa   :  { %v368_v44 = vpop.f32.mrf.mxu0  ;;  %v441_v15 = vpop.f32.mrf.mxu1 }
  0xfb   :  { %5667 = vst [vmem:[#allocation16_spill] sm:$0xff] %v4336_v10  ;;  %5668 = vst [vmem:[#allocation17_spill] sm:$0xff] %v4339_v35  ;;  %v4341_v9 = vadd.f32 %v368_v44, %v103_v18  ;;  %v4344_v6 = vadd.f32 %v441_v15, %v4276_v14 }
  0xfc   :  { %v370_v11 = vpop.f32.mrf.mxu0  ;;  %v443_v1 = vpop.f32.mrf.mxu1 }
  0xfd   :  { %5669 = vst [vmem:[#allocation18_spill] sm:$0xff] %v4341_v9  ;;  %5670 = vst [vmem:[#allocation19_spill] sm:$0xff] %v4344_v6  ;;  %v4346_v7 = vadd.f32 %v370_v11, %v107_v22  ;;  %v4349_v25 = vadd.f32 %v443_v1, %v4287_v19  ;;  %v339_v9 = vadd.f32 %v4270_v12, %v103_v18 }
  0xfe   :  { %v372_v26 = vpop.f32.mrf.mxu0  ;;  %v445_v21 = vpop.f32.mrf.mxu1  ;;  %v341_v1 = vadd.f32 %v4279_v16, %v107_v22 }
  0xff   :  { %5671 = vst [vmem:[#allocation20_spill] sm:$0xff] %v4346_v7  ;;  %5672 = vst [vmem:[#allocation21_spill] sm:$0xff] %v4349_v25  ;;  %v4351_v10 = vadd.f32 %v372_v26, %v103_v18  ;;  %v4354_v8 = vadd.f32 %v445_v21, %v4276_v14  ;;  %v414_v18 = vadd.f32 %v4281_v17, %v4287_v19 }
 0x100   :  { %v374_v35 = vpop.f32.mrf.mxu0  ;;  %v447_v44 = vpop.f32.mrf.mxu1 }
 0x101   :  { %5673 = vst [vmem:[#allocation22_spill] sm:$0xff] %v4351_v10  ;;  %5674 = vst [vmem:[#allocation23_spill] sm:$0xff] %v4354_v8  ;;  %v4357_v15 = vadd.f32 %v374_v35, %v107_v22  ;;  %v4360_v6 = vadd.f32 %v447_v44, %v4287_v19  ;;  %v412_v44 = vadd.f32 %v4272_v13, %v4276_v14 }
 0x102   :  { %v680_v11 = vpop.f32.mrf.mxu0  ;;  %v721_v7 = vpop.f32.mrf.mxu1 }
 0x103   :  { %v728_v25 = vadd.f32 %v680_v11, %v339_v9  ;;  %v730_v22 = vadd.f32 %v721_v7, %v412_v44 }
 0x104   :  { %v682_v30 = vpop.f32.mrf.mxu0  ;;  %v723_v26 = vpop.f32.mrf.mxu1 }
 0x105   :  { %v3202_v10 = vmul.f32 -1.442695, %v728_v25  ;;  %v729_v29 = vadd.f32 %v682_v30, %v341_v1  ;;  %v731_v35 = vadd.f32 %v723_v26, %v414_v18 }
 0x106   :  { %v684_v21 = vpop.f32.mrf.mxu0  ;;  %v725_v8 = vpop.f32.mrf.mxu1 }
 0x107   :  { %3553 = vpow2.f32 %v3202_v10  ;;  %v3203_v20 = vmul.f32 -1.442695, %v729_v29  ;;  %v3204_v16 = vmul.f32 -1.442695, %v731_v35  ;;  %v5675_v21 = vmov 0  }
 0x108   :  { %v685_v32 = vpop.f32.mrf.mxu0  ;;  %v726_v12 = vpop.f32.mrf.mxu1 }
 0x109   :  { %3555 = vpow2.f32 %v3203_v20 }
 0x10a   :  { %3557 = vpow2.f32 %v3204_v16 }
 0x114   :  { %v3554_v9 = vpop.eup %3553 }
 0x115   :  { %v735_v11 = vadd.f32 1.0, %v3554_v9 }
 0x116   :  { %v3556_v25 = vpop.eup %3555 }
 0x117   :  { %3559 = vrcp.f32 %v735_v11  ;;  %v741_v30 = vadd.f32 1.0, %v3556_v25  ;;  %v3558_v10 = vpop.eup %3557 }
 0x118   :  { %3561 = vtanh.f32 %v730_v22  ;;  %v748_v8 = vadd.f32 1.0, %v3558_v10 }
 0x119   :  { %3563 = vrcp.f32 %v741_v30 }
 0x11a   :  { %3565 = vrcp.f32 %v748_v8 }
 0x124   :  { %v3560_v32 = vpop.eup %3559 }
 0x125   :  { %v3562_v20 = vpop.eup %3561 }
 0x126   :  { %v3564_v29 = vpop.eup %3563  ;;  %v752_v19 = vmul.f32 %v3562_v20, %v3560_v32 }
 0x127   :  { %v751_v17 = vmul.f32 0.0, %v3564_v29  ;;  %v3566_v7 = vpop.eup %3565 }
 0x129   :  { %v4367_v1 = vadd.f32 %v752_v19, %v751_v17 }
 0x12b   :  { %3567 = vtanh.f32 %v4367_v1 }
 0x138   :  { %v3568_v13 = vpop.eup %3567 }
 0x139   :  { %v755_v14 = vmul.f32 %v3568_v13, %v3566_v7 }
 0x13b   :  { %v756_v26 = vpack.c.bf16 %v755_v14, %v755_v14 }
 0x13d   :  { %757 = vst [vmem:[#allocation2] sm:$0xf] %v756_v26  ;;  %796 = vmatmul.mubr.bf16.vlgmr.msra.gmra.mxu0 %v756_v26  ;;  %837 = vmatmul.mubr.bf16.vlgmr.msra.gmra.mxu1 %v756_v26 }
 0x13e   :  { %882 = vmatpush1.bf16.msra.mxu0 %v4028_v36  ;;  %923 = vmatpush1.bf16.msra.mxu1 %v4033_v37 }
 0x13f   :  { %883 = vmatprep.subr.bf16.mxu0 %v4040_v38  ;;  %924 = vmatprep.subr.bf16.mxu1 %v4045_v39 }
 0x140   :  { %913 = vmatprep.mubr.bf16.mxu0 %v5675_v21  ;;  %954 = vmatprep.mubr.bf16.mxu1 %v5675_v21 }
 0x142   :  { %884 = vmatpush1.bf16.msra.mxu0 %v4050_v40  ;;  %925 = vmatpush1.bf16.msra.mxu1 %v4057_v41 }
 0x143   :  { %885 = vmatprep.subr.bf16.mxu0 %v4064_v42  ;;  %926 = vmatprep.subr.bf16.mxu1 %v4069_v43 }
 0x146   :  { %886 = vmatpush1.bf16.msra.mxu0 %v4079_v45  ;;  %927 = vmatpush1.bf16.msra.mxu1 %v4084_v46 }
 0x147   :  { %887 = vmatprep.subr.bf16.mxu0 %v4091_v47  ;;  %928 = vmatprep.subr.bf16.mxu1 %v4098_v48 }
 0x14a   :  { %888 = vmatpush1.bf16.msra.mxu0 %v4103_v49  ;;  %929 = vmatpush1.bf16.msra.mxu1 %v4108_v50 }
 0x14b   :  { %889 = vmatprep.subr.bf16.mxu0 %v4115_v51  ;;  %930 = vmatprep.subr.bf16.mxu1 %v4122_v52 }
 0x14e   :  { %890 = vmatpush1.bf16.msra.mxu0 %v4132_v54  ;;  %931 = vmatpush1.bf16.msra.mxu1 %v4137_v55 }
 0x14f   :  { %891 = vmatprep.subr.bf16.mxu0 %v4142_v56  ;;  %932 = vmatprep.subr.bf16.mxu1 %v4147_v57 }
 0x152   :  { %892 = vmatpush1.bf16.msra.mxu0 %v4156_v58  ;;  %933 = vmatpush1.bf16.msra.mxu1 %v4161_v59 }
 0x153   :  { %893 = vmatprep.subr.bf16.mxu0 %v4166_v60  ;;  %934 = vmatprep.subr.bf16.mxu1 %v4171_v61 }
 0x156   :  { %894 = vmatpush1.bf16.msra.mxu0 %v4185_v63  ;;  %935 = vmatpush1.bf16.msra.mxu1 %v4190_v0 }
 0x157   :  { %895 = vmatprep.subr.bf16.mxu0 %v4195_v2  ;;  %936 = vmatprep.subr.bf16.mxu1 %v4204_v3 }
 0x15a   :  { %896 = vmatpush1.bf16.msra.mxu0 %v4211_v4  ;;  %937 = vmatpush1.bf16.msra.mxu1 %v4216_v5 }
 0x15b   :  { %999 = vmatprep.subr.bf16.mxu0 %v4015_v33  ;;  %1040 = vmatprep.subr.bf16.mxu1 %v4020_v34 }
 0x1fd   :  { %v797_v12 = vpop.f32.mrf.mxu0  ;;  %v838_v18 = vpop.f32.mrf.mxu1 }
 0x1fe   :  { %v845_v35 = vadd.f32 %v797_v12, %v4291_v23  ;;  %v847_v29 = vadd.f32 %v838_v18, %v4294_v24 }
 0x1ff   :  { %v799_v44 = vpop.f32.mrf.mxu0  ;;  %v840_v16 = vpop.f32.mrf.mxu1 }
 0x200   :  { %v3205_v9 = vmul.f32 -1.442695, %v845_v35  ;;  %v846_v22 = vadd.f32 %v799_v44, %v4296_v27  ;;  %v848_v20 = vadd.f32 %v840_v16, %v4299_v28 }
 0x201   :  { %v801_v11 = vpop.f32.mrf.mxu0  ;;  %v842_v25 = vpop.f32.mrf.mxu1 }
 0x202   :  { %3569 = vpow2.f32 %v3205_v9  ;;  %v3206_v30 = vmul.f32 -1.442695, %v846_v22  ;;  %v3207_v8 = vmul.f32 -1.442695, %v848_v20 }
 0x203   :  { %v802_v10 = vpop.f32.mrf.mxu0  ;;  %v843_v32 = vpop.f32.mrf.mxu1 }
 0x204   :  { %3571 = vpow2.f32 %v3206_v30 }
 0x205   :  { %3573 = vtanh.f32 %v847_v29 }
 0x206   :  { %3575 = vpow2.f32 %v3207_v8 }
 0x20f   :  { %v3570_v17 = vpop.eup %3569 }
 0x210   :  { %v852_v19 = vadd.f32 1.0, %v3570_v17 }
 0x211   :  { %v3572_v23 = vpop.eup %3571 }
 0x212   :  { %3577 = vrcp.f32 %v852_v19  ;;  %v858_v7 = vadd.f32 1.0, %v3572_v23  ;;  %v3574_v27 = vpop.eup %3573 }
 0x213   :  { %v3576_v13 = vpop.eup %3575 }
 0x214   :  { %3579 = vrcp.f32 %v858_v7  ;;  %v865_v35 = vadd.f32 1.0, %v3576_v13  ;;  %v5676_v7 = vld [vmem:[#allocation5_spill] sm:$0xff] }
 0x216   :  { %3581 = vrcp.f32 %v865_v35 }
 0x21f   :  { %v3578_v14 = vpop.eup %3577 }
 0x220   :  { %v869_v26 = vmul.f32 %v3578_v14, %v3574_v27 }
 0x221   :  { %v3580_v12 = vpop.eup %3579 }
 0x222   :  { %v868_v44 = vmul.f32 %v3580_v12, %v4367_v1 }
 0x223   :  { %v3582_v24 = vpop.eup %3581 }
 0x224   :  { %v4409_v28 = vadd.f32 %v869_v26, %v868_v44 }
 0x226   :  { %3583 = vtanh.f32 %v4409_v28 }
 0x233   :  { %v3584_v18 = vpop.eup %3583 }
 0x234   :  { %v872_v16 = vmul.f32 %v3584_v18, %v3582_v24 }
 0x236   :  { %v873_v9 = vpack.c.bf16 %v872_v16, %v872_v16 }
 0x238   :  { %875 = vst [vmem:[#allocation2 + $0x4] sm:$0xf] %v873_v9  ;;  %914 = vmatmul.mubr.bf16.vlgmr.msra.gmra.mxu0 %v873_v9  ;;  %955 = vmatmul.mubr.bf16.vlgmr.msra.gmra.mxu1 %v873_v9 }
 0x239   :  { %1000 = vmatpush1.bf16.msra.mxu0 %v4028_v36  ;;  %1041 = vmatpush1.bf16.msra.mxu1 %v4033_v37 }
 0x23a   :  { %1001 = vmatprep.subr.bf16.mxu0 %v4040_v38  ;;  %1042 = vmatprep.subr.bf16.mxu1 %v4045_v39 }
 0x23b   :  { %1031 = vmatprep.mubr.bf16.mxu0 %v5675_v21  ;;  %1072 = vmatprep.mubr.bf16.mxu1 %v5675_v21 }
 0x23d   :  { %1002 = vmatpush1.bf16.msra.mxu0 %v4050_v40  ;;  %1043 = vmatpush1.bf16.msra.mxu1 %v4057_v41 }
 0x23e   :  { %1003 = vmatprep.subr.bf16.mxu0 %v4064_v42  ;;  %1044 = vmatprep.subr.bf16.mxu1 %v4069_v43 }
 0x241   :  { %1004 = vmatpush1.bf16.msra.mxu0 %v4079_v45  ;;  %1045 = vmatpush1.bf16.msra.mxu1 %v4084_v46 }
 0x242   :  { %1005 = vmatprep.subr.bf16.mxu0 %v4091_v47  ;;  %1046 = vmatprep.subr.bf16.mxu1 %v4098_v48 }
 0x245   :  { %1006 = vmatpush1.bf16.msra.mxu0 %v4103_v49  ;;  %1047 = vmatpush1.bf16.msra.mxu1 %v4108_v50 }
 0x246   :  { %1007 = vmatprep.subr.bf16.mxu0 %v4115_v51  ;;  %1048 = vmatprep.subr.bf16.mxu1 %v4122_v52 }
 0x249   :  { %1008 = vmatpush1.bf16.msra.mxu0 %v4132_v54  ;;  %1049 = vmatpush1.bf16.msra.mxu1 %v4137_v55 }
 0x24a   :  { %1009 = vmatprep.subr.bf16.mxu0 %v4142_v56  ;;  %1050 = vmatprep.subr.bf16.mxu1 %v4147_v57 }
 0x24d   :  { %1010 = vmatpush1.bf16.msra.mxu0 %v4156_v58  ;;  %1051 = vmatpush1.bf16.msra.mxu1 %v4161_v59 }
 0x24e   :  { %1011 = vmatprep.subr.bf16.mxu0 %v4166_v60  ;;  %1052 = vmatprep.subr.bf16.mxu1 %v4171_v61 }
 0x251   :  { %1012 = vmatpush1.bf16.msra.mxu0 %v4185_v63  ;;  %1053 = vmatpush1.bf16.msra.mxu1 %v4190_v0 }
 0x252   :  { %1013 = vmatprep.subr.bf16.mxu0 %v4195_v2  ;;  %1054 = vmatprep.subr.bf16.mxu1 %v4204_v3 }
 0x255   :  { %1014 = vmatpush1.bf16.msra.mxu0 %v4211_v4  ;;  %1055 = vmatpush1.bf16.msra.mxu1 %v4216_v5 }
 0x256   :  { %1117 = vmatprep.subr.bf16.mxu0 %v4015_v33  ;;  %1158 = vmatprep.subr.bf16.mxu1 %v4020_v34 }
 0x2f8   :  { %v915_v1 = vpop.f32.mrf.mxu0  ;;  %v956_v22 = vpop.f32.mrf.mxu1 }
 0x2f9   :  { %v963_v11 = vadd.f32 %v915_v1, %v4301_v31  ;;  %v965_v27 = vadd.f32 %v956_v22, %v5676_v7 }
 0x2fa   :  { %v917_v25 = vpop.f32.mrf.mxu0  ;;  %v958_v30 = vpop.f32.mrf.mxu1 }
 0x2fb   :  { %v3208_v10 = vmul.f32 -1.442695, %v963_v11  ;;  %v964_v32 = vadd.f32 %v917_v25, %v4306_v53  ;;  %v966_v23 = vadd.f32 %v958_v30, %v4309_v62  ;;  %v5678_v30 = vld [vmem:[#allocation8_spill] sm:$0xff] }
 0x2fc   :  { %v919_v20 = vpop.f32.mrf.mxu0  ;;  %v960_v29 = vpop.f32.mrf.mxu1 }
 0x2fd   :  { %3585 = vpow2.f32 %v3208_v10  ;;  %v3209_v8 = vmul.f32 -1.442695, %v964_v32  ;;  %v3210_v13 = vmul.f32 -1.442695, %v966_v23  ;;  %v5680_v23 = vld [vmem:[#allocation7_spill] sm:$0xff] }
 0x2fe   :  { %v920_v17 = vpop.f32.mrf.mxu0  ;;  %v961_v19 = vpop.f32.mrf.mxu1 }
 0x2ff   :  { %3587 = vpow2.f32 %v3209_v8  ;;  %v5679_v19 = vld [vmem:[#allocation9_spill] sm:$0xff] }
 0x300   :  { %3589 = vtanh.f32 %v965_v27 }
 0x301   :  { %3591 = vpow2.f32 %v3210_v13 }
 0x30a   :  { %v3586_v14 = vpop.eup %3585 }
 0x30b   :  { %v970_v26 = vadd.f32 1.0, %v3586_v14 }
 0x30c   :  { %v3588_v31 = vpop.eup %3587 }
 0x30d   :  { %3593 = vrcp.f32 %v970_v26  ;;  %v976_v12 = vadd.f32 1.0, %v3588_v31  ;;  %v3590_v53 = vpop.eup %3589 }
 0x30e   :  { %v3592_v35 = vpop.eup %3591 }
 0x30f   :  { %3595 = vrcp.f32 %v976_v12  ;;  %v983_v16 = vadd.f32 1.0, %v3592_v35 }
 0x311   :  { %3597 = vrcp.f32 %v983_v16 }
 0x31a   :  { %v3594_v44 = vpop.eup %3593 }
 0x31b   :  { %v987_v24 = vmul.f32 %v3594_v44, %v3590_v53 }
 0x31c   :  { %v3596_v18 = vpop.eup %3595 }
 0x31d   :  { %v986_v9 = vmul.f32 %v3596_v18, %v4409_v28 }
 0x31e   :  { %v3598_v1 = vpop.eup %3597 }
 0x31f   :  { %v4451_v62 = vadd.f32 %v987_v24, %v986_v9 }
 0x321   :  { %3599 = vtanh.f32 %v4451_v62 }
 0x32e   :  { %v3600_v22 = vpop.eup %3599 }
 0x32f   :  { %v990_v11 = vmul.f32 %v3600_v22, %v3598_v1 }
 0x331   :  { %v991_v25 = vpack.c.bf16 %v990_v11, %v990_v11 }
 0x333   :  { %993 = vst [vmem:[#allocation2 + $0x8] sm:$0xf] %v991_v25  ;;  %1032 = vmatmul.mubr.bf16.vlgmr.msra.gmra.mxu0 %v991_v25  ;;  %1073 = vmatmul.mubr.bf16.vlgmr.msra.gmra.mxu1 %v991_v25  ;;  %v4499_v25 = vld [vmem:[%s5641_s3 + $0xe0] ss:$16 sps:$4 sm:$0xff]  }
 0x334   :  { %1118 = vmatpush1.bf16.msra.mxu0 %v4028_v36  ;;  %1159 = vmatpush1.bf16.msra.mxu1 %v4033_v37 }
 0x335   :  { %1119 = vmatprep.subr.bf16.mxu0 %v4040_v38  ;;  %1160 = vmatprep.subr.bf16.mxu1 %v4045_v39  ;;  %v5677_v38 = vld [vmem:[#allocation6_spill] sm:$0xff] }
 0x336   :  { %1149 = vmatprep.mubr.bf16.mxu0 %v5675_v21  ;;  %1190 = vmatprep.mubr.bf16.mxu1 %v5675_v21 }
 0x338   :  { %1120 = vmatpush1.bf16.msra.mxu0 %v4050_v40  ;;  %1161 = vmatpush1.bf16.msra.mxu1 %v4057_v41 }
 0x339   :  { %1121 = vmatprep.subr.bf16.mxu0 %v4064_v42  ;;  %1162 = vmatprep.subr.bf16.mxu1 %v4069_v43 }
 0x33c   :  { %1122 = vmatpush1.bf16.msra.mxu0 %v4079_v45  ;;  %1163 = vmatpush1.bf16.msra.mxu1 %v4084_v46 }
 0x33d   :  { %1123 = vmatprep.subr.bf16.mxu0 %v4091_v47  ;;  %1164 = vmatprep.subr.bf16.mxu1 %v4098_v48 }
 0x340   :  { %1124 = vmatpush1.bf16.msra.mxu0 %v4103_v49  ;;  %1165 = vmatpush1.bf16.msra.mxu1 %v4108_v50 }
 0x341   :  { %1125 = vmatprep.subr.bf16.mxu0 %v4115_v51  ;;  %1166 = vmatprep.subr.bf16.mxu1 %v4122_v52 }
 0x344   :  { %1126 = vmatpush1.bf16.msra.mxu0 %v4132_v54  ;;  %1167 = vmatpush1.bf16.msra.mxu1 %v4137_v55 }
 0x345   :  { %1127 = vmatprep.subr.bf16.mxu0 %v4142_v56  ;;  %1168 = vmatprep.subr.bf16.mxu1 %v4147_v57 }
 0x348   :  { %1128 = vmatpush1.bf16.msra.mxu0 %v4156_v58  ;;  %1169 = vmatpush1.bf16.msra.mxu1 %v4161_v59 }
 0x349   :  { %1129 = vmatprep.subr.bf16.mxu0 %v4166_v60  ;;  %1170 = vmatprep.subr.bf16.mxu1 %v4171_v61 }
 0x34c   :  { %1130 = vmatpush1.bf16.msra.mxu0 %v4185_v63  ;;  %1171 = vmatpush1.bf16.msra.mxu1 %v4190_v0 }
 0x34d   :  { %1131 = vmatprep.subr.bf16.mxu0 %v4195_v2  ;;  %1172 = vmatprep.subr.bf16.mxu1 %v4204_v3 }
 0x350   :  { %1132 = vmatpush1.bf16.msra.mxu0 %v4211_v4  ;;  %1173 = vmatpush1.bf16.msra.mxu1 %v4216_v5 }
 0x351   :  { %1235 = vmatprep.subr.bf16.mxu0 %v4015_v33  ;;  %1276 = vmatprep.subr.bf16.mxu1 %v4020_v34 }
 0x3f3   :  { %v1033_v36 = vpop.f32.mrf.mxu0  ;;  %v1074_v37 = vpop.f32.mrf.mxu1 }
 0x3f4   :  { %v1081_v39 = vadd.f32 %v1033_v36, %v5677_v38  ;;  %v1083_v34 = vadd.f32 %v1074_v37, %v5680_v23  ;;  %v4511_v36 = vld [vmem:[%s5641_s3 + $0xc4] ss:$16 sps:$4 sm:$0xff]   ;;  %v4517_v37 = vld [vmem:[%s5641_s3 + $0xcc] ss:$16 sps:$4 sm:$0xff]   ;;  %v4525_v38 = vld [vmem:[%s5641_s3 + $0xc0] ss:$16 sps:$4 sm:$0xff]  }
 0x3f5   :  { %v1035_v40 = vpop.f32.mrf.mxu0  ;;  %v1076_v41 = vpop.f32.mrf.mxu1 }
 0x3f6   :  { %v3211_v28 = vmul.f32 -1.442695, %v1081_v39  ;;  %v1082_v10 = vadd.f32 %v1035_v40, %v5678_v30  ;;  %v1084_v33 = vadd.f32 %v1076_v41, %v5679_v19  ;;  %v4531_v39 = vld [vmem:[%s5641_s3 + $0xc8] ss:$16 sps:$4 sm:$0xff]  }
 0x3f7   :  { %v1037_v32 = vpop.f32.mrf.mxu0  ;;  %v1078_v20 = vpop.f32.mrf.mxu1 }
 0x3f8   :  { %3601 = vpow2.f32 %v3211_v28  ;;  %v3212_v29 = vmul.f32 -1.442695, %v1082_v10  ;;  %v3213_v7 = vmul.f32 -1.442695, %v1084_v33 }
 0x3f9   :  { %v1038_v8 = vpop.f32.mrf.mxu0  ;;  %v1079_v17 = vpop.f32.mrf.mxu1 }
 0x3fa   :  { %3603 = vpow2.f32 %v3212_v29 }
 0x3fb   :  { %3605 = vtanh.f32 %v1083_v34 }
 0x3fc   :  { %3607 = vpow2.f32 %v3213_v7 }
 0x405   :  { %v3602_v27 = vpop.eup %3601 }
 0x406   :  { %v1088_v13 = vadd.f32 1.0, %v3602_v27 }
 0x407   :  { %v3604_v14 = vpop.eup %3603 }
 0x408   :  { %3609 = vrcp.f32 %v1088_v13  ;;  %v1094_v26 = vadd.f32 1.0, %v3604_v14  ;;  %v3606_v31 = vpop.eup %3605  ;;  %v4589_v13 = vld [vmem:[%s5641_s3 + $0xa4] ss:$16 sps:$4 sm:$0xff]   ;;  %v4595_v14 = vld [vmem:[%s5641_s3 + $0xac] ss:$16 sps:$4 sm:$0xff]  }
 0x409   :  { %v3608_v12 = vpop.eup %3607 }
 0x40a   :  { %3611 = vrcp.f32 %v1094_v26  ;;  %v1101_v24 = vadd.f32 1.0, %v3608_v12  ;;  %v4601_v26 = vld [vmem:[%s5641_s3 + $0xa0] ss:$16 sps:$4 sm:$0xff]   ;;  %v4613_v12 = vld [vmem:[%s5641_s3 + $0x84] ss:$16 sps:$4 sm:$0xff]  }
 0x40c   :  { %3613 = vrcp.f32 %v1101_v24  ;;  %v4637_v24 = vld [vmem:[%s5641_s3 + $0x64] ss:$16 sps:$4 sm:$0xff]  }
 0x415   :  { %v3610_v53 = vpop.eup %3609 }
 0x416   :  { %v1105_v35 = vmul.f32 %v3610_v53, %v3606_v31  ;;  %v4607_v31 = vld [vmem:[%s5641_s3 + $0xa8] ss:$16 sps:$4 sm:$0xff]   ;;  %v4619_v53 = vld [vmem:[%s5641_s3 + $0x8c] ss:$16 sps:$4 sm:$0xff]  }
 0x417   :  { %v3612_v44 = vpop.eup %3611 }
 0x418   :  { %v1104_v18 = vmul.f32 %v3612_v44, %v4451_v62  ;;  %v4505_v62 = vld [vmem:[%s5641_s3 + $0xe8] ss:$16 sps:$4 sm:$0xff]  }
 0x419   :  { %v3614_v9 = vpop.eup %3613  ;;  %v4631_v44 = vld [vmem:[%s5641_s3 + $0x88] ss:$16 sps:$4 sm:$0xff]  }
 0x41a   :  { %v4493_v16 = vadd.f32 %v1105_v35, %v1104_v18  ;;  %v4625_v35 = vld [vmem:[%s5641_s3 + $0x80] ss:$16 sps:$4 sm:$0xff]   ;;  %v4643_v18 = vld [vmem:[%s5641_s3 + $0x6c] ss:$16 sps:$4 sm:$0xff]  }
 0x41c   :  { %3615 = vtanh.f32 %v4493_v16 }
 0x429   :  { %v3616_v1 = vpop.eup %3615 }
 0x42a   :  { %v1108_v22 = vmul.f32 %v3616_v1, %v3614_v9  ;;  %v4655_v9 = vld [vmem:[%s5641_s3 + $0x68] ss:$16 sps:$4 sm:$0xff]   ;;  %v4661_v1 = vld [vmem:[%s5641_s3 + $0x44] ss:$16 sps:$4 sm:$0xff]  }
 0x42c   :  { %v1109_v11 = vpack.c.bf16 %v1108_v22, %v1108_v22  ;;  %v4667_v22 = vld [vmem:[%s5641_s3 + $0x4c] ss:$16 sps:$4 sm:$0xff]  }
 0x42e   :  { %1111 = vst [vmem:[#allocation2 + $0xc] sm:$0xf] %v1109_v11  ;;  %1150 = vmatmul.mubr.bf16.vlgmr.msra.gmra.mxu0 %v1109_v11  ;;  %1191 = vmatmul.mubr.bf16.vlgmr.msra.gmra.mxu1 %v1109_v11  ;;  %v4673_v11 = vld [vmem:[%s5641_s3 + $0x40] ss:$16 sps:$4 sm:$0xff]  }
 0x42f   :  { %1236 = vmatpush1.bf16.msra.mxu0 %v4499_v25  ;;  %1277 = vmatpush1.bf16.msra.mxu1 %v4505_v62 }
 0x430   :  { %1237 = vmatprep.subr.bf16.mxu0 %v4511_v36  ;;  %1278 = vmatprep.subr.bf16.mxu1 %v4517_v37 }
 0x431   :  { %1267 = vmatprep.mubr.bf16.mxu0 %v5675_v21  ;;  %1308 = vmatprep.mubr.bf16.mxu1 %v5675_v21 }
 0x433   :  { %1238 = vmatpush1.bf16.msra.mxu0 %v4525_v38  ;;  %1279 = vmatpush1.bf16.msra.mxu1 %v4531_v39 }
 0x434   :  { %1239 = vmatprep.subr.bf16.mxu0 %v4064_v42  ;;  %1280 = vmatprep.subr.bf16.mxu1 %v4069_v43  ;;  %v4561_v42 = vld [vmem:[%s5641_s3 + $0xe4] ss:$16 sps:$4 sm:$0xff]   ;;  %v4567_v43 = vld [vmem:[%s5641_s3 + $0xec] ss:$16 sps:$4 sm:$0xff]  }
 0x437   :  { %1240 = vmatpush1.bf16.msra.mxu0 %v4079_v45  ;;  %1281 = vmatpush1.bf16.msra.mxu1 %v4084_v46 }
 0x438   :  { %1241 = vmatprep.subr.bf16.mxu0 %v4091_v47  ;;  %1282 = vmatprep.subr.bf16.mxu1 %v4098_v48  ;;  %v5681_v47 = vld [vmem:[#allocation10_spill] sm:$0xff] }
 0x43b   :  { %1242 = vmatpush1.bf16.msra.mxu0 %v4103_v49  ;;  %1283 = vmatpush1.bf16.msra.mxu1 %v4108_v50 }
 0x43c   :  { %1243 = vmatprep.subr.bf16.mxu0 %v4115_v51  ;;  %1284 = vmatprep.subr.bf16.mxu1 %v4122_v52  ;;  %v5682_v52 = vld [vmem:[#allocation12_spill] sm:$0xff] }
 0x43f   :  { %1244 = vmatpush1.bf16.msra.mxu0 %v4132_v54  ;;  %1285 = vmatpush1.bf16.msra.mxu1 %v4137_v55 }
 0x440   :  { %1245 = vmatprep.subr.bf16.mxu0 %v4142_v56  ;;  %1286 = vmatprep.subr.bf16.mxu1 %v4147_v57 }
 0x443   :  { %1246 = vmatpush1.bf16.msra.mxu0 %v4156_v58  ;;  %1287 = vmatpush1.bf16.msra.mxu1 %v4161_v59 }
 0x444   :  { %1247 = vmatprep.subr.bf16.mxu0 %v4166_v60  ;;  %1288 = vmatprep.subr.bf16.mxu1 %v4171_v61  ;;  %v5683_v60 = vld [vmem:[#allocation13_spill] sm:$0xff] }
 0x447   :  { %1248 = vmatpush1.bf16.msra.mxu0 %v4185_v63  ;;  %1289 = vmatpush1.bf16.msra.mxu1 %v4190_v0  ;;  %v5684_v63 = vld [vmem:[#allocation11_spill] sm:$0xff] }
 0x448   :  { %1249 = vmatprep.subr.bf16.mxu0 %v4195_v2  ;;  %1290 = vmatprep.subr.bf16.mxu1 %v4204_v3 }
 0x44b   :  { %1250 = vmatpush1.bf16.msra.mxu0 %v4211_v4  ;;  %1291 = vmatpush1.bf16.msra.mxu1 %v4216_v5 }
 0x44c   :  { %1353 = vmatprep.subr.bf16.mxu0 %v4561_v42  ;;  %1394 = vmatprep.subr.bf16.mxu1 %v4567_v43 }
 0x4ee   :  { %v1151_v45 = vpop.f32.mrf.mxu0  ;;  %v1192_v46 = vpop.f32.mrf.mxu1 }
 0x4ef   :  { %v1199_v48 = vadd.f32 %v1151_v45, %v5681_v47  ;;  %v1201_v0 = vadd.f32 %v1192_v46, %v5684_v63  ;;  %v4679_v45 = vld [vmem:[%s5641_s3 + $0x48] ss:$16 sps:$4 sm:$0xff]   ;;  %v4685_v46 = vld [vmem:[%s5641_s3 + $0x24] ss:$16 sps:$4 sm:$0xff]   ;;  %v4691_v47 = vld [vmem:[%s5641_s3 + $0x2c] ss:$16 sps:$4 sm:$0xff]  }
 0x4f0   :  { %v1153_v49 = vpop.f32.mrf.mxu0  ;;  %v1194_v50 = vpop.f32.mrf.mxu1 }
 0x4f1   :  { %v3214_v51 = vmul.f32 -1.442695, %v1199_v48  ;;  %v1200_v54 = vadd.f32 %v1153_v49, %v5682_v52  ;;  %v1202_v61 = vadd.f32 %v1194_v50, %v5683_v60  ;;  %v4697_v48 = vld [vmem:[%s5641_s3 + $0x20] ss:$16 sps:$4 sm:$0xff]   ;;  %v4703_v49 = vld [vmem:[%s5641_s3 + $0x28] ss:$16 sps:$4 sm:$0xff]  }
 0x4f2   :  { %v1155_v55 = vpop.f32.mrf.mxu0  ;;  %v1196_v56 = vpop.f32.mrf.mxu1  ;;  %v4709_v50 = vld [vmem:[%s5641_s3 + $0x4] ss:$16 sps:$4 sm:$0xff]  }
 0x4f3   :  { %3617 = vpow2.f32 %v3214_v51  ;;  %v3215_v57 = vmul.f32 -1.442695, %v1200_v54  ;;  %v3216_v2 = vmul.f32 -1.442695, %v1202_v61  ;;  %v5685_v54 = vld [vmem:[#allocation14_spill] sm:$0xff] }
 0x4f4   :  { %v1156_v58 = vpop.f32.mrf.mxu0  ;;  %v1197_v59 = vpop.f32.mrf.mxu1 }
 0x4f5   :  { %3619 = vpow2.f32 %v3215_v57  ;;  %v5686_v59 = vld [vmem:[#allocation16_spill] sm:$0xff] }
 0x4f6   :  { %3621 = vtanh.f32 %v1201_v0 }
 0x4f7   :  { %3623 = vpow2.f32 %v3216_v2  ;;  %v5688_v2 = vld [vmem:[#allocation15_spill] sm:$0xff] }
 0x500   :  { %v3618_v40 = vpop.eup %3617 }
 0x501   :  { %v1206_v41 = vadd.f32 1.0, %v3618_v40 }
 0x502   :  { %v3620_v28 = vpop.eup %3619 }
 0x503   :  { %3625 = vrcp.f32 %v1206_v41  ;;  %v1212_v30 = vadd.f32 1.0, %v3620_v28  ;;  %v3622_v10 = vpop.eup %3621 }
 0x504   :  { %v3624_v32 = vpop.eup %3623 }
 0x505   :  { %3627 = vrcp.f32 %v1212_v30  ;;  %v1219_v17 = vadd.f32 1.0, %v3624_v32 }
 0x507   :  { %3629 = vrcp.f32 %v1219_v17 }
 0x510   :  { %v3626_v20 = vpop.eup %3625 }
 0x511   :  { %v1223_v29 = vmul.f32 %v3626_v20, %v3622_v10 }
 0x512   :  { %v3628_v8 = vpop.eup %3627 }
 0x513   :  { %v1222_v19 = vmul.f32 %v3628_v8, %v4493_v16  ;;  %v4649_v16 = vld [vmem:[%s5641_s3 + $0x60] ss:$16 sps:$4 sm:$0xff]  }
 0x514   :  { %v3630_v23 = vpop.eup %3629 }
 0x515   :  { %v4575_v33 = vadd.f32 %v1223_v29, %v1222_v19 }
 0x517   :  { %3631 = vtanh.f32 %v4575_v33 }
 0x524   :  { %v3632_v34 = vpop.eup %3631 }
 0x525   :  { %v1226_v7 = vmul.f32 %v3632_v34, %v3630_v23 }
 0x527   :  { %v1227_v27 = vpack.c.bf16 %v1226_v7, %v1226_v7 }
 0x529   :  { %1229 = vst [vmem:[#allocation2 + $0x10] sm:$0xf] %v1227_v27  ;;  %1268 = vmatmul.mubr.bf16.vlgmr.msra.gmra.mxu0 %v1227_v27  ;;  %1309 = vmatmul.mubr.bf16.vlgmr.msra.gmra.mxu1 %v1227_v27 }
 0x52a   :  { %1354 = vmatpush1.bf16.msra.mxu0 %v4499_v25  ;;  %1395 = vmatpush1.bf16.msra.mxu1 %v4505_v62 }
 0x52b   :  { %1355 = vmatprep.subr.bf16.mxu0 %v4511_v36  ;;  %1396 = vmatprep.subr.bf16.mxu1 %v4517_v37 }
 0x52c   :  { %1385 = vmatprep.mubr.bf16.mxu0 %v5675_v21  ;;  %1426 = vmatprep.mubr.bf16.mxu1 %v5675_v21 }
 0x52e   :  { %1356 = vmatpush1.bf16.msra.mxu0 %v4525_v38  ;;  %1397 = vmatpush1.bf16.msra.mxu1 %v4531_v39 }
 0x52f   :  { %1357 = vmatprep.subr.bf16.mxu0 %v4589_v13  ;;  %1398 = vmatprep.subr.bf16.mxu1 %v4595_v14 }
 0x532   :  { %1358 = vmatpush1.bf16.msra.mxu0 %v4601_v26  ;;  %1399 = vmatpush1.bf16.msra.mxu1 %v4607_v31 }
 0x533   :  { %1359 = vmatprep.subr.bf16.mxu0 %v4613_v12  ;;  %1400 = vmatprep.subr.bf16.mxu1 %v4619_v53 }
 0x536   :  { %1360 = vmatpush1.bf16.msra.mxu0 %v4625_v35  ;;  %1401 = vmatpush1.bf16.msra.mxu1 %v4631_v44 }
 0x537   :  { %1361 = vmatprep.subr.bf16.mxu0 %v4637_v24  ;;  %1402 = vmatprep.subr.bf16.mxu1 %v4643_v18 }
 0x53a   :  { %1362 = vmatpush1.bf16.msra.mxu0 %v4649_v16  ;;  %1403 = vmatpush1.bf16.msra.mxu1 %v4655_v9 }
 0x53b   :  { %1363 = vmatprep.subr.bf16.mxu0 %v4661_v1  ;;  %1404 = vmatprep.subr.bf16.mxu1 %v4667_v22 }
 0x53e   :  { %1364 = vmatpush1.bf16.msra.mxu0 %v4673_v11  ;;  %1405 = vmatpush1.bf16.msra.mxu1 %v4679_v45 }
 0x53f   :  { %1365 = vmatprep.subr.bf16.mxu0 %v4685_v46  ;;  %1406 = vmatprep.subr.bf16.mxu1 %v4691_v47 }
 0x542   :  { %1366 = vmatpush1.bf16.msra.mxu0 %v4697_v48  ;;  %1407 = vmatpush1.bf16.msra.mxu1 %v4703_v49 }
 0x543   :  { %1367 = vmatprep.subr.bf16.mxu0 %v4709_v50  ;;  %1408 = vmatprep.subr.bf16.mxu1 %v4204_v3 }
 0x546   :  { %1368 = vmatpush1.bf16.msra.mxu0 %v4211_v4  ;;  %1409 = vmatpush1.bf16.msra.mxu1 %v4216_v5  ;;  %v5687_v5 = vld [vmem:[#allocation17_spill] sm:$0xff] }
 0x547   :  { %1471 = vmatprep.subr.bf16.mxu0 %v4561_v42  ;;  %1512 = vmatprep.subr.bf16.mxu1 %v4567_v43 }
 0x5e9   :  { %v1269_v51 = vpop.f32.mrf.mxu0  ;;  %v1310_v52 = vpop.f32.mrf.mxu1 }
 0x5ea   :  { %v1317_v55 = vadd.f32 %v1269_v51, %v5685_v54  ;;  %v1319_v43 = vadd.f32 %v1310_v52, %v5688_v2  ;;  %v3461_v2 = vld [vmem:[%s5643_s4 + $0xc4] ss:$16 sps:$4 sm:$0xff]  }
 0x5eb   :  { %v1271_v56 = vpop.f32.mrf.mxu0  ;;  %v1312_v57 = vpop.f32.mrf.mxu1 }
 0x5ec   :  { %v3217_v58 = vmul.f32 -1.442695, %v1317_v55  ;;  %v1318_v60 = vadd.f32 %v1271_v56, %v5686_v59  ;;  %v1320_v42 = vadd.f32 %v1312_v57, %v5687_v5  ;;  %v3456_v5 = vld [vmem:[%s5643_s4 + $0xe8] ss:$16 sps:$4 sm:$0xff]  }
 0x5ed   :  { %v1273_v61 = vpop.f32.mrf.mxu0  ;;  %v1314_v63 = vpop.f32.mrf.mxu1 }
 0x5ee   :  { %3633 = vpow2.f32 %v3217_v58  ;;  %v3218_v3 = vmul.f32 -1.442695, %v1318_v60  ;;  %v3219_v40 = vmul.f32 -1.442695, %v1320_v42 }
 0x5ef   :  { %v1274_v4 = vpop.f32.mrf.mxu0  ;;  %v1315_v0 = vpop.f32.mrf.mxu1 }
 0x5f0   :  { %3635 = vpow2.f32 %v3218_v3  ;;  %v3453_v0 = vld [vmem:[%s5643_s4 + $0xe0] ss:$16 sps:$4 sm:$0xff]  }
 0x5f1   :  { %3637 = vtanh.f32 %v1319_v43  ;;  %v3464_v43 = vld [vmem:[%s5643_s4 + $0xcc] ss:$16 sps:$4 sm:$0xff]  }
 0x5f2   :  { %3639 = vpow2.f32 %v3219_v40  ;;  %v3459_v40 = vld [vmem:[%s5643_s4 + $0xc0] ss:$16 sps:$4 sm:$0xff]  }
 0x5fb   :  { %v3634_v41 = vpop.eup %3633 }
 0x5fc   :  { %v1324_v28 = vadd.f32 1.0, %v3634_v41  ;;  %v3462_v41 = vld [vmem:[%s5643_s4 + $0xc8] ss:$16 sps:$4 sm:$0xff]  }
 0x5fd   :  { %v3636_v30 = vpop.eup %3635 }
 0x5fe   :  { %3641 = vrcp.f32 %v1324_v28  ;;  %v1330_v10 = vadd.f32 1.0, %v3636_v30  ;;  %v3638_v32 = vpop.eup %3637  ;;  %v3467_v28 = vld [vmem:[%s5643_s4 + $0xa4] ss:$16 sps:$4 sm:$0xff]   ;;  %v3470_v30 = vld [vmem:[%s5643_s4 + $0xac] ss:$16 sps:$4 sm:$0xff]  }
 0x5ff   :  { %v3640_v20 = vpop.eup %3639 }
 0x600   :  { %3643 = vrcp.f32 %v1330_v10  ;;  %v1337_v19 = vadd.f32 1.0, %v3640_v20  ;;  %v3465_v10 = vld [vmem:[%s5643_s4 + $0xa0] ss:$16 sps:$4 sm:$0xff]   ;;  %v3473_v20 = vld [vmem:[%s5643_s4 + $0x84] ss:$16 sps:$4 sm:$0xff]  }
 0x602   :  { %3645 = vrcp.f32 %v1337_v19  ;;  %v3479_v19 = vld [vmem:[%s5643_s4 + $0x64] ss:$16 sps:$4 sm:$0xff]  }
 0x60b   :  { %v3642_v29 = vpop.eup %3641 }
 0x60c   :  { %v1341_v8 = vmul.f32 %v3642_v29, %v3638_v32  ;;  %v3468_v32 = vld [vmem:[%s5643_s4 + $0xa8] ss:$16 sps:$4 sm:$0xff]   ;;  %v3476_v29 = vld [vmem:[%s5643_s4 + $0x8c] ss:$16 sps:$4 sm:$0xff]  }
 0x60d   :  { %v3644_v17 = vpop.eup %3643 }
 0x60e   :  { %v1340_v23 = vmul.f32 %v3644_v17, %v4575_v33  ;;  %v3474_v17 = vld [vmem:[%s5643_s4 + $0x88] ss:$16 sps:$4 sm:$0xff]  }
 0x60f   :  { %v3646_v7 = vpop.eup %3645 }
 0x610   :  { %v4722_v34 = vadd.f32 %v1341_v8, %v1340_v23  ;;  %v3471_v8 = vld [vmem:[%s5643_s4 + $0x80] ss:$16 sps:$4 sm:$0xff]   ;;  %v3482_v23 = vld [vmem:[%s5643_s4 + $0x6c] ss:$16 sps:$4 sm:$0xff]  }
 0x612   :  { %3647 = vtanh.f32 %v4722_v34 }
 0x61f   :  { %v3648_v27 = vpop.eup %3647 }
 0x620   :  { %v1344_v51 = vmul.f32 %v3648_v27, %v3646_v7  ;;  %v3480_v7 = vld [vmem:[%s5643_s4 + $0x68] ss:$16 sps:$4 sm:$0xff]   ;;  %v3485_v27 = vld [vmem:[%s5643_s4 + $0x44] ss:$16 sps:$4 sm:$0xff]  }
 0x622   :  { %v1345_v52 = vpack.c.bf16 %v1344_v51, %v1344_v51  ;;  %v3488_v51 = vld [vmem:[%s5643_s4 + $0x4c] ss:$16 sps:$4 sm:$0xff]  }
 0x624   :  { %1347 = vst [vmem:[#allocation2 + $0x14] sm:$0xf] %v1345_v52  ;;  %1386 = vmatmul.mubr.bf16.vlgmr.msra.gmra.mxu0 %v1345_v52  ;;  %1427 = vmatmul.mubr.bf16.vlgmr.msra.gmra.mxu1 %v1345_v52  ;;  %v3483_v52 = vld [vmem:[%s5643_s4 + $0x40] ss:$16 sps:$4 sm:$0xff]  }
 0x625   :  { %1472 = vmatpush1.bf16.msra.mxu0 %v4499_v25  ;;  %1513 = vmatpush1.bf16.msra.mxu1 %v4505_v62  ;;  %v3838_v25 = vld [vmem:[%s5641_s3 + $0xc] ss:$16 sps:$4 sm:$0xff]   ;;  %v3839_v62 = vld [vmem:[%s5641_s3] ss:$16 sps:$4 sm:$0xff]  }
 0x626   :  { %1473 = vmatprep.subr.bf16.mxu0 %v4511_v36  ;;  %1514 = vmatprep.subr.bf16.mxu1 %v4517_v37  ;;  %v3840_v36 = vld [vmem:[%s5641_s3 + $0x8] ss:$16 sps:$4 sm:$0xff]   ;;  %v3455_v37 = vld [vmem:[%s5643_s4 + $0xe4] ss:$16 sps:$4 sm:$0xff]  }
 0x627   :  { %1503 = vmatprep.mubr.bf16.mxu0 %v5675_v21  ;;  %1544 = vmatprep.mubr.bf16.mxu1 %v5675_v21 }
 0x629   :  { %1474 = vmatpush1.bf16.msra.mxu0 %v4525_v38  ;;  %1515 = vmatpush1.bf16.msra.mxu1 %v4531_v39  ;;  %v3458_v38 = vld [vmem:[%s5643_s4 + $0xec] ss:$16 sps:$4 sm:$0xff]  }
 0x62a   :  { %1475 = vmatprep.subr.bf16.mxu0 %v4589_v13  ;;  %1516 = vmatprep.subr.bf16.mxu1 %v4595_v14  ;;  %v5689_v13 = vld [vmem:[#allocation18_spill] sm:$0xff] }
 0x62d   :  { %1476 = vmatpush1.bf16.msra.mxu0 %v4601_v26  ;;  %1517 = vmatpush1.bf16.msra.mxu1 %v4607_v31 }
 0x62e   :  { %1477 = vmatprep.subr.bf16.mxu0 %v4613_v12  ;;  %1518 = vmatprep.subr.bf16.mxu1 %v4619_v53  ;;  %v5690_v53 = vld [vmem:[#allocation20_spill] sm:$0xff] }
 0x631   :  { %1478 = vmatpush1.bf16.msra.mxu0 %v4625_v35  ;;  %1519 = vmatpush1.bf16.msra.mxu1 %v4631_v44 }
 0x632   :  { %1479 = vmatprep.subr.bf16.mxu0 %v4637_v24  ;;  %1520 = vmatprep.subr.bf16.mxu1 %v4643_v18 }
 0x635   :  { %1480 = vmatpush1.bf16.msra.mxu0 %v4649_v16  ;;  %1521 = vmatpush1.bf16.msra.mxu1 %v4655_v9 }
 0x636   :  { %1481 = vmatprep.subr.bf16.mxu0 %v4661_v1  ;;  %1522 = vmatprep.subr.bf16.mxu1 %v4667_v22  ;;  %v5691_v1 = vld [vmem:[#allocation21_spill] sm:$0xff] }
 0x639   :  { %1482 = vmatpush1.bf16.msra.mxu0 %v4673_v11  ;;  %1523 = vmatpush1.bf16.msra.mxu1 %v4679_v45  ;;  %v5692_v11 = vld [vmem:[#allocation19_spill] sm:$0xff] }
 0x63a   :  { %1483 = vmatprep.subr.bf16.mxu0 %v4685_v46  ;;  %1524 = vmatprep.subr.bf16.mxu1 %v4691_v47 }
 0x63d   :  { %1484 = vmatpush1.bf16.msra.mxu0 %v4697_v48  ;;  %1525 = vmatpush1.bf16.msra.mxu1 %v4703_v49 }
 0x63e   :  { %1485 = vmatprep.subr.bf16.mxu0 %v4709_v50  ;;  %1526 = vmatprep.subr.bf16.mxu1 %v3838_v25  ;;  %v3486_v25 = vld [vmem:[%s5643_s4 + $0x48] ss:$16 sps:$4 sm:$0xff]  }
 0x641   :  { %1486 = vmatpush1.bf16.msra.mxu0 %v3839_v62  ;;  %1527 = vmatpush1.bf16.msra.mxu1 %v3840_v36  ;;  %v3491_v62 = vld [vmem:[%s5643_s4 + $0x24] ss:$16 sps:$4 sm:$0xff]   ;;  %v3494_v36 = vld [vmem:[%s5643_s4 + $0x2c] ss:$16 sps:$4 sm:$0xff]  }
 0x642   :  { %1865 = vmatprep.subr.bf16.mxu0 %v3455_v37  ;;  %1938 = vmatprep.subr.bf16.mxu1 %v3458_v38  ;;  %v3489_v37 = vld [vmem:[%s5643_s4 + $0x20] ss:$16 sps:$4 sm:$0xff]   ;;  %v3492_v38 = vld [vmem:[%s5643_s4 + $0x28] ss:$16 sps:$4 sm:$0xff]  }
 0x6e4   :  { %v1387_v39 = vpop.f32.mrf.mxu0  ;;  %v1428_v33 = vpop.f32.mrf.mxu1 }
 0x6e5   :  { %v1435_v14 = vadd.f32 %v1387_v39, %v5689_v13  ;;  %v1437_v45 = vadd.f32 %v1428_v33, %v5692_v11  ;;  %v3497_v39 = vld [vmem:[%s5643_s4 + $0x4] ss:$16 sps:$4 sm:$0xff]   ;;  %v3500_v33 = vld [vmem:[%s5643_s4 + $0xc] ss:$16 sps:$4 sm:$0xff]   ;;  %v3495_v13 = vld [vmem:[%s5643_s4] ss:$16 sps:$4 sm:$0xff]  }
 0x6e6   :  { %v1389_v26 = vpop.f32.mrf.mxu0  ;;  %v1430_v31 = vpop.f32.mrf.mxu1  ;;  %v4931_v11 = vld [vmem:[%s5641_s3 + $0x1ac] ss:$16 sps:$4 sm:$0xff]  }
 0x6e7   :  { %v3220_v12 = vmul.f32 -1.442695, %v1435_v14  ;;  %v1436_v35 = vadd.f32 %v1389_v26, %v5690_v53  ;;  %v1438_v22 = vadd.f32 %v1430_v31, %v5691_v1  ;;  %v3498_v14 = vld [vmem:[%s5643_s4 + $0x8] ss:$16 sps:$4 sm:$0xff]   ;;  %v3501_v26 = vld [vmem:[#allocation2] sm:$0xff]  }
 0x6e8   :  { %v1391_v44 = vpop.f32.mrf.mxu0  ;;  %v1432_v24 = vpop.f32.mrf.mxu1  ;;  %v3502_v31 = vld [vmem:[#allocation2 + $0x8] sm:$0xff]   ;;  %v4878_v53 = vld [vmem:[%s5641_s3 + $0x1e4] ss:$16 sps:$4 sm:$0xff]  }
 0x6e9   :  { %3649 = vpow2.f32 %v3220_v12  ;;  %v3221_v18 = vmul.f32 -1.442695, %v1436_v35  ;;  %v3222_v46 = vmul.f32 -1.442695, %v1438_v22  ;;  %v3503_v12 = vld [vmem:[#allocation2 + $0x10] sm:$0xff]  }
 0x6ea   :  { %v1392_v16 = vpop.f32.mrf.mxu0  ;;  %v1433_v9 = vpop.f32.mrf.mxu1  ;;  %v4883_v35 = vld [vmem:[%s5641_s3 + $0x1ec] ss:$16 sps:$4 sm:$0xff]   ;;  %v4888_v44 = vld [vmem:[%s5641_s3 + $0x1e0] ss:$16 sps:$4 sm:$0xff]   ;;  %v4893_v24 = vld [vmem:[%s5641_s3 + $0x1e8] ss:$16 sps:$4 sm:$0xff]  }
 0x6eb   :  { %3651 = vpow2.f32 %v3221_v18  ;;  %v4902_v18 = vld [vmem:[%s5641_s3 + $0x1c4] ss:$16 sps:$4 sm:$0xff]   ;;  %v4907_v16 = vld [vmem:[%s5641_s3 + $0x1cc] ss:$16 sps:$4 sm:$0xff]   ;;  %v4912_v9 = vld [vmem:[%s5641_s3 + $0x1c0] ss:$16 sps:$4 sm:$0xff]  }
 0x6ec   :  { %3653 = vtanh.f32 %v1437_v45  ;;  %v4917_v1 = vld [vmem:[%s5641_s3 + $0x1c8] ss:$16 sps:$4 sm:$0xff]   ;;  %v4926_v22 = vld [vmem:[%s5641_s3 + $0x1a4] ss:$16 sps:$4 sm:$0xff]   ;;  %v4936_v45 = vld [vmem:[%s5641_s3 + $0x1a0] ss:$16 sps:$4 sm:$0xff]  }
 0x6ed   :  { %3655 = vpow2.f32 %v3222_v46  ;;  %v4941_v46 = vld [vmem:[%s5641_s3 + $0x1a8] ss:$16 sps:$4 sm:$0xff]  }
 0x6f6   :  { %v3650_v47 = vpop.eup %3649 }
 0x6f7   :  { %v1442_v48 = vadd.f32 1.0, %v3650_v47  ;;  %v4950_v47 = vld [vmem:[%s5641_s3 + $0x184] ss:$16 sps:$4 sm:$0xff]  }
 0x6f8   :  { %v3652_v49 = vpop.eup %3651 }
 0x6f9   :  { %3657 = vrcp.f32 %v1442_v48  ;;  %v1448_v50 = vadd.f32 1.0, %v3652_v49  ;;  %v3654_v54 = vpop.eup %3653  ;;  %v4955_v48 = vld [vmem:[%s5641_s3 + $0x18c] ss:$16 sps:$4 sm:$0xff]   ;;  %v4960_v49 = vld [vmem:[%s5641_s3 + $0x180] ss:$16 sps:$4 sm:$0xff]  }
 0x6fa   :  { %v3656_v55 = vpop.eup %3655 }
 0x6fb   :  { %3659 = vrcp.f32 %v1448_v50  ;;  %v1455_v59 = vadd.f32 1.0, %v3656_v55  ;;  %v4965_v50 = vld [vmem:[%s5641_s3 + $0x188] ss:$16 sps:$4 sm:$0xff]   ;;  %v4979_v55 = vld [vmem:[%s5641_s3 + $0x16c] ss:$16 sps:$4 sm:$0xff]  }
 0x6fd   :  { %3661 = vrcp.f32 %v1455_v59  ;;  %v4999_v59 = vld [vmem:[%s5641_s3 + $0x14c] ss:$16 sps:$4 sm:$0xff]  }
 0x706   :  { %v3658_v56 = vpop.eup %3657 }
 0x707   :  { %v1459_v57 = vmul.f32 %v3658_v56, %v3654_v54  ;;  %v4974_v54 = vld [vmem:[%s5641_s3 + $0x164] ss:$16 sps:$4 sm:$0xff]   ;;  %v4984_v56 = vld [vmem:[%s5641_s3 + $0x160] ss:$16 sps:$4 sm:$0xff]  }
 0x708   :  { %v3660_v58 = vpop.eup %3659 }
 0x709   :  { %v1458_v60 = vmul.f32 %v3660_v58, %v4722_v34  ;;  %v3477_v34 = vld [vmem:[%s5643_s4 + $0x60] ss:$16 sps:$4 sm:$0xff]   ;;  %v4994_v58 = vld [vmem:[%s5641_s3 + $0x144] ss:$16 sps:$4 sm:$0xff]  }
 0x70a   :  { %v3662_v63 = vpop.eup %3661 }
 0x70b   :  { %v4774_v61 = vadd.f32 %v1459_v57, %v1458_v60  ;;  %v4989_v57 = vld [vmem:[%s5641_s3 + $0x168] ss:$16 sps:$4 sm:$0xff]   ;;  %v5008_v60 = vld [vmem:[%s5641_s3 + $0x140] ss:$16 sps:$4 sm:$0xff]  }
 0x70d   :  { %3663 = vtanh.f32 %v4774_v61 }
 0x71a   :  { %v3664_v3 = vpop.eup %3663 }
 0x71b   :  { %v1462_v4 = vmul.f32 %v3664_v3, %v3662_v63  ;;  %v5013_v63 = vld [vmem:[%s5641_s3 + $0x148] ss:$16 sps:$4 sm:$0xff]   ;;  %v5022_v3 = vld [vmem:[%s5641_s3 + $0x124] ss:$16 sps:$4 sm:$0xff]  }
 0x71d   :  { %v1463_v42 = vpack.c.bf16 %v1462_v4, %v1462_v4  ;;  %v5027_v4 = vld [vmem:[%s5641_s3 + $0x12c] ss:$16 sps:$4 sm:$0xff]  }
 0x71f   :  { %1465 = vst [vmem:[#allocation2 + $0x18] sm:$0xf] %v1463_v42  ;;  %1504 = vmatmul.mubr.bf16.vlgmr.msra.gmra.mxu0 %v1463_v42  ;;  %1545 = vmatmul.mubr.bf16.vlgmr.msra.gmra.mxu1 %v1463_v42  ;;  %v5042_v42 = vld [vmem:[%s5641_s3 + $0x104] ss:$16 sps:$4 sm:$0xff]  }
 0x720   :  { %1866 = vmatpush1.bf16.msra.mxu0 %v3453_v0  ;;  %1939 = vmatpush1.bf16.msra.mxu1 %v3456_v5  ;;  %v5032_v0 = vld [vmem:[%s5641_s3 + $0x120] ss:$16 sps:$4 sm:$0xff]   ;;  %v5037_v5 = vld [vmem:[%s5641_s3 + $0x128] ss:$16 sps:$4 sm:$0xff]  }
 0x721   :  { %1867 = vmatprep.subr.bf16.mxu0 %v3461_v2  ;;  %1940 = vmatprep.subr.bf16.mxu1 %v3464_v43  ;;  %v5049_v2 = vld [vmem:[%s5641_s3 + $0x10c] ss:$16 sps:$4 sm:$0xff]   ;;  %v5056_v43 = vld [vmem:[%s5641_s3 + $0x100] ss:$16 sps:$4 sm:$0xff]  }
 0x722   :  { %1897 = vmatprep.mubr.bf16.mxu0 %v5675_v21  ;;  %1970 = vmatprep.mubr.bf16.mxu1 %v5675_v21 }
 0x724   :  { %1868 = vmatpush1.bf16.msra.mxu0 %v3459_v40  ;;  %1941 = vmatpush1.bf16.msra.mxu1 %v3462_v41  ;;  %v5061_v40 = vld [vmem:[%s5641_s3 + $0x108] ss:$16 sps:$4 sm:$0xff]  }
 0x725   :  { %1869 = vmatprep.subr.bf16.mxu0 %v3467_v28  ;;  %1942 = vmatprep.subr.bf16.mxu1 %v3470_v30  ;;  %v5693_v30 = vld [vmem:[#allocation22_spill] sm:$0xff] }
 0x728   :  { %1870 = vmatpush1.bf16.msra.mxu0 %v3465_v10  ;;  %1943 = vmatpush1.bf16.msra.mxu1 %v3468_v32 }
 0x729   :  { %1871 = vmatprep.subr.bf16.mxu0 %v3473_v20  ;;  %1944 = vmatprep.subr.bf16.mxu1 %v3476_v29 }
 0x72c   :  { %1872 = vmatpush1.bf16.msra.mxu0 %v3471_v8  ;;  %1945 = vmatpush1.bf16.msra.mxu1 %v3474_v17 }
 0x72d   :  { %1873 = vmatprep.subr.bf16.mxu0 %v3479_v19  ;;  %1946 = vmatprep.subr.bf16.mxu1 %v3482_v23 }
 0x730   :  { %1874 = vmatpush1.bf16.msra.mxu0 %v3477_v34  ;;  %1947 = vmatpush1.bf16.msra.mxu1 %v3480_v7 }
 0x731   :  { %1875 = vmatprep.subr.bf16.mxu0 %v3485_v27  ;;  %1948 = vmatprep.subr.bf16.mxu1 %v3488_v51  ;;  %v5694_v51 = vld [vmem:[#allocation23_spill] sm:$0xff] }
 0x734   :  { %1876 = vmatpush1.bf16.msra.mxu0 %v3483_v52  ;;  %1949 = vmatpush1.bf16.msra.mxu1 %v3486_v25 }
 0x735   :  { %1877 = vmatprep.subr.bf16.mxu0 %v3491_v62  ;;  %1950 = vmatprep.subr.bf16.mxu1 %v3494_v36 }
 0x738   :  { %1878 = vmatpush1.bf16.msra.mxu0 %v3489_v37  ;;  %1951 = vmatpush1.bf16.msra.mxu1 %v3492_v38 }
 0x739   :  { %1879 = vmatprep.subr.bf16.mxu0 %v3497_v39  ;;  %1952 = vmatprep.subr.bf16.mxu1 %v3500_v33 }
 0x73c   :  { %1880 = vmatpush1.bf16.msra.mxu0 %v3495_v13  ;;  %1953 = vmatpush1.bf16.msra.mxu1 %v3498_v14 }
 0x73d   :  { %2207 = vmatprep.subr.bf16.mxu0 %v4878_v53  ;;  %2248 = vmatprep.subr.bf16.mxu1 %v4883_v35 }
 0x73f   :  { %1898 = vmatmul.mubr.bf16.vlgmr.msra.gmra.mxu0 %v3501_v26  ;;  %1971 = vmatmul.mubr.bf16.vlgmr.msra.gmra.mxu1 %v3501_v26 }
 0x740   :  { %1907 = vmatprep.mubr.bf16.mxu0 %v5675_v21  ;;  %1980 = vmatprep.mubr.bf16.mxu1 %v5675_v21 }
 0x741   :  { %2208 = vmatpush1.bf16.msra.mxu0 %v4888_v44  ;;  %2249 = vmatpush1.bf16.msra.mxu1 %v4893_v24 }
 0x742   :  { %2209 = vmatprep.subr.bf16.mxu0 %v4902_v18  ;;  %2250 = vmatprep.subr.bf16.mxu1 %v4907_v16 }
 0x745   :  { %2210 = vmatpush1.bf16.msra.mxu0 %v4912_v9  ;;  %2251 = vmatpush1.bf16.msra.mxu1 %v4917_v1 }
 0x746   :  { %2211 = vmatprep.subr.bf16.mxu0 %v4926_v22  ;;  %2252 = vmatprep.subr.bf16.mxu1 %v4931_v11 }
 0x747   :  { %1908 = vmatmul.mubr.bf16.gmra.mxu0 %v3502_v31  ;;  %1981 = vmatmul.mubr.bf16.gmra.mxu1 %v3502_v31 }
 0x748   :  { %1917 = vmatprep.mubr.bf16.mxu0 %v5675_v21  ;;  %1990 = vmatprep.mubr.bf16.mxu1 %v5675_v21 }
 0x749   :  { %2212 = vmatpush1.bf16.msra.mxu0 %v4936_v45  ;;  %2253 = vmatpush1.bf16.msra.mxu1 %v4941_v46 }
 0x74a   :  { %2213 = vmatprep.subr.bf16.mxu0 %v4950_v47  ;;  %2254 = vmatprep.subr.bf16.mxu1 %v4955_v48 }
 0x74d   :  { %2214 = vmatpush1.bf16.msra.mxu0 %v4960_v49  ;;  %2255 = vmatpush1.bf16.msra.mxu1 %v4965_v50 }
 0x74e   :  { %2215 = vmatprep.subr.bf16.mxu0 %v4974_v54  ;;  %2256 = vmatprep.subr.bf16.mxu1 %v4979_v55 }
 0x74f   :  { %1918 = vmatmul.mubr.bf16.gmra.mxu0 %v3503_v12  ;;  %1991 = vmatmul.mubr.bf16.gmra.mxu1 %v3503_v12 }
 0x750   :  { %1927 = vmatprep.mubr.bf16.mxu0 %v5675_v21  ;;  %2000 = vmatprep.mubr.bf16.mxu1 %v5675_v21 }
 0x751   :  { %2216 = vmatpush1.bf16.msra.mxu0 %v4984_v56  ;;  %2257 = vmatpush1.bf16.msra.mxu1 %v4989_v57 }
 0x752   :  { %2217 = vmatprep.subr.bf16.mxu0 %v4994_v58  ;;  %2258 = vmatprep.subr.bf16.mxu1 %v4999_v59 }
 0x755   :  { %2218 = vmatpush1.bf16.msra.mxu0 %v5008_v60  ;;  %2259 = vmatpush1.bf16.msra.mxu1 %v5013_v63 }
 0x756   :  { %2219 = vmatprep.subr.bf16.mxu0 %v5022_v3  ;;  %2260 = vmatprep.subr.bf16.mxu1 %v5027_v4 }
 0x759   :  { %2220 = vmatpush1.bf16.msra.mxu0 %v5032_v0  ;;  %2261 = vmatpush1.bf16.msra.mxu1 %v5037_v5 }
 0x75a   :  { %2221 = vmatprep.subr.bf16.mxu0 %v5042_v42  ;;  %2262 = vmatprep.subr.bf16.mxu1 %v5049_v2 }
 0x75d   :  { %2222 = vmatpush1.bf16.msra.mxu0 %v5056_v43  ;;  %2263 = vmatpush1.bf16.msra.mxu1 %v5061_v40 }
 0x75e   :  { %2322 = vmatprep.subr.bf16.mxu0 %v4878_v53  ;;  %2363 = vmatprep.subr.bf16.mxu1 %v4883_v35 }
 0x7df   :  { %v1505_v41 = vpop.f32.mrf.mxu0  ;;  %v1546_v28 = vpop.f32.mrf.mxu1 }
 0x7e0   :  { %v1553_v10 = vadd.f32 %v1505_v41, %v5693_v30  ;;  %v1555_v52 = vadd.f32 %v1546_v28, %v5694_v51 }
 0x7e1   :  { %v1507_v32 = vpop.f32.mrf.mxu0  ;;  %v1548_v20 = vpop.f32.mrf.mxu1 }
 0x7e2   :  { %v3223_v29 = vmul.f32 -1.442695, %v1553_v10  ;;  %v1554_v8 = vadd.f32 %v1507_v32, %v4357_v15  ;;  %v1556_v27 = vadd.f32 %v1548_v20, %v4360_v6 }
 0x7e3   :  { %v1509_v17 = vpop.f32.mrf.mxu0  ;;  %v1550_v19 = vpop.f32.mrf.mxu1 }
 0x7e4   :  { %3665 = vpow2.f32 %v3223_v29  ;;  %v3224_v23 = vmul.f32 -1.442695, %v1554_v8  ;;  %v3225_v25 = vmul.f32 -1.442695, %v1556_v27 }
 0x7e5   :  { %v1510_v34 = vpop.f32.mrf.mxu0  ;;  %v1551_v7 = vpop.f32.mrf.mxu1 }
 0x7e6   :  { %3667 = vpow2.f32 %v3224_v23 }
 0x7e7   :  { %3669 = vtanh.f32 %v1555_v52 }
 0x7e8   :  { %3671 = vpow2.f32 %v3225_v25 }
 0x7f1   :  { %v3666_v62 = vpop.eup %3665 }
 0x7f2   :  { %v1560_v36 = vadd.f32 1.0, %v3666_v62 }
 0x7f3   :  { %v3668_v37 = vpop.eup %3667 }
 0x7f4   :  { %3673 = vrcp.f32 %v1560_v36  ;;  %v1566_v38 = vadd.f32 1.0, %v3668_v37  ;;  %v3670_v15 = vpop.eup %3669 }
 0x7f5   :  { %v3672_v39 = vpop.eup %3671 }
 0x7f6   :  { %3675 = vrcp.f32 %v1566_v38  ;;  %v1573_v26 = vadd.f32 1.0, %v3672_v39 }
 0x7f8   :  { %3677 = vrcp.f32 %v1573_v26 }
 0x7ff   :  { %v1972_v32 = vpop.f32.mrf.mxu1 }
 0x801   :  { %v3674_v33 = vpop.eup %3673  ;;  %v1974_v29 = vpop.f32.mrf.mxu1 }
 0x802   :  { %v1577_v13 = vmul.f32 %v3674_v33, %v3670_v15 }
 0x803   :  { %v3676_v14 = vpop.eup %3675  ;;  %v5120_v17 = vpop.f32.mrf.mxu1 }
 0x804   :  { %v1576_v31 = vmul.f32 %v3676_v14, %v4774_v61  ;;  %v1899_v61 = vpop.f32.mrf.mxu0 }
 0x805   :  { %v3678_v12 = vpop.eup %3677  ;;  %v5124_v23 = vpop.f32.mrf.mxu1 }
 0x806   :  { %v1578_v6 = vadd.f32 %v1577_v13, %v1576_v31  ;;  %v1901_v20 = vpop.f32.mrf.mxu0  ;;  %v1618_v31 = vld [vmem:[%s5646_s5] sm:$0xf] }
 0x807   :  { %v5128_v7 = vpop.f32.mrf.mxu1 }
 0x808   :  { %3679 = vtanh.f32 %v1578_v6  ;;  %1585 = vst [vmem:[%s5644_s7] sm:$0xff] %v1578_v6  ;;  %v5118_v8 = vpop.f32.mrf.mxu0  ;;  %5695 = vst [vmem:[#allocation5_spill] sm:$0xff] %v5128_v7 }
 0x809   :  { %v5132_v51 = vpop.f32.mrf.mxu1 }
 0x80a   :  { %v5122_v19 = vpop.f32.mrf.mxu0 }
 0x80b   :  { %v5136_v25 = vpop.f32.mrf.mxu1 }
 0x80c   :  { %v5126_v34 = vpop.f32.mrf.mxu0  ;;  %5697 = vst [vmem:[#allocation8_spill] sm:$0xff] %v5136_v25 }
 0x80d   :  { %v5140_v36 = vpop.f32.mrf.mxu1 }
 0x80e   :  { %v5130_v27 = vpop.f32.mrf.mxu0  ;;  %5699 = vst [vmem:[#allocation7_spill] sm:$0xff] %v5140_v36 }
 0x80f   :  { %v5144_v38 = vpop.f32.mrf.mxu1 }
 0x810   :  { %v5134_v52 = vpop.f32.mrf.mxu0  ;;  %5701 = vst [vmem:[#allocation12_spill] sm:$0xff] %v5144_v38 }
 0x811   :  { %5696 = vst [vmem:[#allocation6_spill] sm:$0xff] %v5134_v52  ;;  %v5148_v39 = vpop.f32.mrf.mxu1 }
 0x812   :  { %v5138_v62 = vpop.f32.mrf.mxu0  ;;  %5703 = vst [vmem:[#allocation11_spill] sm:$0xff] %v5148_v39 }
 0x813   :  { %5698 = vst [vmem:[#allocation9_spill] sm:$0xff] %v5138_v62  ;;  %v5152_v13 = vpop.f32.mrf.mxu1 }
 0x814   :  { %v5142_v37 = vpop.f32.mrf.mxu0  ;;  %5705 = vst [vmem:[#allocation16_spill] sm:$0xff] %v5152_v13 }
 0x815   :  { %v3680_v41 = vpop.eup %3679  ;;  %5700 = vst [vmem:[#allocation10_spill] sm:$0xff] %v5142_v37  ;;  %v5156_v26 = vpop.f32.mrf.mxu1 }
 0x816   :  { %v1580_v28 = vmul.f32 %v3680_v41, %v3678_v12  ;;  %v5146_v15 = vpop.f32.mrf.mxu0  ;;  %5707 = vst [vmem:[#allocation15_spill] sm:$0xff] %v5156_v26 }
 0x817   :  { %5702 = vst [vmem:[#allocation13_spill] sm:$0xff] %v5146_v15 }
 0x818   :  { %v1581_v30 = vpack.c.bf16 %v1580_v28, %v1580_v28  ;;  %1584 = vst [vmem:[%s5645_s6] sm:$0xff] %v1580_v28  ;;  %v5150_v33 = vpop.f32.mrf.mxu0 }
 0x819   :  { %5704 = vst [vmem:[#allocation14_spill] sm:$0xff] %v5150_v33 }
 0x81a   :  { %1583 = vst [vmem:[#allocation2 + $0x1c] sm:$0xf] %v1581_v30  ;;  %v5154_v14 = vpop.f32.mrf.mxu0  ;;  %v5712_v30 = vld [vmem:[#allocation4_spill] sm:$0xff] }
 0x81b   :  { %5706 = vst [vmem:[#allocation17_spill] sm:$0xff] %v5154_v14  ;;  %v5716_v26 = vsub.s32 1, %v5712_v30  ;;  %v5719_v52 = vsub.s32 3, %v5712_v30 }
 0x81d   :  { %v5179_v38 = vrot.slane %v1618_v31, %v5716_v26 }
 0x81f   :  { %v1902_v15 = vadd.f32 %v1901_v20, %v5179_v38  ;;  %v5720_v20 = vsub.s32 2, %v5712_v30 }
 0x821   :  { %v3540_v10 = vld [vmem:[#allocation2 + $0x18] sm:$0xff]  }
 0x822   :  { %1928 = vmatmul.mubr.bf16.gmra.mxu0 %v3540_v10  ;;  %2001 = vmatmul.mubr.bf16.gmra.mxu1 %v3540_v10  ;;  %v5713_v10 = vsub.s32 0, %v5712_v30 }
 0x823   :  { %2239 = vmatprep.mubr.bf16.mxu0 %v5675_v21  ;;  %2280 = vmatprep.mubr.bf16.mxu1 %v5675_v21 }
 0x824   :  { %v5171_v33 = vrot.slane %v1618_v31, %v5713_v10 }
 0x82a   :  { %2240 = vmatmul.mubr.bf16.vlgmr.msra.gmra.mxu0 %v5675_v21  ;;  %2281 = vmatmul.mubr.bf16.vlgmr.msra.gmra.mxu1 %v5675_v21 }
 0x82b   :  { %2323 = vmatpush1.bf16.msra.mxu0 %v4888_v44  ;;  %2364 = vmatpush1.bf16.msra.mxu1 %v4893_v24 }
 0x82c   :  { %2324 = vmatprep.subr.bf16.mxu0 %v4902_v18  ;;  %2365 = vmatprep.subr.bf16.mxu1 %v4907_v16 }
 0x82d   :  { %2354 = vmatprep.mubr.bf16.mxu0 %v5675_v21  ;;  %2395 = vmatprep.mubr.bf16.mxu1 %v5675_v21 }
 0x82f   :  { %2325 = vmatpush1.bf16.msra.mxu0 %v4912_v9  ;;  %2366 = vmatpush1.bf16.msra.mxu1 %v4917_v1 }
 0x830   :  { %2326 = vmatprep.subr.bf16.mxu0 %v4926_v22  ;;  %2367 = vmatprep.subr.bf16.mxu1 %v4931_v11 }
 0x833   :  { %2327 = vmatpush1.bf16.msra.mxu0 %v4936_v45  ;;  %2368 = vmatpush1.bf16.msra.mxu1 %v4941_v46 }
 0x834   :  { %2328 = vmatprep.subr.bf16.mxu0 %v4950_v47  ;;  %2369 = vmatprep.subr.bf16.mxu1 %v4955_v48 }
 0x837   :  { %2329 = vmatpush1.bf16.msra.mxu0 %v4960_v49  ;;  %2370 = vmatpush1.bf16.msra.mxu1 %v4965_v50 }
 0x838   :  { %2330 = vmatprep.subr.bf16.mxu0 %v4974_v54  ;;  %2371 = vmatprep.subr.bf16.mxu1 %v4979_v55 }
 0x83b   :  { %2331 = vmatpush1.bf16.msra.mxu0 %v4984_v56  ;;  %2372 = vmatpush1.bf16.msra.mxu1 %v4989_v57 }
 0x83c   :  { %2332 = vmatprep.subr.bf16.mxu0 %v4994_v58  ;;  %2373 = vmatprep.subr.bf16.mxu1 %v4999_v59 }
 0x83f   :  { %2333 = vmatpush1.bf16.msra.mxu0 %v5008_v60  ;;  %2374 = vmatpush1.bf16.msra.mxu1 %v5013_v63 }
 0x840   :  { %2334 = vmatprep.subr.bf16.mxu0 %v5022_v3  ;;  %2375 = vmatprep.subr.bf16.mxu1 %v5027_v4 }
 0x843   :  { %2335 = vmatpush1.bf16.msra.mxu0 %v5032_v0  ;;  %2376 = vmatpush1.bf16.msra.mxu1 %v5037_v5 }
 0x844   :  { %2336 = vmatprep.subr.bf16.mxu0 %v5042_v42  ;;  %2377 = vmatprep.subr.bf16.mxu1 %v5049_v2 }
 0x847   :  { %2337 = vmatpush1.bf16.msra.mxu0 %v5056_v43  ;;  %2378 = vmatpush1.bf16.msra.mxu1 %v5061_v40 }
 0x848   :  { %2437 = vmatprep.subr.bf16.mxu0 %v4878_v53  ;;  %2478 = vmatprep.subr.bf16.mxu1 %v4883_v35 }
 0x8e2   :  { %v5161_v6 = vpop.f32.mrf.mxu0  ;;  %v5163_v12 = vpop.f32.mrf.mxu1 }
 0x8e3   :  { %5708 = vst [vmem:[#allocation18_spill] sm:$0xff] %v5161_v6  ;;  %5709 = vst [vmem:[#allocation20_spill] sm:$0xff] %v5163_v12  ;;  %v1900_v12 = vadd.f32 %v1899_v61, %v5171_v33 }
 0x8e4   :  { %v5165_v41 = vpop.f32.mrf.mxu0  ;;  %v5167_v28 = vpop.f32.mrf.mxu1 }
 0x8e5   :  { %5710 = vst [vmem:[#allocation21_spill] sm:$0xff] %v5165_v41  ;;  %5711 = vst [vmem:[#allocation19_spill] sm:$0xff] %v5167_v28 }
 0x8e6   :  { %v5173_v13 = vpop.f32.mrf.mxu0  ;;  %v5175_v14 = vpop.f32.mrf.mxu1 }
 0x8e7   :  { %5714 = vst [vmem:[#allocation22_spill] sm:$0xff] %v5173_v13  ;;  %5715 = vst [vmem:[#allocation23_spill] sm:$0xff] %v5175_v14 }
 0x8e8   :  { %v5181_v39 = vpop.f32.mrf.mxu0  ;;  %v5183_v6 = vpop.f32.mrf.mxu1 }
 0x8e9   :  { %5717 = vst [vmem:[#allocation4_spill] sm:$0xff] %v5181_v39  ;;  %5718 = vst [vmem:[#allocation24_spill] sm:$0xff] %v5183_v6  ;;  %v5189_v39 = vrot.slane %v1618_v31, %v5719_v52 }
 0x8ea   :  { %v2241_v41 = vpop.f32.mrf.mxu0  ;;  %v2282_v28 = vpop.f32.mrf.mxu1 }
 0x8eb   :  { %v2289_v10 = vadd.f32 %v2241_v41, %v1900_v12  ;;  %v1975_v61 = vadd.f32 %v1974_v29, %v5189_v39  ;;  %v5194_v12 = vrot.slane %v1618_v31, %v5720_v20 }
 0x8ec   :  { %v2243_v37 = vpop.f32.mrf.mxu0  ;;  %v2284_v25 = vpop.f32.mrf.mxu1 }
 0x8ed   :  { %v3326_v13 = vmul.f32 -1.442695, %v2289_v10  ;;  %v2290_v36 = vadd.f32 %v2243_v37, %v1902_v15  ;;  %v2292_v41 = vadd.f32 %v2284_v25, %v1975_v61  ;;  %v1973_v37 = vadd.f32 %v1972_v32, %v5194_v12 }
 0x8ee   :  { %v2245_v14 = vpop.f32.mrf.mxu0  ;;  %v2286_v62 = vpop.f32.mrf.mxu1 }
 0x8ef   :  { %3681 = vpow2.f32 %v3326_v13  ;;  %v3327_v26 = vmul.f32 -1.442695, %v2290_v36  ;;  %v3328_v15 = vmul.f32 -1.442695, %v2292_v41  ;;  %v2291_v13 = vadd.f32 %v2282_v28, %v1973_v37 }
 0x8f0   :  { %v2246_v6 = vpop.f32.mrf.mxu0  ;;  %v2287_v7 = vpop.f32.mrf.mxu1  ;;  %v1904_v41 = vadd.f32 %v5118_v8, %v5171_v33  ;;  %v1979_v8 = vadd.f32 %v5124_v23, %v5189_v39 }
 0x8f1   :  { %3683 = vpow2.f32 %v3327_v26 }
 0x8f2   :  { %3685 = vpow2.f32 %v3328_v15 }
 0x8fc   :  { %v3682_v62 = vpop.eup %3681 }
 0x8fd   :  { %v2296_v36 = vadd.f32 1.0, %v3682_v62  ;;  %v1906_v62 = vadd.f32 %v5122_v19, %v5179_v38 }
 0x8fe   :  { %v3684_v14 = vpop.eup %3683 }
 0x8ff   :  { %3687 = vrcp.f32 %v2296_v36  ;;  %v2302_v52 = vadd.f32 1.0, %v3684_v14  ;;  %v3686_v7 = vpop.eup %3685 }
 0x900   :  { %3689 = vtanh.f32 %v2291_v13  ;;  %v2309_v30 = vadd.f32 1.0, %v3686_v7 }
 0x901   :  { %3691 = vrcp.f32 %v2302_v52 }
 0x902   :  { %3693 = vrcp.f32 %v2309_v30 }
 0x90c   :  { %v3688_v6 = vpop.eup %3687 }
 0x90d   :  { %v3690_v29 = vpop.eup %3689 }
 0x90e   :  { %v3692_v10 = vpop.eup %3691  ;;  %v2313_v26 = vmul.f32 %v3690_v29, %v3688_v6 }
 0x90f   :  { %v2312_v31 = vmul.f32 0.0, %v3692_v10  ;;  %v3694_v32 = vpop.eup %3693 }
 0x911   :  { %v5197_v25 = vadd.f32 %v2313_v26, %v2312_v31 }
 0x913   :  { %3695 = vtanh.f32 %v5197_v25 }
 0x920   :  { %v3696_v28 = vpop.eup %3695 }
 0x921   :  { %v2316_v61 = vmul.f32 %v3696_v28, %v3694_v32  ;;  %v1977_v32 = vadd.f32 %v5120_v17, %v5194_v12 }
 0x923   :  { %v2321_v20 = vpack.c.bf16 %v2316_v61, %v2316_v61 }
 0x925   :  { %2355 = vmatmul.mubr.bf16.vlgmr.msra.gmra.mxu0 %v2321_v20  ;;  %2396 = vmatmul.mubr.bf16.vlgmr.msra.gmra.mxu1 %v2321_v20 }
 0x926   :  { %2438 = vmatpush1.bf16.msra.mxu0 %v4888_v44  ;;  %2479 = vmatpush1.bf16.msra.mxu1 %v4893_v24 }
 0x927   :  { %2439 = vmatprep.subr.bf16.mxu0 %v4902_v18  ;;  %2480 = vmatprep.subr.bf16.mxu1 %v4907_v16 }
 0x928   :  { %2469 = vmatprep.mubr.bf16.mxu0 %v5675_v21  ;;  %2510 = vmatprep.mubr.bf16.mxu1 %v5675_v21 }
 0x92a   :  { %2440 = vmatpush1.bf16.msra.mxu0 %v4912_v9  ;;  %2481 = vmatpush1.bf16.msra.mxu1 %v4917_v1 }
 0x92b   :  { %2441 = vmatprep.subr.bf16.mxu0 %v4926_v22  ;;  %2482 = vmatprep.subr.bf16.mxu1 %v4931_v11 }
 0x92e   :  { %2442 = vmatpush1.bf16.msra.mxu0 %v4936_v45  ;;  %2483 = vmatpush1.bf16.msra.mxu1 %v4941_v46 }
 0x92f   :  { %2443 = vmatprep.subr.bf16.mxu0 %v4950_v47  ;;  %2484 = vmatprep.subr.bf16.mxu1 %v4955_v48 }
 0x932   :  { %2444 = vmatpush1.bf16.msra.mxu0 %v4960_v49  ;;  %2485 = vmatpush1.bf16.msra.mxu1 %v4965_v50 }
 0x933   :  { %2445 = vmatprep.subr.bf16.mxu0 %v4974_v54  ;;  %2486 = vmatprep.subr.bf16.mxu1 %v4979_v55 }
 0x936   :  { %2446 = vmatpush1.bf16.msra.mxu0 %v4984_v56  ;;  %2487 = vmatpush1.bf16.msra.mxu1 %v4989_v57 }
 0x937   :  { %2447 = vmatprep.subr.bf16.mxu0 %v4994_v58  ;;  %2488 = vmatprep.subr.bf16.mxu1 %v4999_v59 }
 0x93a   :  { %2448 = vmatpush1.bf16.msra.mxu0 %v5008_v60  ;;  %2489 = vmatpush1.bf16.msra.mxu1 %v5013_v63 }
 0x93b   :  { %2449 = vmatprep.subr.bf16.mxu0 %v5022_v3  ;;  %2490 = vmatprep.subr.bf16.mxu1 %v5027_v4 }
 0x93e   :  { %2450 = vmatpush1.bf16.msra.mxu0 %v5032_v0  ;;  %2491 = vmatpush1.bf16.msra.mxu1 %v5037_v5 }
 0x93f   :  { %2451 = vmatprep.subr.bf16.mxu0 %v5042_v42  ;;  %2492 = vmatprep.subr.bf16.mxu1 %v5049_v2 }
 0x942   :  { %2452 = vmatpush1.bf16.msra.mxu0 %v5056_v43  ;;  %2493 = vmatpush1.bf16.msra.mxu1 %v5061_v40 }
 0x943   :  { %2552 = vmatprep.subr.bf16.mxu0 %v4878_v53  ;;  %2593 = vmatprep.subr.bf16.mxu1 %v4883_v35 }
 0x9e5   :  { %v2356_v37 = vpop.f32.mrf.mxu0  ;;  %v2397_v15 = vpop.f32.mrf.mxu1 }
 0x9e6   :  { %v2404_v13 = vadd.f32 %v2356_v37, %v1904_v41  ;;  %v2406_v19 = vadd.f32 %v2397_v15, %v1977_v32 }
 0x9e7   :  { %v2358_v36 = vpop.f32.mrf.mxu0  ;;  %v2399_v14 = vpop.f32.mrf.mxu1 }
 0x9e8   :  { %v3329_v52 = vmul.f32 -1.442695, %v2404_v13  ;;  %v2405_v7 = vadd.f32 %v2358_v36, %v1906_v62  ;;  %v2407_v26 = vadd.f32 %v2399_v14, %v1979_v8  ;;  %v1912_v8 = vadd.f32 %v5130_v27, %v5179_v38 }
 0x9e9   :  { %v2360_v6 = vpop.f32.mrf.mxu0  ;;  %v2401_v29 = vpop.f32.mrf.mxu1 }
 0x9ea   :  { %3697 = vpow2.f32 %v3329_v52  ;;  %v3330_v10 = vmul.f32 -1.442695, %v2405_v7  ;;  %v3331_v28 = vmul.f32 -1.442695, %v2407_v26 }
 0x9eb   :  { %v2361_v30 = vpop.f32.mrf.mxu0  ;;  %v2402_v31 = vpop.f32.mrf.mxu1 }
 0x9ec   :  { %3699 = vpow2.f32 %v3330_v10 }
 0x9ed   :  { %3701 = vtanh.f32 %v2406_v19 }
 0x9ee   :  { %3703 = vpow2.f32 %v3331_v28 }
 0x9f7   :  { %v3698_v61 = vpop.eup %3697 }
 0x9f8   :  { %v2411_v20 = vadd.f32 1.0, %v3698_v61 }
 0x9f9   :  { %v3700_v41 = vpop.eup %3699 }
 0x9fa   :  { %3705 = vrcp.f32 %v2411_v20  ;;  %v2417_v37 = vadd.f32 1.0, %v3700_v41  ;;  %v3702_v62 = vpop.eup %3701 }
 0x9fb   :  { %v3704_v13 = vpop.eup %3703 }
 0x9fc   :  { %3707 = vrcp.f32 %v2417_v37  ;;  %v2424_v23 = vadd.f32 1.0, %v3704_v13 }
 0x9fe   :  { %3709 = vrcp.f32 %v2424_v23 }
 0xa07   :  { %v3706_v36 = vpop.eup %3705 }
 0xa08   :  { %v2428_v52 = vmul.f32 %v3706_v36, %v3702_v62 }
 0xa09   :  { %v3708_v7 = vpop.eup %3707 }
 0xa0a   :  { %v2427_v14 = vmul.f32 %v3708_v7, %v5197_v25  ;;  %v1910_v25 = vadd.f32 %v5126_v34, %v5171_v33  ;;  %v1985_v34 = vadd.f32 %v5132_v51, %v5189_v39 }
 0xa0b   :  { %v3710_v17 = vpop.eup %3709 }
 0xa0c   :  { %v5243_v6 = vadd.f32 %v2428_v52, %v2427_v14  ;;  %v5721_v52 = vld [vmem:[#allocation5_spill] sm:$0xff] }
 0xa0d   :  { %v1983_v7 = vadd.f32 %v5721_v52, %v5194_v12 }
 0xa0e   :  { %3711 = vtanh.f32 %v5243_v6 }
 0xa1b   :  { %v3712_v15 = vpop.eup %3711 }
 0xa1c   :  { %v2431_v29 = vmul.f32 %v3712_v15, %v3710_v17 }
 0xa1e   :  { %v2436_v10 = vpack.c.bf16 %v2431_v29, %v2431_v29 }
 0xa20   :  { %2470 = vmatmul.mubr.bf16.vlgmr.msra.gmra.mxu0 %v2436_v10  ;;  %2511 = vmatmul.mubr.bf16.vlgmr.msra.gmra.mxu1 %v2436_v10 }
 0xa21   :  { %2553 = vmatpush1.bf16.msra.mxu0 %v4888_v44  ;;  %2594 = vmatpush1.bf16.msra.mxu1 %v4893_v24 }
 0xa22   :  { %2554 = vmatprep.subr.bf16.mxu0 %v4902_v18  ;;  %2595 = vmatprep.subr.bf16.mxu1 %v4907_v16 }
 0xa23   :  { %2584 = vmatprep.mubr.bf16.mxu0 %v5675_v21  ;;  %2625 = vmatprep.mubr.bf16.mxu1 %v5675_v21 }
 0xa25   :  { %2555 = vmatpush1.bf16.msra.mxu0 %v4912_v9  ;;  %2596 = vmatpush1.bf16.msra.mxu1 %v4917_v1 }
 0xa26   :  { %2556 = vmatprep.subr.bf16.mxu0 %v4926_v22  ;;  %2597 = vmatprep.subr.bf16.mxu1 %v4931_v11 }
 0xa29   :  { %2557 = vmatpush1.bf16.msra.mxu0 %v4936_v45  ;;  %2598 = vmatpush1.bf16.msra.mxu1 %v4941_v46 }
 0xa2a   :  { %2558 = vmatprep.subr.bf16.mxu0 %v4950_v47  ;;  %2599 = vmatprep.subr.bf16.mxu1 %v4955_v48 }
 0xa2d   :  { %2559 = vmatpush1.bf16.msra.mxu0 %v4960_v49  ;;  %2600 = vmatpush1.bf16.msra.mxu1 %v4965_v50 }
 0xa2e   :  { %2560 = vmatprep.subr.bf16.mxu0 %v4974_v54  ;;  %2601 = vmatprep.subr.bf16.mxu1 %v4979_v55 }
 0xa31   :  { %2561 = vmatpush1.bf16.msra.mxu0 %v4984_v56  ;;  %2602 = vmatpush1.bf16.msra.mxu1 %v4989_v57 }
 0xa32   :  { %2562 = vmatprep.subr.bf16.mxu0 %v4994_v58  ;;  %2603 = vmatprep.subr.bf16.mxu1 %v4999_v59 }
 0xa35   :  { %2563 = vmatpush1.bf16.msra.mxu0 %v5008_v60  ;;  %2604 = vmatpush1.bf16.msra.mxu1 %v5013_v63 }
 0xa36   :  { %2564 = vmatprep.subr.bf16.mxu0 %v5022_v3  ;;  %2605 = vmatprep.subr.bf16.mxu1 %v5027_v4 }
 0xa39   :  { %2565 = vmatpush1.bf16.msra.mxu0 %v5032_v0  ;;  %2606 = vmatpush1.bf16.msra.mxu1 %v5037_v5 }
 0xa3a   :  { %2566 = vmatprep.subr.bf16.mxu0 %v5042_v42  ;;  %2607 = vmatprep.subr.bf16.mxu1 %v5049_v2 }
 0xa3d   :  { %2567 = vmatpush1.bf16.msra.mxu0 %v5056_v43  ;;  %2608 = vmatpush1.bf16.msra.mxu1 %v5061_v40 }
 0xa3e   :  { %2667 = vmatprep.subr.bf16.mxu0 %v4878_v53  ;;  %2708 = vmatprep.subr.bf16.mxu1 %v4883_v35 }
 0xae0   :  { %v2471_v30 = vpop.f32.mrf.mxu0  ;;  %v2512_v31 = vpop.f32.mrf.mxu1 }
 0xae1   :  { %v2519_v26 = vadd.f32 %v2471_v30, %v1910_v25  ;;  %v2521_v27 = vadd.f32 %v2512_v31, %v1983_v7 }
 0xae2   :  { %v2473_v32 = vpop.f32.mrf.mxu0  ;;  %v2514_v19 = vpop.f32.mrf.mxu1 }
 0xae3   :  { %v3332_v28 = vmul.f32 -1.442695, %v2519_v26  ;;  %v2520_v61 = vadd.f32 %v2473_v32, %v1912_v8  ;;  %v2522_v36 = vadd.f32 %v2514_v19, %v1985_v34 }
 0xae4   :  { %v2475_v20 = vpop.f32.mrf.mxu0  ;;  %v2516_v41 = vpop.f32.mrf.mxu1 }
 0xae5   :  { %3713 = vpow2.f32 %v3332_v28  ;;  %v3333_v37 = vmul.f32 -1.442695, %v2520_v61  ;;  %v3334_v23 = vmul.f32 -1.442695, %v2522_v36 }
 0xae6   :  { %v2476_v62 = vpop.f32.mrf.mxu0  ;;  %v2517_v13 = vpop.f32.mrf.mxu1 }
 0xae7   :  { %3715 = vpow2.f32 %v3333_v37  ;;  %v5723_v13 = vld [vmem:[#allocation9_spill] sm:$0xff] }
 0xae8   :  { %3717 = vtanh.f32 %v2521_v27  ;;  %v1916_v34 = vadd.f32 %v5723_v13, %v5179_v38 }
 0xae9   :  { %3719 = vpow2.f32 %v3334_v23 }
 0xaf2   :  { %v3714_v14 = vpop.eup %3713 }
 0xaf3   :  { %v2526_v17 = vadd.f32 1.0, %v3714_v14 }
 0xaf4   :  { %v3716_v15 = vpop.eup %3715 }
 0xaf5   :  { %3721 = vrcp.f32 %v2526_v17  ;;  %v2532_v29 = vadd.f32 1.0, %v3716_v15  ;;  %v3718_v10 = vpop.eup %3717 }
 0xaf6   :  { %v3720_v25 = vpop.eup %3719 }
 0xaf7   :  { %3723 = vrcp.f32 %v2532_v29  ;;  %v2539_v51 = vadd.f32 1.0, %v3720_v25  ;;  %v5724_v25 = vld [vmem:[#allocation7_spill] sm:$0xff] }
 0xaf9   :  { %3725 = vrcp.f32 %v2539_v51 }
 0xb02   :  { %v3722_v30 = vpop.eup %3721 }
 0xb03   :  { %v2543_v8 = vmul.f32 %v3722_v30, %v3718_v10  ;;  %v1989_v30 = vadd.f32 %v5724_v25, %v5189_v39 }
 0xb04   :  { %v3724_v26 = vpop.eup %3723 }
 0xb05   :  { %v2542_v32 = vmul.f32 %v3724_v26, %v5243_v6  ;;  %v5722_v6 = vld [vmem:[#allocation6_spill] sm:$0xff]  ;;  %v5725_v26 = vld [vmem:[#allocation8_spill] sm:$0xff] }
 0xb06   :  { %v3726_v31 = vpop.eup %3725  ;;  %v1914_v41 = vadd.f32 %v5722_v6, %v5171_v33  ;;  %v1987_v51 = vadd.f32 %v5725_v26, %v5194_v12  ;;  %v5387_v26 = vld [vmem:[%s5641_s3 + $0x1e0] ss:$16 sps:$4 sm:$0xff]  }
 0xb07   :  { %v5289_v19 = vadd.f32 %v2543_v8, %v2542_v32 }
 0xb09   :  { %3727 = vtanh.f32 %v5289_v19 }
 0xb16   :  { %v3728_v28 = vpop.eup %3727 }
 0xb17   :  { %v2546_v61 = vmul.f32 %v3728_v28, %v3726_v31 }
 0xb19   :  { %v2551_v20 = vpack.c.bf16 %v2546_v61, %v2546_v61 }
 0xb1b   :  { %2585 = vmatmul.mubr.bf16.vlgmr.msra.gmra.mxu0 %v2551_v20  ;;  %2626 = vmatmul.mubr.bf16.vlgmr.msra.gmra.mxu1 %v2551_v20 }
 0xb1c   :  { %2668 = vmatpush1.bf16.msra.mxu0 %v4888_v44  ;;  %2709 = vmatpush1.bf16.msra.mxu1 %v4893_v24 }
 0xb1d   :  { %2669 = vmatprep.subr.bf16.mxu0 %v4902_v18  ;;  %2710 = vmatprep.subr.bf16.mxu1 %v4907_v16 }
 0xb1e   :  { %2699 = vmatprep.mubr.bf16.mxu0 %v5675_v21  ;;  %2740 = vmatprep.mubr.bf16.mxu1 %v5675_v21 }
 0xb20   :  { %2670 = vmatpush1.bf16.msra.mxu0 %v4912_v9  ;;  %2711 = vmatpush1.bf16.msra.mxu1 %v4917_v1 }
 0xb21   :  { %2671 = vmatprep.subr.bf16.mxu0 %v4926_v22  ;;  %2712 = vmatprep.subr.bf16.mxu1 %v4931_v11 }
 0xb24   :  { %2672 = vmatpush1.bf16.msra.mxu0 %v4936_v45  ;;  %2713 = vmatpush1.bf16.msra.mxu1 %v4941_v46 }
 0xb25   :  { %2673 = vmatprep.subr.bf16.mxu0 %v4950_v47  ;;  %2714 = vmatprep.subr.bf16.mxu1 %v4955_v48 }
 0xb28   :  { %2674 = vmatpush1.bf16.msra.mxu0 %v4960_v49  ;;  %2715 = vmatpush1.bf16.msra.mxu1 %v4965_v50 }
 0xb29   :  { %2675 = vmatprep.subr.bf16.mxu0 %v4974_v54  ;;  %2716 = vmatprep.subr.bf16.mxu1 %v4979_v55 }
 0xb2c   :  { %2676 = vmatpush1.bf16.msra.mxu0 %v4984_v56  ;;  %2717 = vmatpush1.bf16.msra.mxu1 %v4989_v57 }
 0xb2d   :  { %2677 = vmatprep.subr.bf16.mxu0 %v4994_v58  ;;  %2718 = vmatprep.subr.bf16.mxu1 %v4999_v59 }
 0xb30   :  { %2678 = vmatpush1.bf16.msra.mxu0 %v5008_v60  ;;  %2719 = vmatpush1.bf16.msra.mxu1 %v5013_v63 }
 0xb31   :  { %2679 = vmatprep.subr.bf16.mxu0 %v5022_v3  ;;  %2720 = vmatprep.subr.bf16.mxu1 %v5027_v4 }
 0xb34   :  { %2680 = vmatpush1.bf16.msra.mxu0 %v5032_v0  ;;  %2721 = vmatpush1.bf16.msra.mxu1 %v5037_v5 }
 0xb35   :  { %2681 = vmatprep.subr.bf16.mxu0 %v5042_v42  ;;  %2722 = vmatprep.subr.bf16.mxu1 %v5049_v2 }
 0xb38   :  { %2682 = vmatpush1.bf16.msra.mxu0 %v5056_v43  ;;  %2723 = vmatpush1.bf16.msra.mxu1 %v5061_v40 }
 0xb39   :  { %2782 = vmatprep.subr.bf16.mxu0 %v4878_v53  ;;  %2823 = vmatprep.subr.bf16.mxu1 %v4883_v35 }
 0xbdb   :  { %v2586_v37 = vpop.f32.mrf.mxu0  ;;  %v2627_v62 = vpop.f32.mrf.mxu1 }
 0xbdc   :  { %v2634_v36 = vadd.f32 %v2586_v37, %v1914_v41  ;;  %v2636_v32 = vadd.f32 %v2627_v62, %v1987_v51  ;;  %v5393_v51 = vld [vmem:[%s5641_s3 + $0x1e8] ss:$16 sps:$4 sm:$0xff]  }
 0xbdd   :  { %v2588_v52 = vpop.f32.mrf.mxu0  ;;  %v2629_v7 = vpop.f32.mrf.mxu1 }
 0xbde   :  { %v3335_v27 = vmul.f32 -1.442695, %v2634_v36  ;;  %v2635_v23 = vadd.f32 %v2588_v52, %v1916_v34  ;;  %v2637_v8 = vadd.f32 %v2629_v7, %v1989_v30 }
 0xbdf   :  { %v2590_v14 = vpop.f32.mrf.mxu0  ;;  %v2631_v17 = vpop.f32.mrf.mxu1 }
 0xbe0   :  { %3729 = vpow2.f32 %v3335_v27  ;;  %v3336_v15 = vmul.f32 -1.442695, %v2635_v23  ;;  %v3337_v31 = vmul.f32 -1.442695, %v2637_v8 }
 0xbe1   :  { %v2591_v29 = vpop.f32.mrf.mxu0  ;;  %v2632_v10 = vpop.f32.mrf.mxu1 }
 0xbe2   :  { %3731 = vpow2.f32 %v3336_v15 }
 0xbe3   :  { %3733 = vtanh.f32 %v2636_v32  ;;  %v5399_v32 = vld [vmem:[%s5641_s3 + $0x1c4] ss:$16 sps:$4 sm:$0xff]  }
 0xbe4   :  { %3735 = vpow2.f32 %v3337_v31  ;;  %v5405_v31 = vld [vmem:[%s5641_s3 + $0x1cc] ss:$16 sps:$4 sm:$0xff]  }
 0xbed   :  { %v3730_v28 = vpop.eup %3729 }
 0xbee   :  { %v2641_v61 = vadd.f32 1.0, %v3730_v28  ;;  %v5413_v28 = vld [vmem:[%s5641_s3 + $0x1c0] ss:$16 sps:$4 sm:$0xff]  }
 0xbef   :  { %v3732_v20 = vpop.eup %3731 }
 0xbf0   :  { %3737 = vrcp.f32 %v2641_v61  ;;  %v2647_v6 = vadd.f32 1.0, %v3732_v20  ;;  %v3734_v41 = vpop.eup %3733  ;;  %v5419_v61 = vld [vmem:[%s5641_s3 + $0x1c8] ss:$16 sps:$4 sm:$0xff]   ;;  %v5425_v20 = vld [vmem:[%s5641_s3 + $0x1a4] ss:$16 sps:$4 sm:$0xff]  }
 0xbf1   :  { %v3736_v37 = vpop.eup %3735 }
 0xbf2   :  { %3739 = vrcp.f32 %v2647_v6  ;;  %v2654_v52 = vadd.f32 1.0, %v3736_v37  ;;  %v5431_v6 = vld [vmem:[%s5641_s3 + $0x1ac] ss:$16 sps:$4 sm:$0xff]   ;;  %v5443_v37 = vld [vmem:[%s5641_s3 + $0x1a8] ss:$16 sps:$4 sm:$0xff]  }
 0xbf4   :  { %3741 = vrcp.f32 %v2654_v52  ;;  %v5467_v52 = vld [vmem:[%s5641_s3 + $0x188] ss:$16 sps:$4 sm:$0xff]  }
 0xbfd   :  { %v3738_v13 = vpop.eup %3737 }
 0xbfe   :  { %v2658_v34 = vmul.f32 %v3738_v13, %v3734_v41  ;;  %v5437_v41 = vld [vmem:[%s5641_s3 + $0x1a0] ss:$16 sps:$4 sm:$0xff]   ;;  %v5449_v13 = vld [vmem:[%s5641_s3 + $0x184] ss:$16 sps:$4 sm:$0xff]  }
 0xbff   :  { %v3740_v36 = vpop.eup %3739 }
 0xc00   :  { %v2657_v7 = vmul.f32 %v3740_v36, %v5289_v19  ;;  %v5461_v36 = vld [vmem:[%s5641_s3 + $0x180] ss:$16 sps:$4 sm:$0xff]  }
 0xc01   :  { %v3742_v62 = vpop.eup %3741 }
 0xc02   :  { %v5335_v27 = vadd.f32 %v2658_v34, %v2657_v7  ;;  %v5455_v34 = vld [vmem:[%s5641_s3 + $0x18c] ss:$16 sps:$4 sm:$0xff]   ;;  %v5473_v7 = vld [vmem:[%s5641_s3 + $0x164] ss:$16 sps:$4 sm:$0xff]  }
 0xc04   :  { %3743 = vtanh.f32 %v5335_v27 }
 0xc11   :  { %v3744_v23 = vpop.eup %3743 }
 0xc12   :  { %v2661_v14 = vmul.f32 %v3744_v23, %v3742_v62  ;;  %v5485_v62 = vld [vmem:[%s5641_s3 + $0x160] ss:$16 sps:$4 sm:$0xff]   ;;  %v5491_v23 = vld [vmem:[%s5641_s3 + $0x168] ss:$16 sps:$4 sm:$0xff]  }
 0xc14   :  { %v2666_v17 = vpack.c.bf16 %v2661_v14, %v2661_v14  ;;  %v5497_v14 = vld [vmem:[%s5641_s3 + $0x144] ss:$16 sps:$4 sm:$0xff]  }
 0xc16   :  { %2700 = vmatmul.mubr.bf16.vlgmr.msra.gmra.mxu0 %v2666_v17  ;;  %2741 = vmatmul.mubr.bf16.vlgmr.msra.gmra.mxu1 %v2666_v17  ;;  %v5503_v17 = vld [vmem:[%s5641_s3 + $0x14c] ss:$16 sps:$4 sm:$0xff]  }
 0xc17   :  { %2783 = vmatpush1.bf16.msra.mxu0 %v4888_v44  ;;  %2824 = vmatpush1.bf16.msra.mxu1 %v4893_v24  ;;  %v5726_v44 = vld [vmem:[#allocation10_spill] sm:$0xff] }
 0xc18   :  { %2784 = vmatprep.subr.bf16.mxu0 %v4902_v18  ;;  %2825 = vmatprep.subr.bf16.mxu1 %v4907_v16  ;;  %v1920_v24 = vadd.f32 %v5726_v44, %v5171_v33  ;;  %v5509_v44 = vld [vmem:[%s5641_s3 + $0x140] ss:$16 sps:$4 sm:$0xff]  }
 0xc19   :  { %2814 = vmatprep.mubr.bf16.mxu0 %v5675_v21  ;;  %2855 = vmatprep.mubr.bf16.mxu1 %v5675_v21 }
 0xc1b   :  { %2785 = vmatpush1.bf16.msra.mxu0 %v4912_v9  ;;  %2826 = vmatpush1.bf16.msra.mxu1 %v4917_v1  ;;  %v5727_v9 = vld [vmem:[#allocation13_spill] sm:$0xff] }
 0xc1c   :  { %2786 = vmatprep.subr.bf16.mxu0 %v4926_v22  ;;  %2827 = vmatprep.subr.bf16.mxu1 %v4931_v11  ;;  %v1922_v1 = vadd.f32 %v5727_v9, %v5179_v38  ;;  %v5533_v9 = vld [vmem:[%s5641_s3 + $0x120] ss:$16 sps:$4 sm:$0xff]  }
 0xc1f   :  { %2787 = vmatpush1.bf16.msra.mxu0 %v4936_v45  ;;  %2828 = vmatpush1.bf16.msra.mxu1 %v4941_v46 }
 0xc20   :  { %2788 = vmatprep.subr.bf16.mxu0 %v4950_v47  ;;  %2829 = vmatprep.subr.bf16.mxu1 %v4955_v48 }
 0xc23   :  { %2789 = vmatpush1.bf16.msra.mxu0 %v4960_v49  ;;  %2830 = vmatpush1.bf16.msra.mxu1 %v4965_v50 }
 0xc24   :  { %2790 = vmatprep.subr.bf16.mxu0 %v4974_v54  ;;  %2831 = vmatprep.subr.bf16.mxu1 %v4979_v55 }
 0xc27   :  { %2791 = vmatpush1.bf16.msra.mxu0 %v4984_v56  ;;  %2832 = vmatpush1.bf16.msra.mxu1 %v4989_v57  ;;  %v5729_v57 = vld [vmem:[#allocation12_spill] sm:$0xff] }
 0xc28   :  { %2792 = vmatprep.subr.bf16.mxu0 %v4994_v58  ;;  %2833 = vmatprep.subr.bf16.mxu1 %v4999_v59  ;;  %v1993_v58 = vadd.f32 %v5729_v57, %v5194_v12 }
 0xc2b   :  { %2793 = vmatpush1.bf16.msra.mxu0 %v5008_v60  ;;  %2834 = vmatpush1.bf16.msra.mxu1 %v5013_v63 }
 0xc2c   :  { %2794 = vmatprep.subr.bf16.mxu0 %v5022_v3  ;;  %2835 = vmatprep.subr.bf16.mxu1 %v5027_v4 }
 0xc2f   :  { %2795 = vmatpush1.bf16.msra.mxu0 %v5032_v0  ;;  %2836 = vmatpush1.bf16.msra.mxu1 %v5037_v5 }
 0xc30   :  { %2796 = vmatprep.subr.bf16.mxu0 %v5042_v42  ;;  %2837 = vmatprep.subr.bf16.mxu1 %v5049_v2 }
 0xc33   :  { %2797 = vmatpush1.bf16.msra.mxu0 %v5056_v43  ;;  %2838 = vmatpush1.bf16.msra.mxu1 %v5061_v40 }
 0xc34   :  { %2897 = vmatprep.subr.bf16.mxu0 %v4878_v53  ;;  %2938 = vmatprep.subr.bf16.mxu1 %v4883_v35  ;;  %v5728_v35 = vld [vmem:[#allocation11_spill] sm:$0xff] }
 0xc35   :  { %v1995_v55 = vadd.f32 %v5728_v35, %v5189_v39  ;;  %v5731_v35 = vld [vmem:[#allocation17_spill] sm:$0xff] }
 0xcd6   :  { %v2701_v18 = vpop.f32.mrf.mxu0  ;;  %v2742_v16 = vpop.f32.mrf.mxu1 }
 0xcd7   :  { %v2749_v22 = vadd.f32 %v2701_v18, %v1920_v24  ;;  %v2751_v59 = vadd.f32 %v2742_v16, %v1993_v58  ;;  %v5515_v24 = vld [vmem:[%s5641_s3 + $0x148] ss:$16 sps:$4 sm:$0xff]   ;;  %v5521_v18 = vld [vmem:[%s5641_s3 + $0x124] ss:$16 sps:$4 sm:$0xff]   ;;  %v5527_v16 = vld [vmem:[%s5641_s3 + $0x12c] ss:$16 sps:$4 sm:$0xff]  }
 0xcd8   :  { %v2703_v11 = vpop.f32.mrf.mxu0  ;;  %v2744_v45 = vpop.f32.mrf.mxu1 }
 0xcd9   :  { %v3338_v46 = vmul.f32 -1.442695, %v2749_v22  ;;  %v2750_v47 = vadd.f32 %v2703_v11, %v1922_v1  ;;  %v2752_v56 = vadd.f32 %v2744_v45, %v1995_v55  ;;  %v5539_v1 = vld [vmem:[%s5641_s3 + $0x128] ss:$16 sps:$4 sm:$0xff]   ;;  %v5545_v22 = vld [vmem:[%s5641_s3 + $0x104] ss:$16 sps:$4 sm:$0xff]   ;;  %v1926_v55 = vadd.f32 %v5731_v35, %v5179_v38 }
 0xcda   :  { %v2705_v48 = vpop.f32.mrf.mxu0  ;;  %v2746_v49 = vpop.f32.mrf.mxu1  ;;  %v5551_v11 = vld [vmem:[%s5641_s3 + $0x10c] ss:$16 sps:$4 sm:$0xff]   ;;  %v5557_v45 = vld [vmem:[%s5641_s3 + $0x100] ss:$16 sps:$4 sm:$0xff]  }
 0xcdb   :  { %3745 = vpow2.f32 %v3338_v46  ;;  %v3339_v50 = vmul.f32 -1.442695, %v2750_v47  ;;  %v3340_v60 = vmul.f32 -1.442695, %v2752_v56  ;;  %v5563_v46 = vld [vmem:[%s5641_s3 + $0x108] ss:$16 sps:$4 sm:$0xff]  }
 0xcdc   :  { %v2706_v53 = vpop.f32.mrf.mxu0  ;;  %v2747_v54 = vpop.f32.mrf.mxu1  ;;  %v3871_v47 = vld [vmem:[%s5641_s3 + $0x1e4] ss:$16 sps:$4 sm:$0xff]   ;;  %v3872_v48 = vld [vmem:[%s5641_s3 + $0x1ec] ss:$16 sps:$4 sm:$0xff]  }
 0xcdd   :  { %3747 = vpow2.f32 %v3339_v50  ;;  %v5730_v49 = vld [vmem:[#allocation14_spill] sm:$0xff] }
 0xcde   :  { %3749 = vtanh.f32 %v2751_v59  ;;  %v1924_v50 = vadd.f32 %v5730_v49, %v5171_v33 }
 0xcdf   :  { %3751 = vpow2.f32 %v3340_v60 }
 0xce8   :  { %v3746_v63 = vpop.eup %3745 }
 0xce9   :  { %v2756_v3 = vadd.f32 1.0, %v3746_v63 }
 0xcea   :  { %v3748_v4 = vpop.eup %3747 }
 0xceb   :  { %3753 = vrcp.f32 %v2756_v3  ;;  %v2762_v0 = vadd.f32 1.0, %v3748_v4  ;;  %v3750_v5 = vpop.eup %3749 }
 0xcec   :  { %v3752_v42 = vpop.eup %3751 }
 0xced   :  { %3755 = vrcp.f32 %v2762_v0  ;;  %v2769_v19 = vadd.f32 1.0, %v3752_v42  ;;  %v5732_v42 = vld [vmem:[#allocation15_spill] sm:$0xff] }
 0xcef   :  { %3757 = vrcp.f32 %v2769_v19 }
 0xcf8   :  { %v3754_v2 = vpop.eup %3753 }
 0xcf9   :  { %v2773_v43 = vmul.f32 %v3754_v2, %v3750_v5  ;;  %v1999_v2 = vadd.f32 %v5732_v42, %v5189_v39 }
 0xcfa   :  { %v3756_v40 = vpop.eup %3755 }
 0xcfb   :  { %v2772_v15 = vmul.f32 %v3756_v40, %v5335_v27  ;;  %v5479_v27 = vld [vmem:[%s5641_s3 + $0x16c] ss:$16 sps:$4 sm:$0xff]   ;;  %v5733_v40 = vld [vmem:[#allocation16_spill] sm:$0xff] }
 0xcfc   :  { %v3758_v10 = vpop.eup %3757  ;;  %v1997_v19 = vadd.f32 %v5733_v40, %v5194_v12 }
 0xcfd   :  { %v5381_v29 = vadd.f32 %v2773_v43, %v2772_v15 }
 0xcff   :  { %3759 = vtanh.f32 %v5381_v29 }
 0xd0c   :  { %v3760_v25 = vpop.eup %3759 }
 0xd0d   :  { %v2776_v30 = vmul.f32 %v3760_v25, %v3758_v10 }
 0xd0f   :  { %v2781_v8 = vpack.c.bf16 %v2776_v30, %v2776_v30 }
 0xd11   :  { %2815 = vmatmul.mubr.bf16.vlgmr.msra.gmra.mxu0 %v2781_v8  ;;  %2856 = vmatmul.mubr.bf16.vlgmr.msra.gmra.mxu1 %v2781_v8 }
 0xd12   :  { %2898 = vmatpush1.bf16.msra.mxu0 %v5387_v26  ;;  %2939 = vmatpush1.bf16.msra.mxu1 %v5393_v51 }
 0xd13   :  { %2899 = vmatprep.subr.bf16.mxu0 %v5399_v32  ;;  %2940 = vmatprep.subr.bf16.mxu1 %v5405_v31 }
 0xd14   :  { %2929 = vmatprep.mubr.bf16.mxu0 %v5675_v21  ;;  %2970 = vmatprep.mubr.bf16.mxu1 %v5675_v21 }
 0xd16   :  { %2900 = vmatpush1.bf16.msra.mxu0 %v5413_v28  ;;  %2941 = vmatpush1.bf16.msra.mxu1 %v5419_v61 }
 0xd17   :  { %2901 = vmatprep.subr.bf16.mxu0 %v5425_v20  ;;  %2942 = vmatprep.subr.bf16.mxu1 %v5431_v6 }
 0xd1a   :  { %2902 = vmatpush1.bf16.msra.mxu0 %v5437_v41  ;;  %2943 = vmatpush1.bf16.msra.mxu1 %v5443_v37 }
 0xd1b   :  { %2903 = vmatprep.subr.bf16.mxu0 %v5449_v13  ;;  %2944 = vmatprep.subr.bf16.mxu1 %v5455_v34 }
 0xd1e   :  { %2904 = vmatpush1.bf16.msra.mxu0 %v5461_v36  ;;  %2945 = vmatpush1.bf16.msra.mxu1 %v5467_v52 }
 0xd1f   :  { %2905 = vmatprep.subr.bf16.mxu0 %v5473_v7  ;;  %2946 = vmatprep.subr.bf16.mxu1 %v5479_v27 }
 0xd22   :  { %2906 = vmatpush1.bf16.msra.mxu0 %v5485_v62  ;;  %2947 = vmatpush1.bf16.msra.mxu1 %v5491_v23 }
 0xd23   :  { %2907 = vmatprep.subr.bf16.mxu0 %v5497_v14  ;;  %2948 = vmatprep.subr.bf16.mxu1 %v5503_v17 }
 0xd26   :  { %2908 = vmatpush1.bf16.msra.mxu0 %v5509_v44  ;;  %2949 = vmatpush1.bf16.msra.mxu1 %v5515_v24 }
 0xd27   :  { %2909 = vmatprep.subr.bf16.mxu0 %v5521_v18  ;;  %2950 = vmatprep.subr.bf16.mxu1 %v5527_v16 }
 0xd2a   :  { %2910 = vmatpush1.bf16.msra.mxu0 %v5533_v9  ;;  %2951 = vmatpush1.bf16.msra.mxu1 %v5539_v1 }
 0xd2b   :  { %2911 = vmatprep.subr.bf16.mxu0 %v5545_v22  ;;  %2952 = vmatprep.subr.bf16.mxu1 %v5551_v11 }
 0xd2e   :  { %2912 = vmatpush1.bf16.msra.mxu0 %v5557_v45  ;;  %2953 = vmatpush1.bf16.msra.mxu1 %v5563_v46 }
 0xd2f   :  { %3012 = vmatprep.subr.bf16.mxu0 %v3871_v47  ;;  %3053 = vmatprep.subr.bf16.mxu1 %v3872_v48 }
 0xdd1   :  { %v2816_v53 = vpop.f32.mrf.mxu0  ;;  %v2857_v54 = vpop.f32.mrf.mxu1 }
 0xdd2   :  { %v2864_v56 = vadd.f32 %v2816_v53, %v1924_v50  ;;  %v2866_v15 = vadd.f32 %v2857_v54, %v1997_v19 }
 0xdd3   :  { %v2818_v57 = vpop.f32.mrf.mxu0  ;;  %v2859_v58 = vpop.f32.mrf.mxu1 }
 0xdd4   :  { %v3341_v59 = vmul.f32 -1.442695, %v2864_v56  ;;  %v2865_v60 = vadd.f32 %v2818_v57, %v1926_v55  ;;  %v2867_v43 = vadd.f32 %v2859_v58, %v1999_v2 }
 0xdd5   :  { %v2820_v63 = vpop.f32.mrf.mxu0  ;;  %v2861_v3 = vpop.f32.mrf.mxu1 }
 0xdd6   :  { %3761 = vpow2.f32 %v3341_v59  ;;  %v3342_v4 = vmul.f32 -1.442695, %v2865_v60  ;;  %v3343_v10 = vmul.f32 -1.442695, %v2867_v43  ;;  %v5738_v43 = vld [vmem:[#allocation22_spill] sm:$0xff] }
 0xdd7   :  { %v2821_v0 = vpop.f32.mrf.mxu0  ;;  %v2862_v5 = vpop.f32.mrf.mxu1  ;;  %v1934_v40 = vadd.f32 %v5738_v43, %v5171_v33 }
 0xdd8   :  { %3763 = vpow2.f32 %v3342_v4 }
 0xdd9   :  { %3765 = vtanh.f32 %v2866_v15 }
 0xdda   :  { %3767 = vpow2.f32 %v3343_v10  ;;  %v5739_v10 = vld [vmem:[#allocation4_spill] sm:$0xff] }
 0xde3   :  { %v3762_v25 = vpop.eup %3761 }
 0xde4   :  { %v2871_v30 = vadd.f32 1.0, %v3762_v25  ;;  %v1936_v25 = vadd.f32 %v5739_v10, %v5179_v38 }
 0xde5   :  { %v3764_v8 = vpop.eup %3763 }
 0xde6   :  { %3769 = vrcp.f32 %v2871_v30  ;;  %v2877_v47 = vadd.f32 1.0, %v3764_v8  ;;  %v3766_v48 = vpop.eup %3765 }
 0xde7   :  { %v3768_v49 = vpop.eup %3767 }
 0xde8   :  { %3771 = vrcp.f32 %v2877_v47  ;;  %v2884_v55 = vadd.f32 1.0, %v3768_v49 }
 0xdea   :  { %3773 = vrcp.f32 %v2884_v55 }
 0xdf3   :  { %v3770_v50 = vpop.eup %3769 }
 0xdf4   :  { %v2888_v53 = vmul.f32 %v3770_v50, %v3766_v48 }
 0xdf5   :  { %v3772_v35 = vpop.eup %3771 }
 0xdf6   :  { %v2887_v56 = vmul.f32 %v3772_v35, %v5381_v29 }
 0xdf7   :  { %v3774_v54 = vpop.eup %3773 }
 0xdf8   :  { %v5581_v57 = vadd.f32 %v2888_v53, %v2887_v56 }
 0xdfa   :  { %3775 = vtanh.f32 %v5581_v57 }
 0xe07   :  { %v3776_v58 = vpop.eup %3775 }
 0xe08   :  { %v2891_v59 = vmul.f32 %v3776_v58, %v3774_v54  ;;  %v5741_v58 = vld [vmem:[#allocation23_spill] sm:$0xff] }
 0xe0a   :  { %v2896_v60 = vpack.c.bf16 %v2891_v59, %v2891_v59  ;;  %v2007_v59 = vadd.f32 %v5741_v58, %v5194_v12 }
 0xe0c   :  { %2930 = vmatmul.mubr.bf16.vlgmr.msra.gmra.mxu0 %v2896_v60  ;;  %2971 = vmatmul.mubr.bf16.vlgmr.msra.gmra.mxu1 %v2896_v60 }
 0xe0d   :  { %3013 = vmatpush1.bf16.msra.mxu0 %v5387_v26  ;;  %3054 = vmatpush1.bf16.msra.mxu1 %v5393_v51 }
 0xe0e   :  { %3014 = vmatprep.subr.bf16.mxu0 %v5399_v32  ;;  %3055 = vmatprep.subr.bf16.mxu1 %v5405_v31  ;;  %v5735_v32 = vld [vmem:[#allocation21_spill] sm:$0xff] }
 0xe0f   :  { %3044 = vmatprep.mubr.bf16.mxu0 %v5675_v21  ;;  %3085 = vmatprep.mubr.bf16.mxu1 %v5675_v21  ;;  %v5734_v21 = vld [vmem:[#allocation18_spill] sm:$0xff]  ;;  %v1932_v31 = vadd.f32 %v5735_v32, %v5179_v38 }
 0xe10   :  { %v1930_v29 = vadd.f32 %v5734_v21, %v5171_v33 }
 0xe11   :  { %3015 = vmatpush1.bf16.msra.mxu0 %v5413_v28  ;;  %3056 = vmatpush1.bf16.msra.mxu1 %v5419_v61 }
 0xe12   :  { %3016 = vmatprep.subr.bf16.mxu0 %v5425_v20  ;;  %3057 = vmatprep.subr.bf16.mxu1 %v5431_v6 }
 0xe15   :  { %3017 = vmatpush1.bf16.msra.mxu0 %v5437_v41  ;;  %3058 = vmatpush1.bf16.msra.mxu1 %v5443_v37 }
 0xe16   :  { %3018 = vmatprep.subr.bf16.mxu0 %v5449_v13  ;;  %3059 = vmatprep.subr.bf16.mxu1 %v5455_v34 }
 0xe19   :  { %3019 = vmatpush1.bf16.msra.mxu0 %v5461_v36  ;;  %3060 = vmatpush1.bf16.msra.mxu1 %v5467_v52 }
 0xe1a   :  { %3020 = vmatprep.subr.bf16.mxu0 %v5473_v7  ;;  %3061 = vmatprep.subr.bf16.mxu1 %v5479_v27  ;;  %v5736_v7 = vld [vmem:[#allocation19_spill] sm:$0xff] }
 0xe1b   :  { %v2005_v27 = vadd.f32 %v5736_v7, %v5189_v39 }
 0xe1d   :  { %3021 = vmatpush1.bf16.msra.mxu0 %v5485_v62  ;;  %3062 = vmatpush1.bf16.msra.mxu1 %v5491_v23  ;;  %v5737_v23 = vld [vmem:[#allocation20_spill] sm:$0xff] }
 0xe1e   :  { %3022 = vmatprep.subr.bf16.mxu0 %v5497_v14  ;;  %3063 = vmatprep.subr.bf16.mxu1 %v5503_v17  ;;  %v2003_v14 = vadd.f32 %v5737_v23, %v5194_v12 }
 0xe21   :  { %3023 = vmatpush1.bf16.msra.mxu0 %v5509_v44  ;;  %3064 = vmatpush1.bf16.msra.mxu1 %v5515_v24 }
 0xe22   :  { %3024 = vmatprep.subr.bf16.mxu0 %v5521_v18  ;;  %3065 = vmatprep.subr.bf16.mxu1 %v5527_v16 }
 0xe25   :  { %3025 = vmatpush1.bf16.msra.mxu0 %v5533_v9  ;;  %3066 = vmatpush1.bf16.msra.mxu1 %v5539_v1 }
 0xe26   :  { %3026 = vmatprep.subr.bf16.mxu0 %v5545_v22  ;;  %3067 = vmatprep.subr.bf16.mxu1 %v5551_v11 }
 0xe29   :  { %3027 = vmatpush1.bf16.msra.mxu0 %v5557_v45  ;;  %3068 = vmatpush1.bf16.msra.mxu1 %v5563_v46 }
 0xecc   :  { %v2931_v26 = vpop.f32.mrf.mxu0  ;;  %v2972_v51 = vpop.f32.mrf.mxu1 }
 0xecd   :  { %v2979_v28 = vadd.f32 %v2931_v26, %v1930_v29  ;;  %v2981_v17 = vadd.f32 %v2972_v51, %v2003_v14 }
 0xece   :  { %v2933_v61 = vpop.f32.mrf.mxu0  ;;  %v2974_v20 = vpop.f32.mrf.mxu1 }
 0xecf   :  { %v3344_v6 = vmul.f32 -1.442695, %v2979_v28  ;;  %v2980_v41 = vadd.f32 %v2933_v61, %v1932_v31  ;;  %v2982_v62 = vadd.f32 %v2974_v20, %v2005_v27 }
 0xed0   :  { %v2935_v37 = vpop.f32.mrf.mxu0  ;;  %v2976_v13 = vpop.f32.mrf.mxu1 }
 0xed1   :  { %3777 = vpow2.f32 %v3344_v6  ;;  %v3345_v34 = vmul.f32 -1.442695, %v2980_v41  ;;  %v3346_v44 = vmul.f32 -1.442695, %v2982_v62 }
 0xed2   :  { %v2936_v36 = vpop.f32.mrf.mxu0  ;;  %v2977_v52 = vpop.f32.mrf.mxu1 }
 0xed3   :  { %3779 = vpow2.f32 %v3345_v34 }
 0xed4   :  { %3781 = vtanh.f32 %v2981_v17 }
 0xed5   :  { %3783 = vpow2.f32 %v3346_v44 }
 0xede   :  { %v3778_v24 = vpop.eup %3777 }
 0xedf   :  { %v2986_v18 = vadd.f32 1.0, %v3778_v24 }
 0xee0   :  { %v3780_v16 = vpop.eup %3779 }
 0xee1   :  { %3785 = vrcp.f32 %v2986_v18  ;;  %v2992_v9 = vadd.f32 1.0, %v3780_v16  ;;  %v3782_v1 = vpop.eup %3781 }
 0xee2   :  { %v3784_v22 = vpop.eup %3783 }
 0xee3   :  { %3787 = vrcp.f32 %v2992_v9  ;;  %v2999_v63 = vadd.f32 1.0, %v3784_v22 }
 0xee5   :  { %3789 = vrcp.f32 %v2999_v63 }
 0xeee   :  { %v3786_v11 = vpop.eup %3785 }
 0xeef   :  { %v3003_v45 = vmul.f32 %v3786_v11, %v3782_v1 }
 0xef0   :  { %v3788_v46 = vpop.eup %3787 }
 0xef1   :  { %v3002_v3 = vmul.f32 %v3788_v46, %v5581_v57  ;;  %v5740_v57 = vld [vmem:[#allocation24_spill] sm:$0xff] }
 0xef2   :  { %v3790_v0 = vpop.eup %3789  ;;  %v2009_v33 = vadd.f32 %v5740_v57, %v5189_v39 }
 0xef3   :  { %v3004_v4 = vadd.f32 %v3003_v45, %v3002_v3 }
 0xef5   :  { %3791 = vtanh.f32 %v3004_v4 }
 0xf02   :  { %v3792_v5 = vpop.eup %3791 }
 0xf03   :  { %v3006_v42 = vmul.f32 %v3792_v5, %v3790_v0 }
 0xf05   :  { %v3011_v2 = vpack.c.bf16 %v3006_v42, %v3006_v42 }
 0xf07   :  { %3045 = vmatmul.mubr.bf16.vlgmr.msra.gmra.mxu0 %v3011_v2  ;;  %3086 = vmatmul.mubr.bf16.vlgmr.msra.gmra.mxu1 %v3011_v2 }
 0xfc7   :  { %v3046_v19 = vpop.f32.mrf.mxu0  ;;  %v3087_v15 = vpop.f32.mrf.mxu1 }
 0xfc8   :  { %v3094_v30 = vadd.f32 %v3046_v19, %v1934_v40  ;;  %v3096_v38 = vadd.f32 %v3087_v15, %v2007_v59 }
 0xfc9   :  { %v3048_v8 = vpop.f32.mrf.mxu0  ;;  %v3089_v47 = vpop.f32.mrf.mxu1 }
 0xfca   :  { %v3347_v48 = vmul.f32 -1.442695, %v3094_v30  ;;  %v3095_v49 = vadd.f32 %v3048_v8, %v1936_v25  ;;  %v3097_v54 = vadd.f32 %v3089_v47, %v2009_v33 }
 0xfcb   :  { %v3050_v50 = vpop.f32.mrf.mxu0  ;;  %v3091_v53 = vpop.f32.mrf.mxu1 }
 0xfcc   :  { %3793 = vpow2.f32 %v3347_v48  ;;  %v3348_v35 = vmul.f32 -1.442695, %v3095_v49  ;;  %v3349_v60 = vmul.f32 -1.442695, %v3097_v54 }
 0xfcd   :  { %v3051_v55 = vpop.f32.mrf.mxu0  ;;  %v3092_v56 = vpop.f32.mrf.mxu1 }
 0xfce   :  { %3795 = vpow2.f32 %v3348_v35 }
 0xfcf   :  { %3797 = vtanh.f32 %v3096_v38 }
 0xfd0   :  { %3799 = vpow2.f32 %v3349_v60 }
 0xfd9   :  { %v3794_v21 = vpop.eup %3793 }
 0xfda   :  { %v3101_v29 = vadd.f32 1.0, %v3794_v21 }
 0xfdb   :  { %v3796_v26 = vpop.eup %3795 }
 0xfdc   :  { %3801 = vrcp.f32 %v3101_v29  ;;  %v3107_v51 = vadd.f32 1.0, %v3796_v26  ;;  %v3798_v32 = vpop.eup %3797 }
 0xfdd   :  { %v3800_v31 = vpop.eup %3799 }
 0xfde   :  { %3803 = vrcp.f32 %v3107_v51  ;;  %v3114_v39 = vadd.f32 1.0, %v3800_v31 }
 0xfe0   :  { %3805 = vrcp.f32 %v3114_v39 }
 0xfe9   :  { %v3802_v28 = vpop.eup %3801 }
 0xfea   :  { %v3118_v61 = vmul.f32 %v3802_v28, %v3798_v32 }
 0xfeb   :  { %v3804_v20 = vpop.eup %3803 }
 0xfec   :  { %v3117_v6 = vmul.f32 %v3804_v20, %v3004_v4 }
 0xfed   :  { %v3806_v12 = vpop.eup %3805 }
 0xfee   :  { %v3119_v41 = vadd.f32 %v3118_v61, %v3117_v6 }
 0xff0   :  { %3807 = vtanh.f32 %v3119_v41  ;;  %3351 = vst [vmem:[%s5644_s7 + $0x8] sm:$0xff] %v3119_v41 }
 0xffd   :  { %v3808_v37 = vpop.eup %3807 }
 0xffe   :  { %v3121_v13 = vmul.f32 %v3808_v37, %v3806_v12 }
0x1000   :  { %3350 = vst [vmem:[%s5645_s6 + $0x8] sm:$0xff] %v3121_v13 }

</bundles_post_ra>
